<compile_context>
chip_gen: v5e
topology: v5e:2x2
jax: 0.10.0
libtpu: 0.0.40
codegen_flags: <defaults>
</compile_context>

<pallas_src>
import functools

import jax
import jax.numpy as jnp
from jax import lax
from jax.experimental import pallas as pl
from jax.experimental.pallas import tpu as pltpu


# ----------------------------------------------------------------------------
# Fused Pallas kernel (all LSTM layers, both directions, FC head)
# ----------------------------------------------------------------------------
def _make_fused_kernel(num_layers, T, B, H):
    """Build the fused kernel closure for static (num_layers, T, B, H)."""
    n_w_refs = num_layers * 2 * 3  # per layer, per direction: (w_ih_t, w_hh_t, bias)

    def kernel(*refs):
        # ---- unpack refs: inputs..., output, scratch... --------------------
        x_ref = refs[0]                              # (T*B, Din)       VMEM
        w_refs = refs[1:1 + n_w_refs]
        fc_w_ref = refs[1 + n_w_refs]                # (2H, O)
        fc_b_ref = refs[2 + n_w_refs]                # (1, O)
        out_ref = refs[3 + n_w_refs]                 # (B, O)
        fwd0, bwd0, fwd1, bwd1 = refs[4 + n_w_refs:]  # (T*B, H) ping-pong buffers

        layer_w = []
        k = 0
        for _ in range(num_layers):
            dirs = []
            for _ in range(2):                       # 0 = forward, 1 = backward
                dirs.append((w_refs[k], w_refs[k + 1], w_refs[k + 2]))
                k += 3
            layer_w.append(dirs)

        def run_direction(x_mat, wih_ref, whh_ref, b_ref, out_buf, reverse):
            # Hoisted input projection: one batched MXU matmul (+ fused bias)
            # for the whole sequence, off the serial recurrence chain.
            xp = (jnp.dot(x_mat, wih_ref[...],
                          preferred_element_type=jnp.float32) + b_ref[...])
            whh = whh_ref[...]                       # load once per direction
            h = jnp.zeros((B, H), jnp.float32)
            c = jnp.zeros((B, H), jnp.float32)
            # T is small & static -> fully unrolled recurrence with static slices.
            for t in range(T):
                tt = (T - 1 - t) if reverse else t   # reversal = index math only
                row = tt * B
                gates = xp[row:row + B, :] + jnp.dot(
                    h, whh, preferred_element_type=jnp.float32)
                sg = jax.nn.sigmoid(gates)           # one full 4H-wide EUP pass
                tg = jnp.tanh(gates)                 # one full 4H-wide EUP pass
                i = sg[:, 0 * H:1 * H]
                f = sg[:, 1 * H:2 * H]
                g = tg[:, 2 * H:3 * H]
                o = sg[:, 3 * H:4 * H]
                c = f * c + i * g
                h = o * jnp.tanh(c)
                out_buf[row:row + B, :] = h          # aligned, VMEM-resident

        # ---- stacked bidirectional layers, everything VMEM-resident --------
        bufs = ((fwd0, bwd0), (fwd1, bwd1))
        cur = x_ref[...].astype(jnp.float32)         # (T*B, Din)
        for layer in range(num_layers):
            f_buf, b_buf = bufs[layer % 2]
            (wih_f, whh_f, bias_f), (wih_b, whh_b, bias_b) = layer_w[layer]
            run_direction(cur, wih_f, whh_f, bias_f, f_buf, reverse=False)
            run_direction(cur, wih_b, whh_b, bias_b, b_buf, reverse=True)
            cur = jnp.concatenate([f_buf[...], b_buf[...]], axis=-1)  # (T*B, 2H)

        # ---- FC head on out[:, -1, :], fused (no extra launch) -------------
        last = cur[(T - 1) * B:(T - 1) * B + B, :]   # (B, 2H)
        out_ref[...] = (
            jnp.dot(last, fc_w_ref[...], preferred_element_type=jnp.float32)
            + fc_b_ref[...]
        ).astype(out_ref.dtype)

    return kernel


# ----------------------------------------------------------------------------
# Forward pass equivalent to DeepQNetwork.forward (single pallas_call)
# ----------------------------------------------------------------------------
@jax.jit
def deep_q_network_forward(params, x):
    """x: (B, T, input_size), batch_first like PyTorch. Returns (B, output_size)."""
    B, T, Din = x.shape
    num_layers = len(params["lstm"])
    H = params["lstm"][0][0]["w_hh_t"].shape[0]
    O = params["fc"]["w_t"].shape[1]

    # batch_first -> time-major, flattened to (T*B, Din): row t*B + b is
    # (timestep t, batch b). Keeps the kernel free of in-kernel reshapes and lets
    # the whole-sequence input projection be a single 2-D matmul.
    x_flat = jnp.transpose(x, (1, 0, 2)).reshape(T * B, Din).astype(jnp.float32)

    inputs = [x_flat]
    for layer in params["lstm"]:
        for d in layer:
            inputs += [d["w_ih_t"], d["w_hh_t"], d["bias"]]
    inputs += [params["fc"]["w_t"], params["fc"]["b"]]

    vmem = pl.BlockSpec(memory_space=pltpu.MemorySpace.VMEM)
    kernel = _make_fused_kernel(num_layers, T, B, H)
    # Total VMEM footprint (activations + weights) is a few tens of KB at these
    # shapes; well under the scoped limit on v5e/v6e/v7x. Set vmem_limit_bytes
    # explicitly only if B/T/H are scaled into the tens of MB.
    return pl.pallas_call(
        kernel,
        out_shape=jax.ShapeDtypeStruct((B, O), jnp.float32),
        in_specs=[vmem] * len(inputs),
        out_specs=vmem,
        scratch_shapes=[
            pltpu.VMEM((T * B, H), jnp.float32),   # fwd output, even layers
            pltpu.VMEM((T * B, H), jnp.float32),   # bwd output, even layers
            pltpu.VMEM((T * B, H), jnp.float32),   # fwd output, odd layers
            pltpu.VMEM((T * B, H), jnp.float32),   # bwd output, odd layers
        ],
    )(*inputs)


# ----------------------------------------------------------------------------
# Parameter construction (deterministic, PyTorch-style uniform init)
# ----------------------------------------------------------------------------
def init_params(key, input_size, hidden_size, num_layers, output_size):
    """Mimics nn.LSTM / nn.Linear default init: U(-1/sqrt(H), 1/sqrt(H))."""
    params = {"lstm": [], "fc": None}
    bound = 1.0 / jnp.sqrt(jnp.float32(hidden_size))
    H = hidden_size
    for layer in range(num_layers):
        din = input_size if layer == 0 else 2 * hidden_size
        layer_params = []
        for _direction in range(2):  # 0 = forward, 1 = backward
            key, k1, k2, k3, k4 = jax.random.split(key, 5)
            w_ih = jax.random.uniform(k1, (4 * H, din), jnp.float32, -bound, bound)
            w_hh = jax.random.uniform(k2, (4 * H, H), jnp.float32, -bound, bound)
            b_ih = jax.random.uniform(k3, (4 * H,), jnp.float32, -bound, bound)
            b_hh = jax.random.uniform(k4, (4 * H,), jnp.float32, -bound, bound)
            layer_params.append(
                dict(
                    w_ih_t=w_ih.T,                # (din, 4H)
                    w_hh_t=w_hh.T,                # (H,   4H)
                    bias=(b_ih + b_hh)[None, :],  # (1,   4H)
                )
            )
        params["lstm"].append(layer_params)

    key, k1, k2 = jax.random.split(key, 3)
    fc_bound = 1.0 / jnp.sqrt(jnp.float32(2 * hidden_size))
    fc_w = jax.random.uniform(
        k1, (output_size, 2 * hidden_size), jnp.float32, -fc_bound, fc_bound
    )
    fc_b = jax.random.uniform(k2, (output_size,), jnp.float32, -fc_bound, fc_bound)
    params["fc"] = dict(w_t=fc_w.T, b=fc_b[None, :])
    return params


# ----------------------------------------------------------------------------
# Pure-JAX reference (same semantics) for a cheap correctness check
# ----------------------------------------------------------------------------
def _reference_forward(params, x):
    x_tbf = jnp.transpose(x, (1, 0, 2)).astype(jnp.float32)  # (T, B, Din)
    H = params["lstm"][0][0]["w_hh_t"].shape[0]
    B = x.shape[0]

    def run_dir(seq, p):
        def step(carry, x_t):
            h, c = carry
            gates = x_t @ p["w_ih_t"] + h @ p["w_hh_t"] + p["bias"]
            i = jax.nn.sigmoid(gates[:, 0 * H:1 * H])
            f = jax.nn.sigmoid(gates[:, 1 * H:2 * H])
            g = jnp.tanh(gates[:, 2 * H:3 * H])
            o = jax.nn.sigmoid(gates[:, 3 * H:4 * H])
            c = f * c + i * g
            h = o * jnp.tanh(c)
            return (h, c), h

        init = (jnp.zeros((B, H), jnp.float32), jnp.zeros((B, H), jnp.float32))
        _, hs = lax.scan(step, init, seq)
        return hs

    cur = x_tbf
    for p_f, p_b in params["lstm"]:
        out_f = run_dir(cur, p_f)
        out_b = jnp.flip(run_dir(jnp.flip(cur, 0), p_b), 0)
        cur = jnp.concatenate([out_f, out_b], axis=-1)
    last = cur[-1]
    return last @ params["fc"]["w_t"] + params["fc"]["b"]


# ----------------------------------------------------------------------------
# Main
# ----------------------------------------------------------------------------
if __name__ == "__main__":
    batch = 2
    seq_len = 8
    input_size = 32
    hidden_size = 32
    num_layers = 2
    output_size = 4

    key = jax.random.PRNGKey(0)
    key, pkey, xkey = jax.random.split(key, 3)

    params = init_params(pkey, input_size, hidden_size, num_layers, output_size)
    x = jax.random.normal(xkey, (batch, seq_len, input_size), dtype=jnp.float32)

    out = deep_q_network_forward(params, x)
    out = jax.block_until_ready(out)

    assert out.shape == (batch, output_size), out.shape
    assert out.dtype == jnp.float32

    ref = _reference_forward(params, x)
    assert bool(jnp.allclose(out, ref, atol=1e-4, rtol=1e-4)), (
        "kernel/reference mismatch: max abs err = "
        f"{float(jnp.max(jnp.abs(out - ref)))}"
    )
    print("KERNEL_OK")
</pallas_src>

<mosaic_0001>
module attributes {stable_mosaic.version = 11 : i64} {
  func.func @kernel(%arg0: memref<16x32xf32, #tpu.memory_space<vmem>>, %arg1: memref<32x128xf32, #tpu.memory_space<vmem>>, %arg2: memref<32x128xf32, #tpu.memory_space<vmem>>, %arg3: memref<1x128xf32, #tpu.memory_space<vmem>>, %arg4: memref<32x128xf32, #tpu.memory_space<vmem>>, %arg5: memref<32x128xf32, #tpu.memory_space<vmem>>, %arg6: memref<1x128xf32, #tpu.memory_space<vmem>>, %arg7: memref<64x128xf32, #tpu.memory_space<vmem>>, %arg8: memref<32x128xf32, #tpu.memory_space<vmem>>, %arg9: memref<1x128xf32, #tpu.memory_space<vmem>>, %arg10: memref<64x128xf32, #tpu.memory_space<vmem>>, %arg11: memref<32x128xf32, #tpu.memory_space<vmem>>, %arg12: memref<1x128xf32, #tpu.memory_space<vmem>>, %arg13: memref<64x4xf32, #tpu.memory_space<vmem>>, %arg14: memref<1x4xf32, #tpu.memory_space<vmem>>, %arg15: memref<2x4xf32, #tpu.memory_space<vmem>>, %arg16: memref<16x32xf32, #tpu.memory_space<vmem>>, %arg17: memref<16x32xf32, #tpu.memory_space<vmem>>, %arg18: memref<16x32xf32, #tpu.memory_space<vmem>>, %arg19: memref<16x32xf32, #tpu.memory_space<vmem>>) attributes {dimension_semantics = [], scalar_prefetch = 0 : i64, scratch_operands = 4 : i64, tpu.core_type = #tpu.core_type<tc>} {
    %c0 = arith.constant 0 : index
    %c0_0 = arith.constant 0 : index
    %0 = vector.load %arg0[%c0, %c0_0] : memref<16x32xf32, #tpu.memory_space<vmem>>, vector<16x32xf32>
    %c0_1 = arith.constant 0 : index
    %c0_2 = arith.constant 0 : index
    %1 = vector.load %arg1[%c0_1, %c0_2] : memref<32x128xf32, #tpu.memory_space<vmem>>, vector<32x128xf32>
    %cst = arith.constant dense<0.000000e+00> : vector<16x128xf32>
    %2 = tpu.matmul %0, %1, %cst {dimension_numbers = #tpu.dot_dimension_numbers<[1], [0], [0], [1], [0, 0, 1, 1], [], []>} : vector<16x32xf32>, vector<32x128xf32>, vector<16x128xf32> -> vector<16x128xf32>
    %c0_3 = arith.constant 0 : index
    %c0_4 = arith.constant 0 : index
    %3 = vector.load %arg3[%c0_3, %c0_4] : memref<1x128xf32, #tpu.memory_space<vmem>>, vector<1x128xf32>
    %4 = vector.broadcast %3 : vector<1x128xf32> to vector<16x128xf32>
    %5 = arith.addf %2, %4 : vector<16x128xf32>
    %c0_5 = arith.constant 0 : index
    %c0_6 = arith.constant 0 : index
    %6 = vector.load %arg2[%c0_5, %c0_6] : memref<32x128xf32, #tpu.memory_space<vmem>>, vector<32x128xf32>
    %cst_7 = arith.constant 0.000000e+00 : f32
    %7 = vector.broadcast %cst_7 : f32 to vector<2x32xf32>
    %cst_8 = arith.constant 0.000000e+00 : f32
    %8 = vector.broadcast %cst_8 : f32 to vector<2x32xf32>
    %9 = vector.extract_strided_slice %5 {offsets = [0, 0], sizes = [2, 128], strides = [1, 1]} : vector<16x128xf32> to vector<2x128xf32>
    %cst_9 = arith.constant dense<0.000000e+00> : vector<2x128xf32>
    %10 = tpu.matmul %7, %6, %cst_9 {dimension_numbers = #tpu.dot_dimension_numbers<[1], [0], [0], [1], [0, 0, 1, 1], [], []>} : vector<2x32xf32>, vector<32x128xf32>, vector<2x128xf32> -> vector<2x128xf32>
    %11 = arith.addf %9, %10 : vector<2x128xf32>
    %12 = arith.negf %11 : vector<2x128xf32>
    %13 = math.exp %12 : vector<2x128xf32>
    %cst_10 = arith.constant 1.000000e+00 : f32
    %14 = vector.broadcast %cst_10 : f32 to vector<2x128xf32>
    %15 = arith.addf %14, %13 : vector<2x128xf32>
    %16 = arith.divf %14, %15 : vector<2x128xf32>
    %17 = math.tanh %11 : vector<2x128xf32>
    %18 = vector.extract_strided_slice %16 {offsets = [0, 0], sizes = [2, 32], strides = [1, 1]} : vector<2x128xf32> to vector<2x32xf32>
    %19 = vector.extract_strided_slice %16 {offsets = [0, 32], sizes = [2, 32], strides = [1, 1]} : vector<2x128xf32> to vector<2x32xf32>
    %20 = vector.extract_strided_slice %17 {offsets = [0, 64], sizes = [2, 32], strides = [1, 1]} : vector<2x128xf32> to vector<2x32xf32>
    %21 = vector.extract_strided_slice %16 {offsets = [0, 96], sizes = [2, 32], strides = [1, 1]} : vector<2x128xf32> to vector<2x32xf32>
    %22 = arith.mulf %19, %8 : vector<2x32xf32>
    %23 = arith.mulf %18, %20 : vector<2x32xf32>
    %24 = arith.addf %22, %23 : vector<2x32xf32>
    %25 = math.tanh %24 : vector<2x32xf32>
    %26 = arith.mulf %21, %25 : vector<2x32xf32>
    %c0_11 = arith.constant 0 : index
    %c0_12 = arith.constant 0 : index
    %27 = vector.load %arg16[%c0_11, %c0_12] : memref<16x32xf32, #tpu.memory_space<vmem>>, vector<2x32xf32>
    tpu.vector_store %arg16[%c0_11, %c0_12], %26 {strides = array<i32>} : memref<16x32xf32, #tpu.memory_space<vmem>>, vector<2x32xf32>,
    %28 = vector.extract_strided_slice %5 {offsets = [2, 0], sizes = [2, 128], strides = [1, 1]} : vector<16x128xf32> to vector<2x128xf32>
    %cst_13 = arith.constant dense<0.000000e+00> : vector<2x128xf32>
    %29 = tpu.matmul %26, %6, %cst_13 {dimension_numbers = #tpu.dot_dimension_numbers<[1], [0], [0], [1], [0, 0, 1, 1], [], []>} : vector<2x32xf32>, vector<32x128xf32>, vector<2x128xf32> -> vector<2x128xf32>
    %30 = arith.addf %28, %29 : vector<2x128xf32>
    %31 = arith.negf %30 : vector<2x128xf32>
    %32 = math.exp %31 : vector<2x128xf32>
    %cst_14 = arith.constant 1.000000e+00 : f32
    %33 = vector.broadcast %cst_14 : f32 to vector<2x128xf32>
    %34 = arith.addf %33, %32 : vector<2x128xf32>
    %35 = arith.divf %33, %34 : vector<2x128xf32>
    %36 = math.tanh %30 : vector<2x128xf32>
    %37 = vector.extract_strided_slice %35 {offsets = [0, 0], sizes = [2, 32], strides = [1, 1]} : vector<2x128xf32> to vector<2x32xf32>
    %38 = vector.extract_strided_slice %35 {offsets = [0, 32], sizes = [2, 32], strides = [1, 1]} : vector<2x128xf32> to vector<2x32xf32>
    %39 = vector.extract_strided_slice %36 {offsets = [0, 64], sizes = [2, 32], strides = [1, 1]} : vector<2x128xf32> to vector<2x32xf32>
    %40 = vector.extract_strided_slice %35 {offsets = [0, 96], sizes = [2, 32], strides = [1, 1]} : vector<2x128xf32> to vector<2x32xf32>
    %41 = arith.mulf %38, %24 : vector<2x32xf32>
    %42 = arith.mulf %37, %39 : vector<2x32xf32>
    %43 = arith.addf %41, %42 : vector<2x32xf32>
    %44 = math.tanh %43 : vector<2x32xf32>
    %45 = arith.mulf %40, %44 : vector<2x32xf32>
    %c2 = arith.constant 2 : index
    %c0_15 = arith.constant 0 : index
    %46 = vector.load %arg16[%c2, %c0_15] : memref<16x32xf32, #tpu.memory_space<vmem>>, vector<2x32xf32>
    tpu.vector_store %arg16[%c2, %c0_15], %45 {strides = array<i32>} : memref<16x32xf32, #tpu.memory_space<vmem>>, vector<2x32xf32>,
    %47 = vector.extract_strided_slice %5 {offsets = [4, 0], sizes = [2, 128], strides = [1, 1]} : vector<16x128xf32> to vector<2x128xf32>
    %cst_16 = arith.constant dense<0.000000e+00> : vector<2x128xf32>
    %48 = tpu.matmul %45, %6, %cst_16 {dimension_numbers = #tpu.dot_dimension_numbers<[1], [0], [0], [1], [0, 0, 1, 1], [], []>} : vector<2x32xf32>, vector<32x128xf32>, vector<2x128xf32> -> vector<2x128xf32>
    %49 = arith.addf %47, %48 : vector<2x128xf32>
    %50 = arith.negf %49 : vector<2x128xf32>
    %51 = math.exp %50 : vector<2x128xf32>
    %cst_17 = arith.constant 1.000000e+00 : f32
    %52 = vector.broadcast %cst_17 : f32 to vector<2x128xf32>
    %53 = arith.addf %52, %51 : vector<2x128xf32>
    %54 = arith.divf %52, %53 : vector<2x128xf32>
    %55 = math.tanh %49 : vector<2x128xf32>
    %56 = vector.extract_strided_slice %54 {offsets = [0, 0], sizes = [2, 32], strides = [1, 1]} : vector<2x128xf32> to vector<2x32xf32>
    %57 = vector.extract_strided_slice %54 {offsets = [0, 32], sizes = [2, 32], strides = [1, 1]} : vector<2x128xf32> to vector<2x32xf32>
    %58 = vector.extract_strided_slice %55 {offsets = [0, 64], sizes = [2, 32], strides = [1, 1]} : vector<2x128xf32> to vector<2x32xf32>
    %59 = vector.extract_strided_slice %54 {offsets = [0, 96], sizes = [2, 32], strides = [1, 1]} : vector<2x128xf32> to vector<2x32xf32>
    %60 = arith.mulf %57, %43 : vector<2x32xf32>
    %61 = arith.mulf %56, %58 : vector<2x32xf32>
    %62 = arith.addf %60, %61 : vector<2x32xf32>
    %63 = math.tanh %62 : vector<2x32xf32>
    %64 = arith.mulf %59, %63 : vector<2x32xf32>
    %c4 = arith.constant 4 : index
    %c0_18 = arith.constant 0 : index
    %65 = vector.load %arg16[%c4, %c0_18] : memref<16x32xf32, #tpu.memory_space<vmem>>, vector<2x32xf32>
    tpu.vector_store %arg16[%c4, %c0_18], %64 {strides = array<i32>} : memref<16x32xf32, #tpu.memory_space<vmem>>, vector<2x32xf32>,
    %66 = vector.extract_strided_slice %5 {offsets = [6, 0], sizes = [2, 128], strides = [1, 1]} : vector<16x128xf32> to vector<2x128xf32>
    %cst_19 = arith.constant dense<0.000000e+00> : vector<2x128xf32>
    %67 = tpu.matmul %64, %6, %cst_19 {dimension_numbers = #tpu.dot_dimension_numbers<[1], [0], [0], [1], [0, 0, 1, 1], [], []>} : vector<2x32xf32>, vector<32x128xf32>, vector<2x128xf32> -> vector<2x128xf32>
    %68 = arith.addf %66, %67 : vector<2x128xf32>
    %69 = arith.negf %68 : vector<2x128xf32>
    %70 = math.exp %69 : vector<2x128xf32>
    %cst_20 = arith.constant 1.000000e+00 : f32
    %71 = vector.broadcast %cst_20 : f32 to vector<2x128xf32>
    %72 = arith.addf %71, %70 : vector<2x128xf32>
    %73 = arith.divf %71, %72 : vector<2x128xf32>
    %74 = math.tanh %68 : vector<2x128xf32>
    %75 = vector.extract_strided_slice %73 {offsets = [0, 0], sizes = [2, 32], strides = [1, 1]} : vector<2x128xf32> to vector<2x32xf32>
    %76 = vector.extract_strided_slice %73 {offsets = [0, 32], sizes = [2, 32], strides = [1, 1]} : vector<2x128xf32> to vector<2x32xf32>
    %77 = vector.extract_strided_slice %74 {offsets = [0, 64], sizes = [2, 32], strides = [1, 1]} : vector<2x128xf32> to vector<2x32xf32>
    %78 = vector.extract_strided_slice %73 {offsets = [0, 96], sizes = [2, 32], strides = [1, 1]} : vector<2x128xf32> to vector<2x32xf32>
    %79 = arith.mulf %76, %62 : vector<2x32xf32>
    %80 = arith.mulf %75, %77 : vector<2x32xf32>
    %81 = arith.addf %79, %80 : vector<2x32xf32>
    %82 = math.tanh %81 : vector<2x32xf32>
    %83 = arith.mulf %78, %82 : vector<2x32xf32>
    %c6 = arith.constant 6 : index
    %c0_21 = arith.constant 0 : index
    %84 = vector.load %arg16[%c6, %c0_21] : memref<16x32xf32, #tpu.memory_space<vmem>>, vector<2x32xf32>
    tpu.vector_store %arg16[%c6, %c0_21], %83 {strides = array<i32>} : memref<16x32xf32, #tpu.memory_space<vmem>>, vector<2x32xf32>,
    %85 = vector.extract_strided_slice %5 {offsets = [8, 0], sizes = [2, 128], strides = [1, 1]} : vector<16x128xf32> to vector<2x128xf32>
    %cst_22 = arith.constant dense<0.000000e+00> : vector<2x128xf32>
    %86 = tpu.matmul %83, %6, %cst_22 {dimension_numbers = #tpu.dot_dimension_numbers<[1], [0], [0], [1], [0, 0, 1, 1], [], []>} : vector<2x32xf32>, vector<32x128xf32>, vector<2x128xf32> -> vector<2x128xf32>
    %87 = arith.addf %85, %86 : vector<2x128xf32>
    %88 = arith.negf %87 : vector<2x128xf32>
    %89 = math.exp %88 : vector<2x128xf32>
    %cst_23 = arith.constant 1.000000e+00 : f32
    %90 = vector.broadcast %cst_23 : f32 to vector<2x128xf32>
    %91 = arith.addf %90, %89 : vector<2x128xf32>
    %92 = arith.divf %90, %91 : vector<2x128xf32>
    %93 = math.tanh %87 : vector<2x128xf32>
    %94 = vector.extract_strided_slice %92 {offsets = [0, 0], sizes = [2, 32], strides = [1, 1]} : vector<2x128xf32> to vector<2x32xf32>
    %95 = vector.extract_strided_slice %92 {offsets = [0, 32], sizes = [2, 32], strides = [1, 1]} : vector<2x128xf32> to vector<2x32xf32>
    %96 = vector.extract_strided_slice %93 {offsets = [0, 64], sizes = [2, 32], strides = [1, 1]} : vector<2x128xf32> to vector<2x32xf32>
    %97 = vector.extract_strided_slice %92 {offsets = [0, 96], sizes = [2, 32], strides = [1, 1]} : vector<2x128xf32> to vector<2x32xf32>
    %98 = arith.mulf %95, %81 : vector<2x32xf32>
    %99 = arith.mulf %94, %96 : vector<2x32xf32>
    %100 = arith.addf %98, %99 : vector<2x32xf32>
    %101 = math.tanh %100 : vector<2x32xf32>
    %102 = arith.mulf %97, %101 : vector<2x32xf32>
    %c8 = arith.constant 8 : index
    %c0_24 = arith.constant 0 : index
    %103 = vector.load %arg16[%c8, %c0_24] : memref<16x32xf32, #tpu.memory_space<vmem>>, vector<2x32xf32>
    tpu.vector_store %arg16[%c8, %c0_24], %102 {strides = array<i32>} : memref<16x32xf32, #tpu.memory_space<vmem>>, vector<2x32xf32>,
    %104 = vector.extract_strided_slice %5 {offsets = [10, 0], sizes = [2, 128], strides = [1, 1]} : vector<16x128xf32> to vector<2x128xf32>
    %cst_25 = arith.constant dense<0.000000e+00> : vector<2x128xf32>
    %105 = tpu.matmul %102, %6, %cst_25 {dimension_numbers = #tpu.dot_dimension_numbers<[1], [0], [0], [1], [0, 0, 1, 1], [], []>} : vector<2x32xf32>, vector<32x128xf32>, vector<2x128xf32> -> vector<2x128xf32>
    %106 = arith.addf %104, %105 : vector<2x128xf32>
    %107 = arith.negf %106 : vector<2x128xf32>
    %108 = math.exp %107 : vector<2x128xf32>
    %cst_26 = arith.constant 1.000000e+00 : f32
    %109 = vector.broadcast %cst_26 : f32 to vector<2x128xf32>
    %110 = arith.addf %109, %108 : vector<2x128xf32>
    %111 = arith.divf %109, %110 : vector<2x128xf32>
    %112 = math.tanh %106 : vector<2x128xf32>
    %113 = vector.extract_strided_slice %111 {offsets = [0, 0], sizes = [2, 32], strides = [1, 1]} : vector<2x128xf32> to vector<2x32xf32>
    %114 = vector.extract_strided_slice %111 {offsets = [0, 32], sizes = [2, 32], strides = [1, 1]} : vector<2x128xf32> to vector<2x32xf32>
    %115 = vector.extract_strided_slice %112 {offsets = [0, 64], sizes = [2, 32], strides = [1, 1]} : vector<2x128xf32> to vector<2x32xf32>
    %116 = vector.extract_strided_slice %111 {offsets = [0, 96], sizes = [2, 32], strides = [1, 1]} : vector<2x128xf32> to vector<2x32xf32>
    %117 = arith.mulf %114, %100 : vector<2x32xf32>
    %118 = arith.mulf %113, %115 : vector<2x32xf32>
    %119 = arith.addf %117, %118 : vector<2x32xf32>
    %120 = math.tanh %119 : vector<2x32xf32>
    %121 = arith.mulf %116, %120 : vector<2x32xf32>
    %c10 = arith.constant 10 : index
    %c0_27 = arith.constant 0 : index
    %122 = vector.load %arg16[%c10, %c0_27] : memref<16x32xf32, #tpu.memory_space<vmem>>, vector<2x32xf32>
    tpu.vector_store %arg16[%c10, %c0_27], %121 {strides = array<i32>} : memref<16x32xf32, #tpu.memory_space<vmem>>, vector<2x32xf32>,
    %123 = vector.extract_strided_slice %5 {offsets = [12, 0], sizes = [2, 128], strides = [1, 1]} : vector<16x128xf32> to vector<2x128xf32>
    %cst_28 = arith.constant dense<0.000000e+00> : vector<2x128xf32>
    %124 = tpu.matmul %121, %6, %cst_28 {dimension_numbers = #tpu.dot_dimension_numbers<[1], [0], [0], [1], [0, 0, 1, 1], [], []>} : vector<2x32xf32>, vector<32x128xf32>, vector<2x128xf32> -> vector<2x128xf32>
    %125 = arith.addf %123, %124 : vector<2x128xf32>
    %126 = arith.negf %125 : vector<2x128xf32>
    %127 = math.exp %126 : vector<2x128xf32>
    %cst_29 = arith.constant 1.000000e+00 : f32
    %128 = vector.broadcast %cst_29 : f32 to vector<2x128xf32>
    %129 = arith.addf %128, %127 : vector<2x128xf32>
    %130 = arith.divf %128, %129 : vector<2x128xf32>
    %131 = math.tanh %125 : vector<2x128xf32>
    %132 = vector.extract_strided_slice %130 {offsets = [0, 0], sizes = [2, 32], strides = [1, 1]} : vector<2x128xf32> to vector<2x32xf32>
    %133 = vector.extract_strided_slice %130 {offsets = [0, 32], sizes = [2, 32], strides = [1, 1]} : vector<2x128xf32> to vector<2x32xf32>
    %134 = vector.extract_strided_slice %131 {offsets = [0, 64], sizes = [2, 32], strides = [1, 1]} : vector<2x128xf32> to vector<2x32xf32>
    %135 = vector.extract_strided_slice %130 {offsets = [0, 96], sizes = [2, 32], strides = [1, 1]} : vector<2x128xf32> to vector<2x32xf32>
    %136 = arith.mulf %133, %119 : vector<2x32xf32>
    %137 = arith.mulf %132, %134 : vector<2x32xf32>
    %138 = arith.addf %136, %137 : vector<2x32xf32>
    %139 = math.tanh %138 : vector<2x32xf32>
    %140 = arith.mulf %135, %139 : vector<2x32xf32>
    %c12 = arith.constant 12 : index
    %c0_30 = arith.constant 0 : index
    %141 = vector.load %arg16[%c12, %c0_30] : memref<16x32xf32, #tpu.memory_space<vmem>>, vector<2x32xf32>
    tpu.vector_store %arg16[%c12, %c0_30], %140 {strides = array<i32>} : memref<16x32xf32, #tpu.memory_space<vmem>>, vector<2x32xf32>,
    %142 = vector.extract_strided_slice %5 {offsets = [14, 0], sizes = [2, 128], strides = [1, 1]} : vector<16x128xf32> to vector<2x128xf32>
    %cst_31 = arith.constant dense<0.000000e+00> : vector<2x128xf32>
    %143 = tpu.matmul %140, %6, %cst_31 {dimension_numbers = #tpu.dot_dimension_numbers<[1], [0], [0], [1], [0, 0, 1, 1], [], []>} : vector<2x32xf32>, vector<32x128xf32>, vector<2x128xf32> -> vector<2x128xf32>
    %144 = arith.addf %142, %143 : vector<2x128xf32>
    %145 = arith.negf %144 : vector<2x128xf32>
    %146 = math.exp %145 : vector<2x128xf32>
    %cst_32 = arith.constant 1.000000e+00 : f32
    %147 = vector.broadcast %cst_32 : f32 to vector<2x128xf32>
    %148 = arith.addf %147, %146 : vector<2x128xf32>
    %149 = arith.divf %147, %148 : vector<2x128xf32>
    %150 = math.tanh %144 : vector<2x128xf32>
    %151 = vector.extract_strided_slice %149 {offsets = [0, 0], sizes = [2, 32], strides = [1, 1]} : vector<2x128xf32> to vector<2x32xf32>
    %152 = vector.extract_strided_slice %149 {offsets = [0, 32], sizes = [2, 32], strides = [1, 1]} : vector<2x128xf32> to vector<2x32xf32>
    %153 = vector.extract_strided_slice %150 {offsets = [0, 64], sizes = [2, 32], strides = [1, 1]} : vector<2x128xf32> to vector<2x32xf32>
    %154 = vector.extract_strided_slice %149 {offsets = [0, 96], sizes = [2, 32], strides = [1, 1]} : vector<2x128xf32> to vector<2x32xf32>
    %155 = arith.mulf %152, %138 : vector<2x32xf32>
    %156 = arith.mulf %151, %153 : vector<2x32xf32>
    %157 = arith.addf %155, %156 : vector<2x32xf32>
    %158 = math.tanh %157 : vector<2x32xf32>
    %159 = arith.mulf %154, %158 : vector<2x32xf32>
    %c14 = arith.constant 14 : index
    %c0_33 = arith.constant 0 : index
    %160 = vector.load %arg16[%c14, %c0_33] : memref<16x32xf32, #tpu.memory_space<vmem>>, vector<2x32xf32>
    tpu.vector_store %arg16[%c14, %c0_33], %159 {strides = array<i32>} : memref<16x32xf32, #tpu.memory_space<vmem>>, vector<2x32xf32>,
    %c0_34 = arith.constant 0 : index
    %c0_35 = arith.constant 0 : index
    %161 = vector.load %arg4[%c0_34, %c0_35] : memref<32x128xf32, #tpu.memory_space<vmem>>, vector<32x128xf32>
    %cst_36 = arith.constant dense<0.000000e+00> : vector<16x128xf32>
    %162 = tpu.matmul %0, %161, %cst_36 {dimension_numbers = #tpu.dot_dimension_numbers<[1], [0], [0], [1], [0, 0, 1, 1], [], []>} : vector<16x32xf32>, vector<32x128xf32>, vector<16x128xf32> -> vector<16x128xf32>
    %c0_37 = arith.constant 0 : index
    %c0_38 = arith.constant 0 : index
    %163 = vector.load %arg6[%c0_37, %c0_38] : memref<1x128xf32, #tpu.memory_space<vmem>>, vector<1x128xf32>
    %164 = vector.broadcast %163 : vector<1x128xf32> to vector<16x128xf32>
    %165 = arith.addf %162, %164 : vector<16x128xf32>
    %c0_39 = arith.constant 0 : index
    %c0_40 = arith.constant 0 : index
    %166 = vector.load %arg5[%c0_39, %c0_40] : memref<32x128xf32, #tpu.memory_space<vmem>>, vector<32x128xf32>
    %cst_41 = arith.constant 0.000000e+00 : f32
    %167 = vector.broadcast %cst_41 : f32 to vector<2x32xf32>
    %cst_42 = arith.constant 0.000000e+00 : f32
    %168 = vector.broadcast %cst_42 : f32 to vector<2x32xf32>
    %169 = vector.extract_strided_slice %165 {offsets = [14, 0], sizes = [2, 128], strides = [1, 1]} : vector<16x128xf32> to vector<2x128xf32>
    %cst_43 = arith.constant dense<0.000000e+00> : vector<2x128xf32>
    %170 = tpu.matmul %167, %166, %cst_43 {dimension_numbers = #tpu.dot_dimension_numbers<[1], [0], [0], [1], [0, 0, 1, 1], [], []>} : vector<2x32xf32>, vector<32x128xf32>, vector<2x128xf32> -> vector<2x128xf32>
    %171 = arith.addf %169, %170 : vector<2x128xf32>
    %172 = arith.negf %171 : vector<2x128xf32>
    %173 = math.exp %172 : vector<2x128xf32>
    %cst_44 = arith.constant 1.000000e+00 : f32
    %174 = vector.broadcast %cst_44 : f32 to vector<2x128xf32>
    %175 = arith.addf %174, %173 : vector<2x128xf32>
    %176 = arith.divf %174, %175 : vector<2x128xf32>
    %177 = math.tanh %171 : vector<2x128xf32>
    %178 = vector.extract_strided_slice %176 {offsets = [0, 0], sizes = [2, 32], strides = [1, 1]} : vector<2x128xf32> to vector<2x32xf32>
    %179 = vector.extract_strided_slice %176 {offsets = [0, 32], sizes = [2, 32], strides = [1, 1]} : vector<2x128xf32> to vector<2x32xf32>
    %180 = vector.extract_strided_slice %177 {offsets = [0, 64], sizes = [2, 32], strides = [1, 1]} : vector<2x128xf32> to vector<2x32xf32>
    %181 = vector.extract_strided_slice %176 {offsets = [0, 96], sizes = [2, 32], strides = [1, 1]} : vector<2x128xf32> to vector<2x32xf32>
    %182 = arith.mulf %179, %168 : vector<2x32xf32>
    %183 = arith.mulf %178, %180 : vector<2x32xf32>
    %184 = arith.addf %182, %183 : vector<2x32xf32>
    %185 = math.tanh %184 : vector<2x32xf32>
    %186 = arith.mulf %181, %185 : vector<2x32xf32>
    %c14_45 = arith.constant 14 : index
    %c0_46 = arith.constant 0 : index
    %187 = vector.load %arg17[%c14_45, %c0_46] : memref<16x32xf32, #tpu.memory_space<vmem>>, vector<2x32xf32>
    tpu.vector_store %arg17[%c14_45, %c0_46], %186 {strides = array<i32>} : memref<16x32xf32, #tpu.memory_space<vmem>>, vector<2x32xf32>,
    %188 = vector.extract_strided_slice %165 {offsets = [12, 0], sizes = [2, 128], strides = [1, 1]} : vector<16x128xf32> to vector<2x128xf32>
    %cst_47 = arith.constant dense<0.000000e+00> : vector<2x128xf32>
    %189 = tpu.matmul %186, %166, %cst_47 {dimension_numbers = #tpu.dot_dimension_numbers<[1], [0], [0], [1], [0, 0, 1, 1], [], []>} : vector<2x32xf32>, vector<32x128xf32>, vector<2x128xf32> -> vector<2x128xf32>
    %190 = arith.addf %188, %189 : vector<2x128xf32>
    %191 = arith.negf %190 : vector<2x128xf32>
    %192 = math.exp %191 : vector<2x128xf32>
    %cst_48 = arith.constant 1.000000e+00 : f32
    %193 = vector.broadcast %cst_48 : f32 to vector<2x128xf32>
    %194 = arith.addf %193, %192 : vector<2x128xf32>
    %195 = arith.divf %193, %194 : vector<2x128xf32>
    %196 = math.tanh %190 : vector<2x128xf32>
    %197 = vector.extract_strided_slice %195 {offsets = [0, 0], sizes = [2, 32], strides = [1, 1]} : vector<2x128xf32> to vector<2x32xf32>
    %198 = vector.extract_strided_slice %195 {offsets = [0, 32], sizes = [2, 32], strides = [1, 1]} : vector<2x128xf32> to vector<2x32xf32>
    %199 = vector.extract_strided_slice %196 {offsets = [0, 64], sizes = [2, 32], strides = [1, 1]} : vector<2x128xf32> to vector<2x32xf32>
    %200 = vector.extract_strided_slice %195 {offsets = [0, 96], sizes = [2, 32], strides = [1, 1]} : vector<2x128xf32> to vector<2x32xf32>
    %201 = arith.mulf %198, %184 : vector<2x32xf32>
    %202 = arith.mulf %197, %199 : vector<2x32xf32>
    %203 = arith.addf %201, %202 : vector<2x32xf32>
    %204 = math.tanh %203 : vector<2x32xf32>
    %205 = arith.mulf %200, %204 : vector<2x32xf32>
    %c12_49 = arith.constant 12 : index
    %c0_50 = arith.constant 0 : index
    %206 = vector.load %arg17[%c12_49, %c0_50] : memref<16x32xf32, #tpu.memory_space<vmem>>, vector<2x32xf32>
    tpu.vector_store %arg17[%c12_49, %c0_50], %205 {strides = array<i32>} : memref<16x32xf32, #tpu.memory_space<vmem>>, vector<2x32xf32>,
    %207 = vector.extract_strided_slice %165 {offsets = [10, 0], sizes = [2, 128], strides = [1, 1]} : vector<16x128xf32> to vector<2x128xf32>
    %cst_51 = arith.constant dense<0.000000e+00> : vector<2x128xf32>
    %208 = tpu.matmul %205, %166, %cst_51 {dimension_numbers = #tpu.dot_dimension_numbers<[1], [0], [0], [1], [0, 0, 1, 1], [], []>} : vector<2x32xf32>, vector<32x128xf32>, vector<2x128xf32> -> vector<2x128xf32>
    %209 = arith.addf %207, %208 : vector<2x128xf32>
    %210 = arith.negf %209 : vector<2x128xf32>
    %211 = math.exp %210 : vector<2x128xf32>
    %cst_52 = arith.constant 1.000000e+00 : f32
    %212 = vector.broadcast %cst_52 : f32 to vector<2x128xf32>
    %213 = arith.addf %212, %211 : vector<2x128xf32>
    %214 = arith.divf %212, %213 : vector<2x128xf32>
    %215 = math.tanh %209 : vector<2x128xf32>
    %216 = vector.extract_strided_slice %214 {offsets = [0, 0], sizes = [2, 32], strides = [1, 1]} : vector<2x128xf32> to vector<2x32xf32>
    %217 = vector.extract_strided_slice %214 {offsets = [0, 32], sizes = [2, 32], strides = [1, 1]} : vector<2x128xf32> to vector<2x32xf32>
    %218 = vector.extract_strided_slice %215 {offsets = [0, 64], sizes = [2, 32], strides = [1, 1]} : vector<2x128xf32> to vector<2x32xf32>
    %219 = vector.extract_strided_slice %214 {offsets = [0, 96], sizes = [2, 32], strides = [1, 1]} : vector<2x128xf32> to vector<2x32xf32>
    %220 = arith.mulf %217, %203 : vector<2x32xf32>
    %221 = arith.mulf %216, %218 : vector<2x32xf32>
    %222 = arith.addf %220, %221 : vector<2x32xf32>
    %223 = math.tanh %222 : vector<2x32xf32>
    %224 = arith.mulf %219, %223 : vector<2x32xf32>
    %c10_53 = arith.constant 10 : index
    %c0_54 = arith.constant 0 : index
    %225 = vector.load %arg17[%c10_53, %c0_54] : memref<16x32xf32, #tpu.memory_space<vmem>>, vector<2x32xf32>
    tpu.vector_store %arg17[%c10_53, %c0_54], %224 {strides = array<i32>} : memref<16x32xf32, #tpu.memory_space<vmem>>, vector<2x32xf32>,
    %226 = vector.extract_strided_slice %165 {offsets = [8, 0], sizes = [2, 128], strides = [1, 1]} : vector<16x128xf32> to vector<2x128xf32>
    %cst_55 = arith.constant dense<0.000000e+00> : vector<2x128xf32>
    %227 = tpu.matmul %224, %166, %cst_55 {dimension_numbers = #tpu.dot_dimension_numbers<[1], [0], [0], [1], [0, 0, 1, 1], [], []>} : vector<2x32xf32>, vector<32x128xf32>, vector<2x128xf32> -> vector<2x128xf32>
    %228 = arith.addf %226, %227 : vector<2x128xf32>
    %229 = arith.negf %228 : vector<2x128xf32>
    %230 = math.exp %229 : vector<2x128xf32>
    %cst_56 = arith.constant 1.000000e+00 : f32
    %231 = vector.broadcast %cst_56 : f32 to vector<2x128xf32>
    %232 = arith.addf %231, %230 : vector<2x128xf32>
    %233 = arith.divf %231, %232 : vector<2x128xf32>
    %234 = math.tanh %228 : vector<2x128xf32>
    %235 = vector.extract_strided_slice %233 {offsets = [0, 0], sizes = [2, 32], strides = [1, 1]} : vector<2x128xf32> to vector<2x32xf32>
    %236 = vector.extract_strided_slice %233 {offsets = [0, 32], sizes = [2, 32], strides = [1, 1]} : vector<2x128xf32> to vector<2x32xf32>
    %237 = vector.extract_strided_slice %234 {offsets = [0, 64], sizes = [2, 32], strides = [1, 1]} : vector<2x128xf32> to vector<2x32xf32>
    %238 = vector.extract_strided_slice %233 {offsets = [0, 96], sizes = [2, 32], strides = [1, 1]} : vector<2x128xf32> to vector<2x32xf32>
    %239 = arith.mulf %236, %222 : vector<2x32xf32>
    %240 = arith.mulf %235, %237 : vector<2x32xf32>
    %241 = arith.addf %239, %240 : vector<2x32xf32>
    %242 = math.tanh %241 : vector<2x32xf32>
    %243 = arith.mulf %238, %242 : vector<2x32xf32>
    %c8_57 = arith.constant 8 : index
    %c0_58 = arith.constant 0 : index
    %244 = vector.load %arg17[%c8_57, %c0_58] : memref<16x32xf32, #tpu.memory_space<vmem>>, vector<2x32xf32>
    tpu.vector_store %arg17[%c8_57, %c0_58], %243 {strides = array<i32>} : memref<16x32xf32, #tpu.memory_space<vmem>>, vector<2x32xf32>,
    %245 = vector.extract_strided_slice %165 {offsets = [6, 0], sizes = [2, 128], strides = [1, 1]} : vector<16x128xf32> to vector<2x128xf32>
    %cst_59 = arith.constant dense<0.000000e+00> : vector<2x128xf32>
    %246 = tpu.matmul %243, %166, %cst_59 {dimension_numbers = #tpu.dot_dimension_numbers<[1], [0], [0], [1], [0, 0, 1, 1], [], []>} : vector<2x32xf32>, vector<32x128xf32>, vector<2x128xf32> -> vector<2x128xf32>
    %247 = arith.addf %245, %246 : vector<2x128xf32>
    %248 = arith.negf %247 : vector<2x128xf32>
    %249 = math.exp %248 : vector<2x128xf32>
    %cst_60 = arith.constant 1.000000e+00 : f32
    %250 = vector.broadcast %cst_60 : f32 to vector<2x128xf32>
    %251 = arith.addf %250, %249 : vector<2x128xf32>
    %252 = arith.divf %250, %251 : vector<2x128xf32>
    %253 = math.tanh %247 : vector<2x128xf32>
    %254 = vector.extract_strided_slice %252 {offsets = [0, 0], sizes = [2, 32], strides = [1, 1]} : vector<2x128xf32> to vector<2x32xf32>
    %255 = vector.extract_strided_slice %252 {offsets = [0, 32], sizes = [2, 32], strides = [1, 1]} : vector<2x128xf32> to vector<2x32xf32>
    %256 = vector.extract_strided_slice %253 {offsets = [0, 64], sizes = [2, 32], strides = [1, 1]} : vector<2x128xf32> to vector<2x32xf32>
    %257 = vector.extract_strided_slice %252 {offsets = [0, 96], sizes = [2, 32], strides = [1, 1]} : vector<2x128xf32> to vector<2x32xf32>
    %258 = arith.mulf %255, %241 : vector<2x32xf32>
    %259 = arith.mulf %254, %256 : vector<2x32xf32>
    %260 = arith.addf %258, %259 : vector<2x32xf32>
    %261 = math.tanh %260 : vector<2x32xf32>
    %262 = arith.mulf %257, %261 : vector<2x32xf32>
    %c6_61 = arith.constant 6 : index
    %c0_62 = arith.constant 0 : index
    %263 = vector.load %arg17[%c6_61, %c0_62] : memref<16x32xf32, #tpu.memory_space<vmem>>, vector<2x32xf32>
    tpu.vector_store %arg17[%c6_61, %c0_62], %262 {strides = array<i32>} : memref<16x32xf32, #tpu.memory_space<vmem>>, vector<2x32xf32>,
    %264 = vector.extract_strided_slice %165 {offsets = [4, 0], sizes = [2, 128], strides = [1, 1]} : vector<16x128xf32> to vector<2x128xf32>
    %cst_63 = arith.constant dense<0.000000e+00> : vector<2x128xf32>
    %265 = tpu.matmul %262, %166, %cst_63 {dimension_numbers = #tpu.dot_dimension_numbers<[1], [0], [0], [1], [0, 0, 1, 1], [], []>} : vector<2x32xf32>, vector<32x128xf32>, vector<2x128xf32> -> vector<2x128xf32>
    %266 = arith.addf %264, %265 : vector<2x128xf32>
    %267 = arith.negf %266 : vector<2x128xf32>
    %268 = math.exp %267 : vector<2x128xf32>
    %cst_64 = arith.constant 1.000000e+00 : f32
    %269 = vector.broadcast %cst_64 : f32 to vector<2x128xf32>
    %270 = arith.addf %269, %268 : vector<2x128xf32>
    %271 = arith.divf %269, %270 : vector<2x128xf32>
    %272 = math.tanh %266 : vector<2x128xf32>
    %273 = vector.extract_strided_slice %271 {offsets = [0, 0], sizes = [2, 32], strides = [1, 1]} : vector<2x128xf32> to vector<2x32xf32>
    %274 = vector.extract_strided_slice %271 {offsets = [0, 32], sizes = [2, 32], strides = [1, 1]} : vector<2x128xf32> to vector<2x32xf32>
    %275 = vector.extract_strided_slice %272 {offsets = [0, 64], sizes = [2, 32], strides = [1, 1]} : vector<2x128xf32> to vector<2x32xf32>
    %276 = vector.extract_strided_slice %271 {offsets = [0, 96], sizes = [2, 32], strides = [1, 1]} : vector<2x128xf32> to vector<2x32xf32>
    %277 = arith.mulf %274, %260 : vector<2x32xf32>
    %278 = arith.mulf %273, %275 : vector<2x32xf32>
    %279 = arith.addf %277, %278 : vector<2x32xf32>
    %280 = math.tanh %279 : vector<2x32xf32>
    %281 = arith.mulf %276, %280 : vector<2x32xf32>
    %c4_65 = arith.constant 4 : index
    %c0_66 = arith.constant 0 : index
    %282 = vector.load %arg17[%c4_65, %c0_66] : memref<16x32xf32, #tpu.memory_space<vmem>>, vector<2x32xf32>
    tpu.vector_store %arg17[%c4_65, %c0_66], %281 {strides = array<i32>} : memref<16x32xf32, #tpu.memory_space<vmem>>, vector<2x32xf32>,
    %283 = vector.extract_strided_slice %165 {offsets = [2, 0], sizes = [2, 128], strides = [1, 1]} : vector<16x128xf32> to vector<2x128xf32>
    %cst_67 = arith.constant dense<0.000000e+00> : vector<2x128xf32>
    %284 = tpu.matmul %281, %166, %cst_67 {dimension_numbers = #tpu.dot_dimension_numbers<[1], [0], [0], [1], [0, 0, 1, 1], [], []>} : vector<2x32xf32>, vector<32x128xf32>, vector<2x128xf32> -> vector<2x128xf32>
    %285 = arith.addf %283, %284 : vector<2x128xf32>
    %286 = arith.negf %285 : vector<2x128xf32>
    %287 = math.exp %286 : vector<2x128xf32>
    %cst_68 = arith.constant 1.000000e+00 : f32
    %288 = vector.broadcast %cst_68 : f32 to vector<2x128xf32>
    %289 = arith.addf %288, %287 : vector<2x128xf32>
    %290 = arith.divf %288, %289 : vector<2x128xf32>
    %291 = math.tanh %285 : vector<2x128xf32>
    %292 = vector.extract_strided_slice %290 {offsets = [0, 0], sizes = [2, 32], strides = [1, 1]} : vector<2x128xf32> to vector<2x32xf32>
    %293 = vector.extract_strided_slice %290 {offsets = [0, 32], sizes = [2, 32], strides = [1, 1]} : vector<2x128xf32> to vector<2x32xf32>
    %294 = vector.extract_strided_slice %291 {offsets = [0, 64], sizes = [2, 32], strides = [1, 1]} : vector<2x128xf32> to vector<2x32xf32>
    %295 = vector.extract_strided_slice %290 {offsets = [0, 96], sizes = [2, 32], strides = [1, 1]} : vector<2x128xf32> to vector<2x32xf32>
    %296 = arith.mulf %293, %279 : vector<2x32xf32>
    %297 = arith.mulf %292, %294 : vector<2x32xf32>
    %298 = arith.addf %296, %297 : vector<2x32xf32>
    %299 = math.tanh %298 : vector<2x32xf32>
    %300 = arith.mulf %295, %299 : vector<2x32xf32>
    %c2_69 = arith.constant 2 : index
    %c0_70 = arith.constant 0 : index
    %301 = vector.load %arg17[%c2_69, %c0_70] : memref<16x32xf32, #tpu.memory_space<vmem>>, vector<2x32xf32>
    tpu.vector_store %arg17[%c2_69, %c0_70], %300 {strides = array<i32>} : memref<16x32xf32, #tpu.memory_space<vmem>>, vector<2x32xf32>,
    %302 = vector.extract_strided_slice %165 {offsets = [0, 0], sizes = [2, 128], strides = [1, 1]} : vector<16x128xf32> to vector<2x128xf32>
    %cst_71 = arith.constant dense<0.000000e+00> : vector<2x128xf32>
    %303 = tpu.matmul %300, %166, %cst_71 {dimension_numbers = #tpu.dot_dimension_numbers<[1], [0], [0], [1], [0, 0, 1, 1], [], []>} : vector<2x32xf32>, vector<32x128xf32>, vector<2x128xf32> -> vector<2x128xf32>
    %304 = arith.addf %302, %303 : vector<2x128xf32>
    %305 = arith.negf %304 : vector<2x128xf32>
    %306 = math.exp %305 : vector<2x128xf32>
    %cst_72 = arith.constant 1.000000e+00 : f32
    %307 = vector.broadcast %cst_72 : f32 to vector<2x128xf32>
    %308 = arith.addf %307, %306 : vector<2x128xf32>
    %309 = arith.divf %307, %308 : vector<2x128xf32>
    %310 = math.tanh %304 : vector<2x128xf32>
    %311 = vector.extract_strided_slice %309 {offsets = [0, 0], sizes = [2, 32], strides = [1, 1]} : vector<2x128xf32> to vector<2x32xf32>
    %312 = vector.extract_strided_slice %309 {offsets = [0, 32], sizes = [2, 32], strides = [1, 1]} : vector<2x128xf32> to vector<2x32xf32>
    %313 = vector.extract_strided_slice %310 {offsets = [0, 64], sizes = [2, 32], strides = [1, 1]} : vector<2x128xf32> to vector<2x32xf32>
    %314 = vector.extract_strided_slice %309 {offsets = [0, 96], sizes = [2, 32], strides = [1, 1]} : vector<2x128xf32> to vector<2x32xf32>
    %315 = arith.mulf %312, %298 : vector<2x32xf32>
    %316 = arith.mulf %311, %313 : vector<2x32xf32>
    %317 = arith.addf %315, %316 : vector<2x32xf32>
    %318 = math.tanh %317 : vector<2x32xf32>
    %319 = arith.mulf %314, %318 : vector<2x32xf32>
    %c0_73 = arith.constant 0 : index
    %c0_74 = arith.constant 0 : index
    %320 = vector.load %arg17[%c0_73, %c0_74] : memref<16x32xf32, #tpu.memory_space<vmem>>, vector<2x32xf32>
    tpu.vector_store %arg17[%c0_73, %c0_74], %319 {strides = array<i32>} : memref<16x32xf32, #tpu.memory_space<vmem>>, vector<2x32xf32>,
    %c0_75 = arith.constant 0 : index
    %c0_76 = arith.constant 0 : index
    %321 = vector.load %arg16[%c0_75, %c0_76] : memref<16x32xf32, #tpu.memory_space<vmem>>, vector<16x32xf32>
    %c0_77 = arith.constant 0 : index
    %c0_78 = arith.constant 0 : index
    %322 = vector.load %arg17[%c0_77, %c0_78] : memref<16x32xf32, #tpu.memory_space<vmem>>, vector<16x32xf32>
    %323 = tpu.concatenate %321, %322 in 1 : vector<16x32xf32>, vector<16x32xf32> -> vector<16x64xf32>
    %c0_79 = arith.constant 0 : index
    %c0_80 = arith.constant 0 : index
    %324 = vector.load %arg7[%c0_79, %c0_80] : memref<64x128xf32, #tpu.memory_space<vmem>>, vector<64x128xf32>
    %cst_81 = arith.constant dense<0.000000e+00> : vector<16x128xf32>
    %325 = tpu.matmul %323, %324, %cst_81 {dimension_numbers = #tpu.dot_dimension_numbers<[1], [0], [0], [1], [0, 0, 1, 1], [], []>} : vector<16x64xf32>, vector<64x128xf32>, vector<16x128xf32> -> vector<16x128xf32>
    %c0_82 = arith.constant 0 : index
    %c0_83 = arith.constant 0 : index
    %326 = vector.load %arg9[%c0_82, %c0_83] : memref<1x128xf32, #tpu.memory_space<vmem>>, vector<1x128xf32>
    %327 = vector.broadcast %326 : vector<1x128xf32> to vector<16x128xf32>
    %328 = arith.addf %325, %327 : vector<16x128xf32>
    %c0_84 = arith.constant 0 : index
    %c0_85 = arith.constant 0 : index
    %329 = vector.load %arg8[%c0_84, %c0_85] : memref<32x128xf32, #tpu.memory_space<vmem>>, vector<32x128xf32>
    %cst_86 = arith.constant 0.000000e+00 : f32
    %330 = vector.broadcast %cst_86 : f32 to vector<2x32xf32>
    %cst_87 = arith.constant 0.000000e+00 : f32
    %331 = vector.broadcast %cst_87 : f32 to vector<2x32xf32>
    %332 = vector.extract_strided_slice %328 {offsets = [0, 0], sizes = [2, 128], strides = [1, 1]} : vector<16x128xf32> to vector<2x128xf32>
    %cst_88 = arith.constant dense<0.000000e+00> : vector<2x128xf32>
    %333 = tpu.matmul %330, %329, %cst_88 {dimension_numbers = #tpu.dot_dimension_numbers<[1], [0], [0], [1], [0, 0, 1, 1], [], []>} : vector<2x32xf32>, vector<32x128xf32>, vector<2x128xf32> -> vector<2x128xf32>
    %334 = arith.addf %332, %333 : vector<2x128xf32>
    %335 = arith.negf %334 : vector<2x128xf32>
    %336 = math.exp %335 : vector<2x128xf32>
    %cst_89 = arith.constant 1.000000e+00 : f32
    %337 = vector.broadcast %cst_89 : f32 to vector<2x128xf32>
    %338 = arith.addf %337, %336 : vector<2x128xf32>
    %339 = arith.divf %337, %338 : vector<2x128xf32>
    %340 = math.tanh %334 : vector<2x128xf32>
    %341 = vector.extract_strided_slice %339 {offsets = [0, 0], sizes = [2, 32], strides = [1, 1]} : vector<2x128xf32> to vector<2x32xf32>
    %342 = vector.extract_strided_slice %339 {offsets = [0, 32], sizes = [2, 32], strides = [1, 1]} : vector<2x128xf32> to vector<2x32xf32>
    %343 = vector.extract_strided_slice %340 {offsets = [0, 64], sizes = [2, 32], strides = [1, 1]} : vector<2x128xf32> to vector<2x32xf32>
    %344 = vector.extract_strided_slice %339 {offsets = [0, 96], sizes = [2, 32], strides = [1, 1]} : vector<2x128xf32> to vector<2x32xf32>
    %345 = arith.mulf %342, %331 : vector<2x32xf32>
    %346 = arith.mulf %341, %343 : vector<2x32xf32>
    %347 = arith.addf %345, %346 : vector<2x32xf32>
    %348 = math.tanh %347 : vector<2x32xf32>
    %349 = arith.mulf %344, %348 : vector<2x32xf32>
    %c0_90 = arith.constant 0 : index
    %c0_91 = arith.constant 0 : index
    %350 = vector.load %arg18[%c0_90, %c0_91] : memref<16x32xf32, #tpu.memory_space<vmem>>, vector<2x32xf32>
    tpu.vector_store %arg18[%c0_90, %c0_91], %349 {strides = array<i32>} : memref<16x32xf32, #tpu.memory_space<vmem>>, vector<2x32xf32>,
    %351 = vector.extract_strided_slice %328 {offsets = [2, 0], sizes = [2, 128], strides = [1, 1]} : vector<16x128xf32> to vector<2x128xf32>
    %cst_92 = arith.constant dense<0.000000e+00> : vector<2x128xf32>
    %352 = tpu.matmul %349, %329, %cst_92 {dimension_numbers = #tpu.dot_dimension_numbers<[1], [0], [0], [1], [0, 0, 1, 1], [], []>} : vector<2x32xf32>, vector<32x128xf32>, vector<2x128xf32> -> vector<2x128xf32>
    %353 = arith.addf %351, %352 : vector<2x128xf32>
    %354 = arith.negf %353 : vector<2x128xf32>
    %355 = math.exp %354 : vector<2x128xf32>
    %cst_93 = arith.constant 1.000000e+00 : f32
    %356 = vector.broadcast %cst_93 : f32 to vector<2x128xf32>
    %357 = arith.addf %356, %355 : vector<2x128xf32>
    %358 = arith.divf %356, %357 : vector<2x128xf32>
    %359 = math.tanh %353 : vector<2x128xf32>
    %360 = vector.extract_strided_slice %358 {offsets = [0, 0], sizes = [2, 32], strides = [1, 1]} : vector<2x128xf32> to vector<2x32xf32>
    %361 = vector.extract_strided_slice %358 {offsets = [0, 32], sizes = [2, 32], strides = [1, 1]} : vector<2x128xf32> to vector<2x32xf32>
    %362 = vector.extract_strided_slice %359 {offsets = [0, 64], sizes = [2, 32], strides = [1, 1]} : vector<2x128xf32> to vector<2x32xf32>
    %363 = vector.extract_strided_slice %358 {offsets = [0, 96], sizes = [2, 32], strides = [1, 1]} : vector<2x128xf32> to vector<2x32xf32>
    %364 = arith.mulf %361, %347 : vector<2x32xf32>
    %365 = arith.mulf %360, %362 : vector<2x32xf32>
    %366 = arith.addf %364, %365 : vector<2x32xf32>
    %367 = math.tanh %366 : vector<2x32xf32>
    %368 = arith.mulf %363, %367 : vector<2x32xf32>
    %c2_94 = arith.constant 2 : index
    %c0_95 = arith.constant 0 : index
    %369 = vector.load %arg18[%c2_94, %c0_95] : memref<16x32xf32, #tpu.memory_space<vmem>>, vector<2x32xf32>
    tpu.vector_store %arg18[%c2_94, %c0_95], %368 {strides = array<i32>} : memref<16x32xf32, #tpu.memory_space<vmem>>, vector<2x32xf32>,
    %370 = vector.extract_strided_slice %328 {offsets = [4, 0], sizes = [2, 128], strides = [1, 1]} : vector<16x128xf32> to vector<2x128xf32>
    %cst_96 = arith.constant dense<0.000000e+00> : vector<2x128xf32>
    %371 = tpu.matmul %368, %329, %cst_96 {dimension_numbers = #tpu.dot_dimension_numbers<[1], [0], [0], [1], [0, 0, 1, 1], [], []>} : vector<2x32xf32>, vector<32x128xf32>, vector<2x128xf32> -> vector<2x128xf32>
    %372 = arith.addf %370, %371 : vector<2x128xf32>
    %373 = arith.negf %372 : vector<2x128xf32>
    %374 = math.exp %373 : vector<2x128xf32>
    %cst_97 = arith.constant 1.000000e+00 : f32
    %375 = vector.broadcast %cst_97 : f32 to vector<2x128xf32>
    %376 = arith.addf %375, %374 : vector<2x128xf32>
    %377 = arith.divf %375, %376 : vector<2x128xf32>
    %378 = math.tanh %372 : vector<2x128xf32>
    %379 = vector.extract_strided_slice %377 {offsets = [0, 0], sizes = [2, 32], strides = [1, 1]} : vector<2x128xf32> to vector<2x32xf32>
    %380 = vector.extract_strided_slice %377 {offsets = [0, 32], sizes = [2, 32], strides = [1, 1]} : vector<2x128xf32> to vector<2x32xf32>
    %381 = vector.extract_strided_slice %378 {offsets = [0, 64], sizes = [2, 32], strides = [1, 1]} : vector<2x128xf32> to vector<2x32xf32>
    %382 = vector.extract_strided_slice %377 {offsets = [0, 96], sizes = [2, 32], strides = [1, 1]} : vector<2x128xf32> to vector<2x32xf32>
    %383 = arith.mulf %380, %366 : vector<2x32xf32>
    %384 = arith.mulf %379, %381 : vector<2x32xf32>
    %385 = arith.addf %383, %384 : vector<2x32xf32>
    %386 = math.tanh %385 : vector<2x32xf32>
    %387 = arith.mulf %382, %386 : vector<2x32xf32>
    %c4_98 = arith.constant 4 : index
    %c0_99 = arith.constant 0 : index
    %388 = vector.load %arg18[%c4_98, %c0_99] : memref<16x32xf32, #tpu.memory_space<vmem>>, vector<2x32xf32>
    tpu.vector_store %arg18[%c4_98, %c0_99], %387 {strides = array<i32>} : memref<16x32xf32, #tpu.memory_space<vmem>>, vector<2x32xf32>,
    %389 = vector.extract_strided_slice %328 {offsets = [6, 0], sizes = [2, 128], strides = [1, 1]} : vector<16x128xf32> to vector<2x128xf32>
    %cst_100 = arith.constant dense<0.000000e+00> : vector<2x128xf32>
    %390 = tpu.matmul %387, %329, %cst_100 {dimension_numbers = #tpu.dot_dimension_numbers<[1], [0], [0], [1], [0, 0, 1, 1], [], []>} : vector<2x32xf32>, vector<32x128xf32>, vector<2x128xf32> -> vector<2x128xf32>
    %391 = arith.addf %389, %390 : vector<2x128xf32>
    %392 = arith.negf %391 : vector<2x128xf32>
    %393 = math.exp %392 : vector<2x128xf32>
    %cst_101 = arith.constant 1.000000e+00 : f32
    %394 = vector.broadcast %cst_101 : f32 to vector<2x128xf32>
    %395 = arith.addf %394, %393 : vector<2x128xf32>
    %396 = arith.divf %394, %395 : vector<2x128xf32>
    %397 = math.tanh %391 : vector<2x128xf32>
    %398 = vector.extract_strided_slice %396 {offsets = [0, 0], sizes = [2, 32], strides = [1, 1]} : vector<2x128xf32> to vector<2x32xf32>
    %399 = vector.extract_strided_slice %396 {offsets = [0, 32], sizes = [2, 32], strides = [1, 1]} : vector<2x128xf32> to vector<2x32xf32>
    %400 = vector.extract_strided_slice %397 {offsets = [0, 64], sizes = [2, 32], strides = [1, 1]} : vector<2x128xf32> to vector<2x32xf32>
    %401 = vector.extract_strided_slice %396 {offsets = [0, 96], sizes = [2, 32], strides = [1, 1]} : vector<2x128xf32> to vector<2x32xf32>
    %402 = arith.mulf %399, %385 : vector<2x32xf32>
    %403 = arith.mulf %398, %400 : vector<2x32xf32>
    %404 = arith.addf %402, %403 : vector<2x32xf32>
    %405 = math.tanh %404 : vector<2x32xf32>
    %406 = arith.mulf %401, %405 : vector<2x32xf32>
    %c6_102 = arith.constant 6 : index
    %c0_103 = arith.constant 0 : index
    %407 = vector.load %arg18[%c6_102, %c0_103] : memref<16x32xf32, #tpu.memory_space<vmem>>, vector<2x32xf32>
    tpu.vector_store %arg18[%c6_102, %c0_103], %406 {strides = array<i32>} : memref<16x32xf32, #tpu.memory_space<vmem>>, vector<2x32xf32>,
    %408 = vector.extract_strided_slice %328 {offsets = [8, 0], sizes = [2, 128], strides = [1, 1]} : vector<16x128xf32> to vector<2x128xf32>
    %cst_104 = arith.constant dense<0.000000e+00> : vector<2x128xf32>
    %409 = tpu.matmul %406, %329, %cst_104 {dimension_numbers = #tpu.dot_dimension_numbers<[1], [0], [0], [1], [0, 0, 1, 1], [], []>} : vector<2x32xf32>, vector<32x128xf32>, vector<2x128xf32> -> vector<2x128xf32>
    %410 = arith.addf %408, %409 : vector<2x128xf32>
    %411 = arith.negf %410 : vector<2x128xf32>
    %412 = math.exp %411 : vector<2x128xf32>
    %cst_105 = arith.constant 1.000000e+00 : f32
    %413 = vector.broadcast %cst_105 : f32 to vector<2x128xf32>
    %414 = arith.addf %413, %412 : vector<2x128xf32>
    %415 = arith.divf %413, %414 : vector<2x128xf32>
    %416 = math.tanh %410 : vector<2x128xf32>
    %417 = vector.extract_strided_slice %415 {offsets = [0, 0], sizes = [2, 32], strides = [1, 1]} : vector<2x128xf32> to vector<2x32xf32>
    %418 = vector.extract_strided_slice %415 {offsets = [0, 32], sizes = [2, 32], strides = [1, 1]} : vector<2x128xf32> to vector<2x32xf32>
    %419 = vector.extract_strided_slice %416 {offsets = [0, 64], sizes = [2, 32], strides = [1, 1]} : vector<2x128xf32> to vector<2x32xf32>
    %420 = vector.extract_strided_slice %415 {offsets = [0, 96], sizes = [2, 32], strides = [1, 1]} : vector<2x128xf32> to vector<2x32xf32>
    %421 = arith.mulf %418, %404 : vector<2x32xf32>
    %422 = arith.mulf %417, %419 : vector<2x32xf32>
    %423 = arith.addf %421, %422 : vector<2x32xf32>
    %424 = math.tanh %423 : vector<2x32xf32>
    %425 = arith.mulf %420, %424 : vector<2x32xf32>
    %c8_106 = arith.constant 8 : index
    %c0_107 = arith.constant 0 : index
    %426 = vector.load %arg18[%c8_106, %c0_107] : memref<16x32xf32, #tpu.memory_space<vmem>>, vector<2x32xf32>
    tpu.vector_store %arg18[%c8_106, %c0_107], %425 {strides = array<i32>} : memref<16x32xf32, #tpu.memory_space<vmem>>, vector<2x32xf32>,
    %427 = vector.extract_strided_slice %328 {offsets = [10, 0], sizes = [2, 128], strides = [1, 1]} : vector<16x128xf32> to vector<2x128xf32>
    %cst_108 = arith.constant dense<0.000000e+00> : vector<2x128xf32>
    %428 = tpu.matmul %425, %329, %cst_108 {dimension_numbers = #tpu.dot_dimension_numbers<[1], [0], [0], [1], [0, 0, 1, 1], [], []>} : vector<2x32xf32>, vector<32x128xf32>, vector<2x128xf32> -> vector<2x128xf32>
    %429 = arith.addf %427, %428 : vector<2x128xf32>
    %430 = arith.negf %429 : vector<2x128xf32>
    %431 = math.exp %430 : vector<2x128xf32>
    %cst_109 = arith.constant 1.000000e+00 : f32
    %432 = vector.broadcast %cst_109 : f32 to vector<2x128xf32>
    %433 = arith.addf %432, %431 : vector<2x128xf32>
    %434 = arith.divf %432, %433 : vector<2x128xf32>
    %435 = math.tanh %429 : vector<2x128xf32>
    %436 = vector.extract_strided_slice %434 {offsets = [0, 0], sizes = [2, 32], strides = [1, 1]} : vector<2x128xf32> to vector<2x32xf32>
    %437 = vector.extract_strided_slice %434 {offsets = [0, 32], sizes = [2, 32], strides = [1, 1]} : vector<2x128xf32> to vector<2x32xf32>
    %438 = vector.extract_strided_slice %435 {offsets = [0, 64], sizes = [2, 32], strides = [1, 1]} : vector<2x128xf32> to vector<2x32xf32>
    %439 = vector.extract_strided_slice %434 {offsets = [0, 96], sizes = [2, 32], strides = [1, 1]} : vector<2x128xf32> to vector<2x32xf32>
    %440 = arith.mulf %437, %423 : vector<2x32xf32>
    %441 = arith.mulf %436, %438 : vector<2x32xf32>
    %442 = arith.addf %440, %441 : vector<2x32xf32>
    %443 = math.tanh %442 : vector<2x32xf32>
    %444 = arith.mulf %439, %443 : vector<2x32xf32>
    %c10_110 = arith.constant 10 : index
    %c0_111 = arith.constant 0 : index
    %445 = vector.load %arg18[%c10_110, %c0_111] : memref<16x32xf32, #tpu.memory_space<vmem>>, vector<2x32xf32>
    tpu.vector_store %arg18[%c10_110, %c0_111], %444 {strides = array<i32>} : memref<16x32xf32, #tpu.memory_space<vmem>>, vector<2x32xf32>,
    %446 = vector.extract_strided_slice %328 {offsets = [12, 0], sizes = [2, 128], strides = [1, 1]} : vector<16x128xf32> to vector<2x128xf32>
    %cst_112 = arith.constant dense<0.000000e+00> : vector<2x128xf32>
    %447 = tpu.matmul %444, %329, %cst_112 {dimension_numbers = #tpu.dot_dimension_numbers<[1], [0], [0], [1], [0, 0, 1, 1], [], []>} : vector<2x32xf32>, vector<32x128xf32>, vector<2x128xf32> -> vector<2x128xf32>
    %448 = arith.addf %446, %447 : vector<2x128xf32>
    %449 = arith.negf %448 : vector<2x128xf32>
    %450 = math.exp %449 : vector<2x128xf32>
    %cst_113 = arith.constant 1.000000e+00 : f32
    %451 = vector.broadcast %cst_113 : f32 to vector<2x128xf32>
    %452 = arith.addf %451, %450 : vector<2x128xf32>
    %453 = arith.divf %451, %452 : vector<2x128xf32>
    %454 = math.tanh %448 : vector<2x128xf32>
    %455 = vector.extract_strided_slice %453 {offsets = [0, 0], sizes = [2, 32], strides = [1, 1]} : vector<2x128xf32> to vector<2x32xf32>
    %456 = vector.extract_strided_slice %453 {offsets = [0, 32], sizes = [2, 32], strides = [1, 1]} : vector<2x128xf32> to vector<2x32xf32>
    %457 = vector.extract_strided_slice %454 {offsets = [0, 64], sizes = [2, 32], strides = [1, 1]} : vector<2x128xf32> to vector<2x32xf32>
    %458 = vector.extract_strided_slice %453 {offsets = [0, 96], sizes = [2, 32], strides = [1, 1]} : vector<2x128xf32> to vector<2x32xf32>
    %459 = arith.mulf %456, %442 : vector<2x32xf32>
    %460 = arith.mulf %455, %457 : vector<2x32xf32>
    %461 = arith.addf %459, %460 : vector<2x32xf32>
    %462 = math.tanh %461 : vector<2x32xf32>
    %463 = arith.mulf %458, %462 : vector<2x32xf32>
    %c12_114 = arith.constant 12 : index
    %c0_115 = arith.constant 0 : index
    %464 = vector.load %arg18[%c12_114, %c0_115] : memref<16x32xf32, #tpu.memory_space<vmem>>, vector<2x32xf32>
    tpu.vector_store %arg18[%c12_114, %c0_115], %463 {strides = array<i32>} : memref<16x32xf32, #tpu.memory_space<vmem>>, vector<2x32xf32>,
    %465 = vector.extract_strided_slice %328 {offsets = [14, 0], sizes = [2, 128], strides = [1, 1]} : vector<16x128xf32> to vector<2x128xf32>
    %cst_116 = arith.constant dense<0.000000e+00> : vector<2x128xf32>
    %466 = tpu.matmul %463, %329, %cst_116 {dimension_numbers = #tpu.dot_dimension_numbers<[1], [0], [0], [1], [0, 0, 1, 1], [], []>} : vector<2x32xf32>, vector<32x128xf32>, vector<2x128xf32> -> vector<2x128xf32>
    %467 = arith.addf %465, %466 : vector<2x128xf32>
    %468 = arith.negf %467 : vector<2x128xf32>
    %469 = math.exp %468 : vector<2x128xf32>
    %cst_117 = arith.constant 1.000000e+00 : f32
    %470 = vector.broadcast %cst_117 : f32 to vector<2x128xf32>
    %471 = arith.addf %470, %469 : vector<2x128xf32>
    %472 = arith.divf %470, %471 : vector<2x128xf32>
    %473 = math.tanh %467 : vector<2x128xf32>
    %474 = vector.extract_strided_slice %472 {offsets = [0, 0], sizes = [2, 32], strides = [1, 1]} : vector<2x128xf32> to vector<2x32xf32>
    %475 = vector.extract_strided_slice %472 {offsets = [0, 32], sizes = [2, 32], strides = [1, 1]} : vector<2x128xf32> to vector<2x32xf32>
    %476 = vector.extract_strided_slice %473 {offsets = [0, 64], sizes = [2, 32], strides = [1, 1]} : vector<2x128xf32> to vector<2x32xf32>
    %477 = vector.extract_strided_slice %472 {offsets = [0, 96], sizes = [2, 32], strides = [1, 1]} : vector<2x128xf32> to vector<2x32xf32>
    %478 = arith.mulf %475, %461 : vector<2x32xf32>
    %479 = arith.mulf %474, %476 : vector<2x32xf32>
    %480 = arith.addf %478, %479 : vector<2x32xf32>
    %481 = math.tanh %480 : vector<2x32xf32>
    %482 = arith.mulf %477, %481 : vector<2x32xf32>
    %c14_118 = arith.constant 14 : index
    %c0_119 = arith.constant 0 : index
    %483 = vector.load %arg18[%c14_118, %c0_119] : memref<16x32xf32, #tpu.memory_space<vmem>>, vector<2x32xf32>
    tpu.vector_store %arg18[%c14_118, %c0_119], %482 {strides = array<i32>} : memref<16x32xf32, #tpu.memory_space<vmem>>, vector<2x32xf32>,
    %c0_120 = arith.constant 0 : index
    %c0_121 = arith.constant 0 : index
    %484 = vector.load %arg10[%c0_120, %c0_121] : memref<64x128xf32, #tpu.memory_space<vmem>>, vector<64x128xf32>
    %cst_122 = arith.constant dense<0.000000e+00> : vector<16x128xf32>
    %485 = tpu.matmul %323, %484, %cst_122 {dimension_numbers = #tpu.dot_dimension_numbers<[1], [0], [0], [1], [0, 0, 1, 1], [], []>} : vector<16x64xf32>, vector<64x128xf32>, vector<16x128xf32> -> vector<16x128xf32>
    %c0_123 = arith.constant 0 : index
    %c0_124 = arith.constant 0 : index
    %486 = vector.load %arg12[%c0_123, %c0_124] : memref<1x128xf32, #tpu.memory_space<vmem>>, vector<1x128xf32>
    %487 = vector.broadcast %486 : vector<1x128xf32> to vector<16x128xf32>
    %488 = arith.addf %485, %487 : vector<16x128xf32>
    %c0_125 = arith.constant 0 : index
    %c0_126 = arith.constant 0 : index
    %489 = vector.load %arg11[%c0_125, %c0_126] : memref<32x128xf32, #tpu.memory_space<vmem>>, vector<32x128xf32>
    %cst_127 = arith.constant 0.000000e+00 : f32
    %490 = vector.broadcast %cst_127 : f32 to vector<2x32xf32>
    %cst_128 = arith.constant 0.000000e+00 : f32
    %491 = vector.broadcast %cst_128 : f32 to vector<2x32xf32>
    %492 = vector.extract_strided_slice %488 {offsets = [14, 0], sizes = [2, 128], strides = [1, 1]} : vector<16x128xf32> to vector<2x128xf32>
    %cst_129 = arith.constant dense<0.000000e+00> : vector<2x128xf32>
    %493 = tpu.matmul %490, %489, %cst_129 {dimension_numbers = #tpu.dot_dimension_numbers<[1], [0], [0], [1], [0, 0, 1, 1], [], []>} : vector<2x32xf32>, vector<32x128xf32>, vector<2x128xf32> -> vector<2x128xf32>
    %494 = arith.addf %492, %493 : vector<2x128xf32>
    %495 = arith.negf %494 : vector<2x128xf32>
    %496 = math.exp %495 : vector<2x128xf32>
    %cst_130 = arith.constant 1.000000e+00 : f32
    %497 = vector.broadcast %cst_130 : f32 to vector<2x128xf32>
    %498 = arith.addf %497, %496 : vector<2x128xf32>
    %499 = arith.divf %497, %498 : vector<2x128xf32>
    %500 = math.tanh %494 : vector<2x128xf32>
    %501 = vector.extract_strided_slice %499 {offsets = [0, 0], sizes = [2, 32], strides = [1, 1]} : vector<2x128xf32> to vector<2x32xf32>
    %502 = vector.extract_strided_slice %499 {offsets = [0, 32], sizes = [2, 32], strides = [1, 1]} : vector<2x128xf32> to vector<2x32xf32>
    %503 = vector.extract_strided_slice %500 {offsets = [0, 64], sizes = [2, 32], strides = [1, 1]} : vector<2x128xf32> to vector<2x32xf32>
    %504 = vector.extract_strided_slice %499 {offsets = [0, 96], sizes = [2, 32], strides = [1, 1]} : vector<2x128xf32> to vector<2x32xf32>
    %505 = arith.mulf %502, %491 : vector<2x32xf32>
    %506 = arith.mulf %501, %503 : vector<2x32xf32>
    %507 = arith.addf %505, %506 : vector<2x32xf32>
    %508 = math.tanh %507 : vector<2x32xf32>
    %509 = arith.mulf %504, %508 : vector<2x32xf32>
    %c14_131 = arith.constant 14 : index
    %c0_132 = arith.constant 0 : index
    %510 = vector.load %arg19[%c14_131, %c0_132] : memref<16x32xf32, #tpu.memory_space<vmem>>, vector<2x32xf32>
    tpu.vector_store %arg19[%c14_131, %c0_132], %509 {strides = array<i32>} : memref<16x32xf32, #tpu.memory_space<vmem>>, vector<2x32xf32>,
    %511 = vector.extract_strided_slice %488 {offsets = [12, 0], sizes = [2, 128], strides = [1, 1]} : vector<16x128xf32> to vector<2x128xf32>
    %cst_133 = arith.constant dense<0.000000e+00> : vector<2x128xf32>
    %512 = tpu.matmul %509, %489, %cst_133 {dimension_numbers = #tpu.dot_dimension_numbers<[1], [0], [0], [1], [0, 0, 1, 1], [], []>} : vector<2x32xf32>, vector<32x128xf32>, vector<2x128xf32> -> vector<2x128xf32>
    %513 = arith.addf %511, %512 : vector<2x128xf32>
    %514 = arith.negf %513 : vector<2x128xf32>
    %515 = math.exp %514 : vector<2x128xf32>
    %cst_134 = arith.constant 1.000000e+00 : f32
    %516 = vector.broadcast %cst_134 : f32 to vector<2x128xf32>
    %517 = arith.addf %516, %515 : vector<2x128xf32>
    %518 = arith.divf %516, %517 : vector<2x128xf32>
    %519 = math.tanh %513 : vector<2x128xf32>
    %520 = vector.extract_strided_slice %518 {offsets = [0, 0], sizes = [2, 32], strides = [1, 1]} : vector<2x128xf32> to vector<2x32xf32>
    %521 = vector.extract_strided_slice %518 {offsets = [0, 32], sizes = [2, 32], strides = [1, 1]} : vector<2x128xf32> to vector<2x32xf32>
    %522 = vector.extract_strided_slice %519 {offsets = [0, 64], sizes = [2, 32], strides = [1, 1]} : vector<2x128xf32> to vector<2x32xf32>
    %523 = vector.extract_strided_slice %518 {offsets = [0, 96], sizes = [2, 32], strides = [1, 1]} : vector<2x128xf32> to vector<2x32xf32>
    %524 = arith.mulf %521, %507 : vector<2x32xf32>
    %525 = arith.mulf %520, %522 : vector<2x32xf32>
    %526 = arith.addf %524, %525 : vector<2x32xf32>
    %527 = math.tanh %526 : vector<2x32xf32>
    %528 = arith.mulf %523, %527 : vector<2x32xf32>
    %c12_135 = arith.constant 12 : index
    %c0_136 = arith.constant 0 : index
    %529 = vector.load %arg19[%c12_135, %c0_136] : memref<16x32xf32, #tpu.memory_space<vmem>>, vector<2x32xf32>
    tpu.vector_store %arg19[%c12_135, %c0_136], %528 {strides = array<i32>} : memref<16x32xf32, #tpu.memory_space<vmem>>, vector<2x32xf32>,
    %530 = vector.extract_strided_slice %488 {offsets = [10, 0], sizes = [2, 128], strides = [1, 1]} : vector<16x128xf32> to vector<2x128xf32>
    %cst_137 = arith.constant dense<0.000000e+00> : vector<2x128xf32>
    %531 = tpu.matmul %528, %489, %cst_137 {dimension_numbers = #tpu.dot_dimension_numbers<[1], [0], [0], [1], [0, 0, 1, 1], [], []>} : vector<2x32xf32>, vector<32x128xf32>, vector<2x128xf32> -> vector<2x128xf32>
    %532 = arith.addf %530, %531 : vector<2x128xf32>
    %533 = arith.negf %532 : vector<2x128xf32>
    %534 = math.exp %533 : vector<2x128xf32>
    %cst_138 = arith.constant 1.000000e+00 : f32
    %535 = vector.broadcast %cst_138 : f32 to vector<2x128xf32>
    %536 = arith.addf %535, %534 : vector<2x128xf32>
    %537 = arith.divf %535, %536 : vector<2x128xf32>
    %538 = math.tanh %532 : vector<2x128xf32>
    %539 = vector.extract_strided_slice %537 {offsets = [0, 0], sizes = [2, 32], strides = [1, 1]} : vector<2x128xf32> to vector<2x32xf32>
    %540 = vector.extract_strided_slice %537 {offsets = [0, 32], sizes = [2, 32], strides = [1, 1]} : vector<2x128xf32> to vector<2x32xf32>
    %541 = vector.extract_strided_slice %538 {offsets = [0, 64], sizes = [2, 32], strides = [1, 1]} : vector<2x128xf32> to vector<2x32xf32>
    %542 = vector.extract_strided_slice %537 {offsets = [0, 96], sizes = [2, 32], strides = [1, 1]} : vector<2x128xf32> to vector<2x32xf32>
    %543 = arith.mulf %540, %526 : vector<2x32xf32>
    %544 = arith.mulf %539, %541 : vector<2x32xf32>
    %545 = arith.addf %543, %544 : vector<2x32xf32>
    %546 = math.tanh %545 : vector<2x32xf32>
    %547 = arith.mulf %542, %546 : vector<2x32xf32>
    %c10_139 = arith.constant 10 : index
    %c0_140 = arith.constant 0 : index
    %548 = vector.load %arg19[%c10_139, %c0_140] : memref<16x32xf32, #tpu.memory_space<vmem>>, vector<2x32xf32>
    tpu.vector_store %arg19[%c10_139, %c0_140], %547 {strides = array<i32>} : memref<16x32xf32, #tpu.memory_space<vmem>>, vector<2x32xf32>,
    %549 = vector.extract_strided_slice %488 {offsets = [8, 0], sizes = [2, 128], strides = [1, 1]} : vector<16x128xf32> to vector<2x128xf32>
    %cst_141 = arith.constant dense<0.000000e+00> : vector<2x128xf32>
    %550 = tpu.matmul %547, %489, %cst_141 {dimension_numbers = #tpu.dot_dimension_numbers<[1], [0], [0], [1], [0, 0, 1, 1], [], []>} : vector<2x32xf32>, vector<32x128xf32>, vector<2x128xf32> -> vector<2x128xf32>
    %551 = arith.addf %549, %550 : vector<2x128xf32>
    %552 = arith.negf %551 : vector<2x128xf32>
    %553 = math.exp %552 : vector<2x128xf32>
    %cst_142 = arith.constant 1.000000e+00 : f32
    %554 = vector.broadcast %cst_142 : f32 to vector<2x128xf32>
    %555 = arith.addf %554, %553 : vector<2x128xf32>
    %556 = arith.divf %554, %555 : vector<2x128xf32>
    %557 = math.tanh %551 : vector<2x128xf32>
    %558 = vector.extract_strided_slice %556 {offsets = [0, 0], sizes = [2, 32], strides = [1, 1]} : vector<2x128xf32> to vector<2x32xf32>
    %559 = vector.extract_strided_slice %556 {offsets = [0, 32], sizes = [2, 32], strides = [1, 1]} : vector<2x128xf32> to vector<2x32xf32>
    %560 = vector.extract_strided_slice %557 {offsets = [0, 64], sizes = [2, 32], strides = [1, 1]} : vector<2x128xf32> to vector<2x32xf32>
    %561 = vector.extract_strided_slice %556 {offsets = [0, 96], sizes = [2, 32], strides = [1, 1]} : vector<2x128xf32> to vector<2x32xf32>
    %562 = arith.mulf %559, %545 : vector<2x32xf32>
    %563 = arith.mulf %558, %560 : vector<2x32xf32>
    %564 = arith.addf %562, %563 : vector<2x32xf32>
    %565 = math.tanh %564 : vector<2x32xf32>
    %566 = arith.mulf %561, %565 : vector<2x32xf32>
    %c8_143 = arith.constant 8 : index
    %c0_144 = arith.constant 0 : index
    %567 = vector.load %arg19[%c8_143, %c0_144] : memref<16x32xf32, #tpu.memory_space<vmem>>, vector<2x32xf32>
    tpu.vector_store %arg19[%c8_143, %c0_144], %566 {strides = array<i32>} : memref<16x32xf32, #tpu.memory_space<vmem>>, vector<2x32xf32>,
    %568 = vector.extract_strided_slice %488 {offsets = [6, 0], sizes = [2, 128], strides = [1, 1]} : vector<16x128xf32> to vector<2x128xf32>
    %cst_145 = arith.constant dense<0.000000e+00> : vector<2x128xf32>
    %569 = tpu.matmul %566, %489, %cst_145 {dimension_numbers = #tpu.dot_dimension_numbers<[1], [0], [0], [1], [0, 0, 1, 1], [], []>} : vector<2x32xf32>, vector<32x128xf32>, vector<2x128xf32> -> vector<2x128xf32>
    %570 = arith.addf %568, %569 : vector<2x128xf32>
    %571 = arith.negf %570 : vector<2x128xf32>
    %572 = math.exp %571 : vector<2x128xf32>
    %cst_146 = arith.constant 1.000000e+00 : f32
    %573 = vector.broadcast %cst_146 : f32 to vector<2x128xf32>
    %574 = arith.addf %573, %572 : vector<2x128xf32>
    %575 = arith.divf %573, %574 : vector<2x128xf32>
    %576 = math.tanh %570 : vector<2x128xf32>
    %577 = vector.extract_strided_slice %575 {offsets = [0, 0], sizes = [2, 32], strides = [1, 1]} : vector<2x128xf32> to vector<2x32xf32>
    %578 = vector.extract_strided_slice %575 {offsets = [0, 32], sizes = [2, 32], strides = [1, 1]} : vector<2x128xf32> to vector<2x32xf32>
    %579 = vector.extract_strided_slice %576 {offsets = [0, 64], sizes = [2, 32], strides = [1, 1]} : vector<2x128xf32> to vector<2x32xf32>
    %580 = vector.extract_strided_slice %575 {offsets = [0, 96], sizes = [2, 32], strides = [1, 1]} : vector<2x128xf32> to vector<2x32xf32>
    %581 = arith.mulf %578, %564 : vector<2x32xf32>
    %582 = arith.mulf %577, %579 : vector<2x32xf32>
    %583 = arith.addf %581, %582 : vector<2x32xf32>
    %584 = math.tanh %583 : vector<2x32xf32>
    %585 = arith.mulf %580, %584 : vector<2x32xf32>
    %c6_147 = arith.constant 6 : index
    %c0_148 = arith.constant 0 : index
    %586 = vector.load %arg19[%c6_147, %c0_148] : memref<16x32xf32, #tpu.memory_space<vmem>>, vector<2x32xf32>
    tpu.vector_store %arg19[%c6_147, %c0_148], %585 {strides = array<i32>} : memref<16x32xf32, #tpu.memory_space<vmem>>, vector<2x32xf32>,
    %587 = vector.extract_strided_slice %488 {offsets = [4, 0], sizes = [2, 128], strides = [1, 1]} : vector<16x128xf32> to vector<2x128xf32>
    %cst_149 = arith.constant dense<0.000000e+00> : vector<2x128xf32>
    %588 = tpu.matmul %585, %489, %cst_149 {dimension_numbers = #tpu.dot_dimension_numbers<[1], [0], [0], [1], [0, 0, 1, 1], [], []>} : vector<2x32xf32>, vector<32x128xf32>, vector<2x128xf32> -> vector<2x128xf32>
    %589 = arith.addf %587, %588 : vector<2x128xf32>
    %590 = arith.negf %589 : vector<2x128xf32>
    %591 = math.exp %590 : vector<2x128xf32>
    %cst_150 = arith.constant 1.000000e+00 : f32
    %592 = vector.broadcast %cst_150 : f32 to vector<2x128xf32>
    %593 = arith.addf %592, %591 : vector<2x128xf32>
    %594 = arith.divf %592, %593 : vector<2x128xf32>
    %595 = math.tanh %589 : vector<2x128xf32>
    %596 = vector.extract_strided_slice %594 {offsets = [0, 0], sizes = [2, 32], strides = [1, 1]} : vector<2x128xf32> to vector<2x32xf32>
    %597 = vector.extract_strided_slice %594 {offsets = [0, 32], sizes = [2, 32], strides = [1, 1]} : vector<2x128xf32> to vector<2x32xf32>
    %598 = vector.extract_strided_slice %595 {offsets = [0, 64], sizes = [2, 32], strides = [1, 1]} : vector<2x128xf32> to vector<2x32xf32>
    %599 = vector.extract_strided_slice %594 {offsets = [0, 96], sizes = [2, 32], strides = [1, 1]} : vector<2x128xf32> to vector<2x32xf32>
    %600 = arith.mulf %597, %583 : vector<2x32xf32>
    %601 = arith.mulf %596, %598 : vector<2x32xf32>
    %602 = arith.addf %600, %601 : vector<2x32xf32>
    %603 = math.tanh %602 : vector<2x32xf32>
    %604 = arith.mulf %599, %603 : vector<2x32xf32>
    %c4_151 = arith.constant 4 : index
    %c0_152 = arith.constant 0 : index
    %605 = vector.load %arg19[%c4_151, %c0_152] : memref<16x32xf32, #tpu.memory_space<vmem>>, vector<2x32xf32>
    tpu.vector_store %arg19[%c4_151, %c0_152], %604 {strides = array<i32>} : memref<16x32xf32, #tpu.memory_space<vmem>>, vector<2x32xf32>,
    %606 = vector.extract_strided_slice %488 {offsets = [2, 0], sizes = [2, 128], strides = [1, 1]} : vector<16x128xf32> to vector<2x128xf32>
    %cst_153 = arith.constant dense<0.000000e+00> : vector<2x128xf32>
    %607 = tpu.matmul %604, %489, %cst_153 {dimension_numbers = #tpu.dot_dimension_numbers<[1], [0], [0], [1], [0, 0, 1, 1], [], []>} : vector<2x32xf32>, vector<32x128xf32>, vector<2x128xf32> -> vector<2x128xf32>
    %608 = arith.addf %606, %607 : vector<2x128xf32>
    %609 = arith.negf %608 : vector<2x128xf32>
    %610 = math.exp %609 : vector<2x128xf32>
    %cst_154 = arith.constant 1.000000e+00 : f32
    %611 = vector.broadcast %cst_154 : f32 to vector<2x128xf32>
    %612 = arith.addf %611, %610 : vector<2x128xf32>
    %613 = arith.divf %611, %612 : vector<2x128xf32>
    %614 = math.tanh %608 : vector<2x128xf32>
    %615 = vector.extract_strided_slice %613 {offsets = [0, 0], sizes = [2, 32], strides = [1, 1]} : vector<2x128xf32> to vector<2x32xf32>
    %616 = vector.extract_strided_slice %613 {offsets = [0, 32], sizes = [2, 32], strides = [1, 1]} : vector<2x128xf32> to vector<2x32xf32>
    %617 = vector.extract_strided_slice %614 {offsets = [0, 64], sizes = [2, 32], strides = [1, 1]} : vector<2x128xf32> to vector<2x32xf32>
    %618 = vector.extract_strided_slice %613 {offsets = [0, 96], sizes = [2, 32], strides = [1, 1]} : vector<2x128xf32> to vector<2x32xf32>
    %619 = arith.mulf %616, %602 : vector<2x32xf32>
    %620 = arith.mulf %615, %617 : vector<2x32xf32>
    %621 = arith.addf %619, %620 : vector<2x32xf32>
    %622 = math.tanh %621 : vector<2x32xf32>
    %623 = arith.mulf %618, %622 : vector<2x32xf32>
    %c2_155 = arith.constant 2 : index
    %c0_156 = arith.constant 0 : index
    %624 = vector.load %arg19[%c2_155, %c0_156] : memref<16x32xf32, #tpu.memory_space<vmem>>, vector<2x32xf32>
    tpu.vector_store %arg19[%c2_155, %c0_156], %623 {strides = array<i32>} : memref<16x32xf32, #tpu.memory_space<vmem>>, vector<2x32xf32>,
    %625 = vector.extract_strided_slice %488 {offsets = [0, 0], sizes = [2, 128], strides = [1, 1]} : vector<16x128xf32> to vector<2x128xf32>
    %cst_157 = arith.constant dense<0.000000e+00> : vector<2x128xf32>
    %626 = tpu.matmul %623, %489, %cst_157 {dimension_numbers = #tpu.dot_dimension_numbers<[1], [0], [0], [1], [0, 0, 1, 1], [], []>} : vector<2x32xf32>, vector<32x128xf32>, vector<2x128xf32> -> vector<2x128xf32>
    %627 = arith.addf %625, %626 : vector<2x128xf32>
    %628 = arith.negf %627 : vector<2x128xf32>
    %629 = math.exp %628 : vector<2x128xf32>
    %cst_158 = arith.constant 1.000000e+00 : f32
    %630 = vector.broadcast %cst_158 : f32 to vector<2x128xf32>
    %631 = arith.addf %630, %629 : vector<2x128xf32>
    %632 = arith.divf %630, %631 : vector<2x128xf32>
    %633 = math.tanh %627 : vector<2x128xf32>
    %634 = vector.extract_strided_slice %632 {offsets = [0, 0], sizes = [2, 32], strides = [1, 1]} : vector<2x128xf32> to vector<2x32xf32>
    %635 = vector.extract_strided_slice %632 {offsets = [0, 32], sizes = [2, 32], strides = [1, 1]} : vector<2x128xf32> to vector<2x32xf32>
    %636 = vector.extract_strided_slice %633 {offsets = [0, 64], sizes = [2, 32], strides = [1, 1]} : vector<2x128xf32> to vector<2x32xf32>
    %637 = vector.extract_strided_slice %632 {offsets = [0, 96], sizes = [2, 32], strides = [1, 1]} : vector<2x128xf32> to vector<2x32xf32>
    %638 = arith.mulf %635, %621 : vector<2x32xf32>
    %639 = arith.mulf %634, %636 : vector<2x32xf32>
    %640 = arith.addf %638, %639 : vector<2x32xf32>
    %641 = math.tanh %640 : vector<2x32xf32>
    %642 = arith.mulf %637, %641 : vector<2x32xf32>
    %c0_159 = arith.constant 0 : index
    %c0_160 = arith.constant 0 : index
    %643 = vector.load %arg19[%c0_159, %c0_160] : memref<16x32xf32, #tpu.memory_space<vmem>>, vector<2x32xf32>
    tpu.vector_store %arg19[%c0_159, %c0_160], %642 {strides = array<i32>} : memref<16x32xf32, #tpu.memory_space<vmem>>, vector<2x32xf32>,
    %c0_161 = arith.constant 0 : index
    %c0_162 = arith.constant 0 : index
    %644 = vector.load %arg18[%c0_161, %c0_162] : memref<16x32xf32, #tpu.memory_space<vmem>>, vector<16x32xf32>
    %c0_163 = arith.constant 0 : index
    %c0_164 = arith.constant 0 : index
    %645 = vector.load %arg19[%c0_163, %c0_164] : memref<16x32xf32, #tpu.memory_space<vmem>>, vector<16x32xf32>
    %646 = tpu.concatenate %644, %645 in 1 : vector<16x32xf32>, vector<16x32xf32> -> vector<16x64xf32>
    %647 = vector.extract_strided_slice %646 {offsets = [14, 0], sizes = [2, 64], strides = [1, 1]} : vector<16x64xf32> to vector<2x64xf32>
    %c0_165 = arith.constant 0 : index
    %c0_166 = arith.constant 0 : index
    %648 = vector.load %arg13[%c0_165, %c0_166] : memref<64x4xf32, #tpu.memory_space<vmem>>, vector<64x4xf32>
    %cst_167 = arith.constant dense<0.000000e+00> : vector<2x4xf32>
    %649 = tpu.matmul %647, %648, %cst_167 {dimension_numbers = #tpu.dot_dimension_numbers<[1], [0], [0], [1], [0, 0, 1, 1], [], []>} : vector<2x64xf32>, vector<64x4xf32>, vector<2x4xf32> -> vector<2x4xf32>
    %c0_168 = arith.constant 0 : index
    %c0_169 = arith.constant 0 : index
    %650 = vector.load %arg14[%c0_168, %c0_169] : memref<1x4xf32, #tpu.memory_space<vmem>>, vector<1x4xf32>
    %651 = vector.broadcast %650 : vector<1x4xf32> to vector<2x4xf32>
    %652 = arith.addf %649, %651 : vector<2x4xf32>
    %c0_170 = arith.constant 0 : index
    %c0_171 = arith.constant 0 : index
    %653 = vector.load %arg15[%c0_170, %c0_171] : memref<2x4xf32, #tpu.memory_space<vmem>>, vector<2x4xf32>
    tpu.vector_store %arg15[%c0_170, %c0_171], %652 {strides = array<i32>} : memref<2x4xf32, #tpu.memory_space<vmem>>, vector<2x4xf32>,
    return
  }
}

</mosaic_0001>

<bundles_post_ra>
// kernel: deep_q_network_forward.1
= control target key start
LH: loop header
LB: loop body
LE: loop exit
PB: predicated region body
PF: predicated region fallthrough
CT: control target
= control target key end

     0   :  { %20 = vsyncpa [#allocation7], 0  ;;  %s4003_s0 = inlined_call_operand.vmem [shape: f32[16,32], index: 0, kind: input, shape index: {}]   ;;  %s4004_s1 = inlined_call_operand.vmem [shape: f32[32,128], index: 1, kind: input, shape index: {}]   ;;  %s4005_s2 = inlined_call_operand.hbm [shape: f32[32,128], index: 2, kind: input, shape index: {}]   ;;  %s4006_s3 = inlined_call_operand.vmem [shape: f32[1,128], index: 3, kind: input, shape index: {}]   ;;  %s4007_s4 = inlined_call_operand.hbm [shape: f32[32,128], index: 4, kind: input, shape index: {}]   ;;  %s4008_s5 = inlined_call_operand.hbm [shape: f32[32,128], index: 5, kind: input, shape index: {}]   ;;  %s4009_s6 = inlined_call_operand.vmem [shape: f32[1,128], index: 6, kind: input, shape index: {}]   ;;  %s4010_s7 = inlined_call_operand.vmem [shape: f32[64,128], index: 7, kind: input, shape index: {}]   ;;  %s4011_s8 = inlined_call_operand.hbm [shape: f32[32,128], index: 8, kind: input, shape index: {}]   ;;  %s4012_s9 = inlined_call_operand.vmem [shape: f32[1,128], index: 9, kind: input, shape index: {}]   ;;  %s4013_s10 = inlined_call_operand.hbm [shape: f32[64,128], index: 10, kind: input, shape index: {}]   ;;  %s4014_s11 = inlined_call_operand.hbm [shape: f32[32,128], index: 11, kind: input, shape index: {}]   ;;  %s4015_s12 = inlined_call_operand.vmem [shape: f32[1,128], index: 12, kind: input, shape index: {}]   ;;  %s4016_s13 = inlined_call_operand.vmem [shape: f32[64,4], index: 13, kind: input, shape index: {}]   ;;  %s4017_s14 = inlined_call_operand.hbm [shape: f32[1,4], index: 14, kind: input, shape index: {}]   ;;  %s4018_s15 = inlined_call_operand.hbm [shape: f32[2,4], index: 15, kind: output, shape index: {}]  }
   0x1   :  { %21 = vsyncpa [#allocation10], 0 }
   0x2   :  { %22 = vsyncpa [#allocation13], 0 }
   0x3   :  { %23 = vsyncpa [#allocation16], 0 }
   0x4   :  { %24 = vsyncpa [#allocation8], 0  ;;  %s48_s20 = sshll.u32 %s4007_s4, 4  ;;  %s3247_s21 = smov [#allocation9]   ;;  %s49_s20 = int_to_ptr.hbm [resolvable:$true] %s48_s20 }
   0x5   :  { %s50_s22 = sshll.u32 %s3247_s21, 4  ;;  %s78_s25 = sshll.u32 %s4011_s8, 4  ;;  %s51_s22 = int_to_ptr.vmem [resolvable:$true] %s50_s22  ;;  %s79_s25 = int_to_ptr.hbm [resolvable:$true] %s78_s25 }
   0x6   :  { %s3248_s26 = smov 128   ;;  %s3249_s27 = smov 8  }
   0x7   :  { %56 = dma.hbm_to_vmem [thread:$0]  %s49_s20, 512, %s51_s22, [#allocation10], %s3248_s26, %s3248_s26, %s3249_s27  }
   0x8   :  { %s3250_s28 = smov [#allocation12]   ;;  %s106_s4 = sshll.u32 %s4014_s11, 4  ;;  %s107_s4 = int_to_ptr.hbm [resolvable:$true] %s106_s4 }
   0x9   :  { %s80_s29 = sshll.u32 %s3250_s28, 4  ;;  %s33_s18 = sshll.u32 %s4005_s2, 4  ;;  %s81_s29 = int_to_ptr.vmem [resolvable:$true] %s80_s29  ;;  %s34_s18 = int_to_ptr.hbm [resolvable:$true] %s33_s18 }
   0xa   :  { %86 = dma.hbm_to_vmem [thread:$0]  %s79_s25, 512, %s81_s29, [#allocation13], %s3248_s26, %s3248_s26, %s3249_s27  }
   0xb   :  { %s3251_s19 = smov [#allocation15]   ;;  %s3252_s20 = smov [#allocation6]  }
   0xc   :  { %s108_s21 = sshll.u32 %s3251_s19, 4  ;;  %s35_s11 = sshll.u32 %s3252_s20, 4  ;;  %s109_s21 = int_to_ptr.vmem [resolvable:$true] %s108_s21  ;;  %s36_s11 = int_to_ptr.vmem [resolvable:$true] %s35_s11 }
   0xd   :  { %114 = dma.hbm_to_vmem [thread:$0]  %s107_s4, 512, %s109_s21, [#allocation16], %s3248_s26, %s3248_s26, %s3249_s27  }
   0xe   :  { %s61_s24 = sshll.u32 %s4008_s5, 4  ;;  %s93_s28 = sshll.u32 %s4013_s10, 4  ;;  %s62_s24 = int_to_ptr.hbm [resolvable:$true] %s61_s24  ;;  %s94_s28 = int_to_ptr.hbm [resolvable:$true] %s93_s28 }
   0xf   :  { %41 = dma.hbm_to_vmem [thread:$0]  %s34_s18, 512, %s36_s11, [#allocation7], %s3248_s26, %s3248_s26, %s3249_s27  }
  0x10   :  { %s3253_s29 = smov [#allocation11]   ;;  %s3254_s16 = smov [#allocation14]  }
  0x11   :  { %s63_s30 = sshll.u32 %s3253_s29, 4  ;;  %s95_s5 = sshll.u32 %s3254_s16, 4  ;;  %s64_s30 = int_to_ptr.vmem [resolvable:$true] %s63_s30  ;;  %s96_s5 = int_to_ptr.vmem [resolvable:$true] %s95_s5 }
  0x12   :  { %69 = dma.hbm_to_vmem [thread:$0]  %s62_s24, 512, %s64_s30, [#allocation10], %s3248_s26, %s3248_s26, %s3249_s27  }
  0x13   :  { %s124_s17 = sshll.u32 %s4017_s14, 4  ;;  %s3255_s10 = smov [#allocation17]   ;;  %s125_s17 = int_to_ptr.hbm [resolvable:$true] %s124_s17 }
  0x14   :  { %101 = dma.hbm_to_vmem [thread:$0]  %s94_s28, 1024, %s96_s5, [#allocation13], %s3248_s26, %s3248_s26, %s3249_s27  }
  0x15   :  { %s126_s18 = sshll.u32 %s3255_s10, 4  ;;  %s127_s18 = int_to_ptr.vmem [resolvable:$true] %s126_s18 }
  0x16   :  { %129 = dma.hbm_to_vmem [thread:$0]  %s125_s17, 16, %s127_s18, [#allocation16]  }
  0x17   :  { %3237 = dma.done.wait [#allocation7], 512  }
  0x18   :  { %3238 = vsyncadd [#allocation7], 4294966784 }
  0x19   :  { %3239 = dma.done.wait [#allocation10], 1024  }
  0x1a   :  { %3240 = vsyncadd [#allocation10], 4294966272 }
  0x1b   :  { %3241 = dma.done.wait [#allocation13], 1536  }
  0x1c   :  { %3242 = vsyncadd [#allocation13], 4294965760 }
  0x1d   :  { %3243 = dma.done.wait [#allocation16], 528  }
  0x1e   :  { %3244 = vsyncadd [#allocation16], 4294966768  ;;  %v201_v0 = vld [vmem:[#allocation6 + $0x18] sm:$0xff]  ;;  %v200_v1 = vld [vmem:[#allocation6 + $0x10] sm:$0xff]  ;;  %vm168_vm0 = vcmask 261120   ;;  %v3256_v9 = vmov 0.0  }
  0x1f   :  { %v163_v2 = vld [vmem:[%s4004_s1 + $0x18] sm:$0xff]  ;;  %217 = vmatpush.msra.mxu2 %v201_v0  ;;  %v162_v3 = vld [vmem:[%s4004_s1 + $0x10] sm:$0xff]  ;;  %v199_v4 = vld [vmem:[#allocation6 + $0x8] sm:$0xff]  ;;  %358 = vmatpush.msra.mxu3 %v201_v0  ;;  %s3257_s25 = smov 64   ;;  %vm267_vm5 = vcmask 254976   ;;  %s2689_s21 = sshll.u32 %s4018_s15, 4  ;;  %s2690_s21 = int_to_ptr.hbm [resolvable:$true] %s2689_s21 }
  0x20   :  { %187 = vmatpush.msra.mxu0 %v163_v2  ;;  %v198_v5 = vld [vmem:[#allocation6] sm:$0xff]  ;;  %v161_v6 = vld [vmem:[%s4004_s1 + $0x8] sm:$0xff]  ;;  %433 = vmatpush.msra.mxu1 %v201_v0 }
  0x21   :  { %218 = vmatpush.msra.mxu2 %v200_v1  ;;  %v160_v7 = vld [vmem:[%s4004_s1] sm:$0xff]  ;;  %359 = vmatpush.msra.mxu3 %v200_v1 }
  0x22   :  { %188 = vmatpush.msra.mxu0 %v162_v3  ;;  %434 = vmatpush.msra.mxu1 %v200_v1  ;;  %v3394_v8 = vld [vmem:[%s4003_s0] sm:$0xff] }
  0x23   :  { %219 = vmatpush.msra.mxu2 %v199_v4  ;;  %360 = vmatpush.msra.mxu3 %v199_v4  ;;  %v3402_v10 = vld [vmem:[%s4006_s3] ss:$0 sm:$0xff]  ;;  %s3258_s3 = smov 32  }
  0x24   :  { %189 = vmatpush.msra.mxu0 %v161_v6  ;;  %435 = vmatpush.msra.mxu1 %v199_v4 }
  0x25   :  { %220 = vmatpush.msra.mxu2 %v198_v5  ;;  %361 = vmatpush.msra.mxu3 %v198_v5 }
  0x26   :  { %190 = vmatpush.msra.mxu0 %v160_v7  ;;  %221 = vmatmul.f32.vlgmr.msra.gmra.mxu2 %v3256_v9 }
  0x27   :  { %2702 = vmatmul.msk.f32.vlgmr.msra.gmra.mxu0 %vm168_vm0, %v3394_v8  ;;  %283 = vmatpush.msrb.mxu2 %v201_v0 }
  0x28   :  { %436 = vmatpush.msra.mxu1 %v198_v5  ;;  %576 = vmatpush.msrb.mxu3 %v201_v0 }
  0x29   :  { %284 = vmatpush.msrb.mxu2 %v200_v1  ;;  %650 = vmatpush.msrb.mxu0 %v201_v0 }
  0x2a   :  { %577 = vmatpush.msrb.mxu3 %v200_v1  ;;  %724 = vmatpush.msrb.mxu1 %v201_v0 }
  0x2b   :  { %285 = vmatpush.msrb.mxu2 %v199_v4  ;;  %651 = vmatpush.msrb.mxu0 %v200_v1 }
  0x2c   :  { %578 = vmatpush.msrb.mxu3 %v199_v4  ;;  %725 = vmatpush.msrb.mxu1 %v200_v1 }
  0x2d   :  { %286 = vmatpush.msrb.mxu2 %v198_v5  ;;  %652 = vmatpush.msrb.mxu0 %v199_v4 }
  0x2e   :  { %579 = vmatpush.msrb.mxu3 %v198_v5  ;;  %726 = vmatpush.msrb.mxu1 %v199_v4 }
  0x2f   :  { %508 = vmatpush.msra.mxu2 %v201_v0  ;;  %653 = vmatpush.msrb.mxu0 %v198_v5 }
  0x30   :  { %727 = vmatpush.msrb.mxu1 %v198_v5 }
  0x31   :  { %509 = vmatpush.msra.mxu2 %v200_v1 }
  0x33   :  { %510 = vmatpush.msra.mxu2 %v199_v4 }
  0x35   :  { %511 = vmatpush.msra.mxu2 %v198_v5 }
  0xa4   :  { %v192_v11 = vpop.f32.mrf.mxu0 }
  0xa5   :  { %v3405_v12 = vadd.f32 %v3402_v10, %v192_v11 }
  0xa9   :  { %v222_v13 = vpop.f32.mrf.mxu2 }
  0xaa   :  { %v225_v14 = vadd.f32 %v222_v13, %v3405_v12 }
  0xac   :  { %2789 = vtanh.f32 %v225_v14  ;;  %v2704_v16 = vmul.f32 -1.442695, %v225_v14 }
  0xae   :  { %2791 = vpow2.f32 %v2704_v16 }
  0xb2   :  { %v2790_v15 = vpop.eup %2789 }
  0xb3   :  { %248 = vrot.lane.b32.xlu0 %v2790_v15, %s3257_s25 }
  0xb4   :  { %v2792_v17 = vpop.eup %2791 }
  0xb5   :  { %v229_v18 = vadd.f32 1.0, %v2792_v17 }
  0xb7   :  { %2793 = vrcp.f32 %v229_v18  ;;  %v241_v24 = vand.u32 2147483648, %v229_v18  ;;  %vm235_vm2 = vweird.f32 %v229_v18  ;;  %v239_v25 = vand.u32 2147483647, %v229_v18 }
  0xb9   :  { %v242_v27 = vor.u32 1.1754944e-38, %v241_v24  ;;  %vm240_vm4 = vcmp.eq.f32.partialorder %v239_v25, 8.507059e+37 }
  0xbd   :  { %v2794_v19 = vpop.eup %2793 }
  0xbe   :  { %v231_v20 = vmul.f32 %v2794_v19, %v229_v18  ;;  %vm236_vm1 = vweird.f32 %v2794_v19 }
  0xbf   :  { %vm237_vm3 = vmor %vm235_vm2, %vm236_vm1 }
  0xc0   :  { %v232_v21 = vsub.f32 1.0, %v231_v20 }
  0xc2   :  { %v233_v22 = vmul.f32 %v2794_v19, %v232_v21 }
  0xc4   :  { %v234_v23 = vadd.f32 %v2794_v19, %v233_v22 }
  0xc6   :  { %v238_v26 = vsel %vm237_vm3, %v2794_v19, %v234_v23 }
  0xc7   :  { %v243_v29 = vsel %vm240_vm4, %v242_v27, %v238_v26 }
  0xc8   :  { %v246_v31 = vmul.f32 0.0, %v243_v29 }
 0x125   :  { %v249_v28 = vpop.permute.xlu0 %248 }
 0x126   :  { %v251_v30 = vmul.f32 %v249_v28, %v243_v29 }
 0x128   :  { %253 = vrot.lane.b32.xlu0 %v251_v30, %s3258_s3 }
 0x19a   :  { %v254_v32 = vpop.permute.xlu0 %253 }
 0x19b   :  { %v256_v33 = vadd.f32 %v254_v32, %v246_v31 }
 0x19d   :  { %2795 = vtanh.f32 %v256_v33  ;;  %v316_v57 = vrot.slane %v256_v33, 6 }
 0x1a3   :  { %v2796_v34 = vpop.eup %2795 }
 0x1a4   :  { %259 = vrot.lane.b32.xlu1 %v2796_v34, %s3257_s25 }
 0x216   :  { %v260_v35 = vpop.permute.xlu1 %259 }
 0x217   :  { %v262_v36 = vmul.f32 %v260_v35, %v243_v29 }
 0x219   :  { %264 = vrot.lane.b32.xlu1 %v262_v36, %s3258_s3 }
 0x28b   :  { %v265_v37 = vpop.permute.xlu1 %264 }
 0x28c   :  { %268 = vst.msk [vmem:[#allocation2] sm:$0x3] %vm267_vm5, %v265_v37  ;;  %2705 = vmatmul.msk.f32.vlgmr.msrb.gmra.mxu2 %vm168_vm0, %v265_v37 }
 0x30f   :  { %v288_v38 = vpop.f32.mrf.mxu2 }
 0x310   :  { %v292_v39 = vrot.slane %v288_v38, 6 }
 0x312   :  { %v294_v40 = vadd.f32 %v292_v39, %v3405_v12 }
 0x314   :  { %2797 = vtanh.f32 %v294_v40  ;;  %v2706_v42 = vmul.f32 -1.442695, %v294_v40 }
 0x316   :  { %2799 = vpow2.f32 %v2706_v42 }
 0x31a   :  { %v2798_v41 = vpop.eup %2797 }
 0x31b   :  { %320 = vrot.lane.b32.xlu2 %v2798_v41, %s3257_s25 }
 0x31c   :  { %v2800_v43 = vpop.eup %2799 }
 0x31d   :  { %v298_v44 = vadd.f32 1.0, %v2800_v43 }
 0x31f   :  { %2801 = vrcp.f32 %v298_v44  ;;  %v310_v50 = vand.u32 2147483648, %v298_v44  ;;  %vm304_vm7 = vweird.f32 %v298_v44  ;;  %v308_v51 = vand.u32 2147483647, %v298_v44 }
 0x321   :  { %v311_v53 = vor.u32 1.1754944e-38, %v310_v50  ;;  %vm309_vm9 = vcmp.eq.f32.partialorder %v308_v51, 8.507059e+37 }
 0x325   :  { %v2802_v45 = vpop.eup %2801 }
 0x326   :  { %v300_v46 = vmul.f32 %v2802_v45, %v298_v44  ;;  %vm305_vm6 = vweird.f32 %v2802_v45 }
 0x327   :  { %vm306_vm8 = vmor %vm304_vm7, %vm305_vm6 }
 0x328   :  { %v301_v47 = vsub.f32 1.0, %v300_v46 }
 0x32a   :  { %v302_v48 = vmul.f32 %v2802_v45, %v301_v47 }
 0x32c   :  { %v303_v49 = vadd.f32 %v2802_v45, %v302_v48 }
 0x32e   :  { %v307_v52 = vsel %vm306_vm8, %v2802_v45, %v303_v49 }
 0x32f   :  { %v312_v55 = vsel %vm309_vm9, %v311_v53, %v307_v52 }
 0x330   :  { %v318_v58 = vmul.f32 %v316_v57, %v312_v55 }
 0x375   :  { %v321_v54 = vpop.permute.xlu2 %320 }
 0x376   :  { %v323_v56 = vmul.f32 %v321_v54, %v312_v55 }
 0x378   :  { %325 = vrot.lane.b32.xlu2 %v323_v56, %s3258_s3 }
 0x3d2   :  { %v326_v59 = vpop.permute.xlu2 %325 }
 0x3d3   :  { %v328_v60 = vadd.f32 %v326_v59, %v318_v58 }
 0x3d5   :  { %2803 = vtanh.f32 %v328_v60  ;;  %v391_v25 = vrot.slane %v328_v60, 6  ;;  %v159_v60 = vld [vmem:[%s4003_s0 + $0x8] sm:$0xff] }
 0x3d6   :  { %2703 = vmatmul.msk.f32.gmra.mxu0 %vm168_vm0, %v159_v60 }
 0x3db   :  { %v2804_v61 = vpop.eup %2803 }
 0x3dc   :  { %331 = vrot.lane.b32.xlu0 %v2804_v61, %s3257_s25 }
 0x44e   :  { %v332_v62 = vpop.permute.xlu0 %331 }
 0x44f   :  { %v3418_v63 = vmul.f32 %v332_v62, %v312_v55 }
 0x451   :  { %v341_v0 = vrot.slane %v3418_v63, 2 }
 0x453   :  { %342 = vrot.lane.b32.xlu1 %v341_v0, %s3258_s3  ;;  %v195_v62 = vpop.f32.mrf.mxu0 }
 0x454   :  { %v3446_v0 = vadd.f32 %v3402_v10, %v195_v62 }
 0x4c5   :  { %v343_v1 = vpop.permute.xlu1 %342 }
 0x4c6   :  { %2707 = vmatmul.msk.f32.vlgmr.msra.gmra.mxu3 %vm168_vm0, %v343_v1 }
 0x549   :  { %v363_v2 = vpop.f32.mrf.mxu3 }
 0x54a   :  { %v367_v3 = vrot.slane %v363_v2, 4 }
 0x54c   :  { %v369_v4 = vadd.f32 %v367_v3, %v3405_v12 }
 0x54e   :  { %2805 = vtanh.f32 %v369_v4  ;;  %v2708_v6 = vmul.f32 -1.442695, %v369_v4 }
 0x550   :  { %2807 = vpow2.f32 %v2708_v6 }
 0x554   :  { %v2806_v5 = vpop.eup %2805 }
 0x555   :  { %395 = vrot.lane.b32.xlu2 %v2806_v5, %s3257_s25 }
 0x556   :  { %v2808_v7 = vpop.eup %2807 }
 0x557   :  { %v373_v11 = vadd.f32 1.0, %v2808_v7 }
 0x559   :  { %2809 = vrcp.f32 %v373_v11  ;;  %v385_v18 = vand.u32 2147483648, %v373_v11  ;;  %vm379_vm11 = vweird.f32 %v373_v11  ;;  %v383_v19 = vand.u32 2147483647, %v373_v11 }
 0x55b   :  { %v386_v21 = vor.u32 1.1754944e-38, %v385_v18  ;;  %vm384_vm13 = vcmp.eq.f32.partialorder %v383_v19, 8.507059e+37 }
 0x55f   :  { %v2810_v13 = vpop.eup %2809 }
 0x560   :  { %v375_v14 = vmul.f32 %v2810_v13, %v373_v11  ;;  %vm380_vm10 = vweird.f32 %v2810_v13 }
 0x561   :  { %vm381_vm12 = vmor %vm379_vm11, %vm380_vm10 }
 0x562   :  { %v376_v15 = vsub.f32 1.0, %v375_v14 }
 0x564   :  { %v377_v16 = vmul.f32 %v2810_v13, %v376_v15 }
 0x566   :  { %v378_v17 = vadd.f32 %v2810_v13, %v377_v16 }
 0x568   :  { %v382_v20 = vsel %vm381_vm12, %v2810_v13, %v378_v17 }
 0x569   :  { %v387_v23 = vsel %vm384_vm13, %v386_v21, %v382_v20 }
 0x56a   :  { %v393_v26 = vmul.f32 %v391_v25, %v387_v23 }
 0x5af   :  { %v396_v22 = vpop.permute.xlu2 %395 }
 0x5b0   :  { %v398_v24 = vmul.f32 %v396_v22, %v387_v23 }
 0x5b2   :  { %400 = vrot.lane.b32.xlu0 %v398_v24, %s3258_s3 }
 0x624   :  { %v401_v27 = vpop.permute.xlu0 %400 }
 0x625   :  { %v403_v28 = vadd.f32 %v401_v27, %v393_v26  ;;  %v784_v27 = vld [vmem:[#allocation9 + $0x18] sm:$0xff] }
 0x626   :  { %801 = vmatpush.msrb.mxu2 %v784_v27 }
 0x627   :  { %2811 = vtanh.f32 %v403_v28  ;;  %v466_v52 = vrot.slane %v403_v28, 6  ;;  %v783_v28 = vld [vmem:[#allocation9 + $0x10] sm:$0xff] }
 0x628   :  { %802 = vmatpush.msrb.mxu2 %v783_v28 }
 0x62d   :  { %v2812_v29 = vpop.eup %2811 }
 0x62e   :  { %406 = vrot.lane.b32.xlu1 %v2812_v29, %s3257_s25  ;;  %v782_v29 = vld [vmem:[#allocation9 + $0x8] sm:$0xff] }
 0x62f   :  { %803 = vmatpush.msrb.mxu2 %v782_v29 }
 0x6a0   :  { %v407_v30 = vpop.permute.xlu1 %406 }
 0x6a1   :  { %v3427_v31 = vmul.f32 %v407_v30, %v387_v23  ;;  %v781_v30 = vld [vmem:[#allocation9] sm:$0xff] }
 0x6a2   :  { %804 = vmatpush.msrb.mxu2 %v781_v30 }
 0x6a3   :  { %v416_v32 = vrot.slane %v3427_v31, 4 }
 0x6a5   :  { %417 = vrot.lane.b32.xlu2 %v416_v32, %s3258_s3 }
 0x6ff   :  { %v418_v33 = vpop.permute.xlu2 %417 }
 0x700   :  { %2709 = vmatmul.msk.f32.vlgmr.msra.gmra.mxu1 %vm168_vm0, %v418_v33 }
 0x77d   :  { %v438_v34 = vpop.f32.mrf.mxu1 }
 0x77e   :  { %v442_v35 = vrot.slane %v438_v34, 2  ;;  %v3459_v34 = vld [vmem:[#allocation11 + $0x18] sm:$0xff] }
 0x77f   :  { %828 = vmatpush.msra.mxu3 %v3459_v34  ;;  %899 = vmatpush.msra.mxu0 %v3459_v34 }
 0x780   :  { %v444_v36 = vadd.f32 %v442_v35, %v3405_v12  ;;  %v3461_v35 = vld [vmem:[#allocation11 + $0x10] sm:$0xff]  ;;  %973 = vmatpush.msra.mxu1 %v3459_v34 }
 0x781   :  { %829 = vmatpush.msra.mxu3 %v3461_v35  ;;  %900 = vmatpush.msra.mxu0 %v3461_v35 }
 0x782   :  { %2813 = vtanh.f32 %v444_v36  ;;  %v2710_v38 = vmul.f32 -1.442695, %v444_v36  ;;  %v3465_v36 = vld [vmem:[#allocation11 + $0x8] sm:$0xff]  ;;  %974 = vmatpush.msra.mxu1 %v3461_v35 }
 0x783   :  { %830 = vmatpush.msra.mxu3 %v3465_v36  ;;  %901 = vmatpush.msra.mxu0 %v3465_v36 }
 0x784   :  { %2815 = vpow2.f32 %v2710_v38  ;;  %975 = vmatpush.msra.mxu1 %v3465_v36  ;;  %v2785_v38 = vld [vmem:[%s4009_s6] ss:$0 sm:$0xff] }
 0x788   :  { %v2814_v37 = vpop.eup %2813 }
 0x789   :  { %470 = vrot.lane.b32.xlu0 %v2814_v37, %s3257_s25 }
 0x78a   :  { %v2816_v39 = vpop.eup %2815 }
 0x78b   :  { %v448_v40 = vadd.f32 1.0, %v2816_v39 }
 0x78d   :  { %2817 = vrcp.f32 %v448_v40  ;;  %v460_v46 = vand.u32 2147483648, %v448_v40  ;;  %vm454_vm15 = vweird.f32 %v448_v40  ;;  %v458_v47 = vand.u32 2147483647, %v448_v40 }
 0x78f   :  { %v461_v48 = vor.u32 1.1754944e-38, %v460_v46  ;;  %vm459_vm2 = vcmp.eq.f32.partialorder %v458_v47, 8.507059e+37 }
 0x793   :  { %v2818_v41 = vpop.eup %2817 }
 0x794   :  { %v450_v42 = vmul.f32 %v2818_v41, %v448_v40  ;;  %vm455_vm14 = vweird.f32 %v2818_v41 }
 0x795   :  { %vm456_vm1 = vmor %vm454_vm15, %vm455_vm14 }
 0x796   :  { %v451_v43 = vsub.f32 1.0, %v450_v42 }
 0x798   :  { %v452_v44 = vmul.f32 %v2818_v41, %v451_v43 }
 0x79a   :  { %v453_v45 = vadd.f32 %v2818_v41, %v452_v44 }
 0x79c   :  { %v457_v12 = vsel %vm456_vm1, %v2818_v41, %v453_v45 }
 0x79d   :  { %v462_v50 = vsel %vm459_vm2, %v461_v48, %v457_v12 }
 0x79e   :  { %v468_v53 = vmul.f32 %v466_v52, %v462_v50 }
 0x7fb   :  { %v471_v49 = vpop.permute.xlu0 %470 }
 0x7fc   :  { %v473_v51 = vmul.f32 %v471_v49, %v462_v50 }
 0x7fe   :  { %475 = vrot.lane.b32.xlu1 %v473_v51, %s3258_s3 }
 0x870   :  { %v476_v54 = vpop.permute.xlu1 %475 }
 0x871   :  { %v478_v55 = vadd.f32 %v476_v54, %v468_v53 }
 0x873   :  { %2819 = vtanh.f32 %v478_v55  ;;  %v538_v22 = vrot.slane %v478_v55, 6 }
 0x879   :  { %v2820_v56 = vpop.eup %2819 }
 0x87a   :  { %481 = vrot.lane.b32.xlu2 %v2820_v56, %s3257_s25 }
 0x8d4   :  { %v482_v57 = vpop.permute.xlu2 %481 }
 0x8d5   :  { %v3436_v58 = vmul.f32 %v482_v57, %v462_v50 }
 0x8d7   :  { %v491_v59 = vrot.slane %v3436_v58, 6 }
 0x8d9   :  { %492 = vrot.lane.b32.xlu0 %v491_v59, %s3258_s3 }
 0x94b   :  { %v493_v61 = vpop.permute.xlu0 %492 }
 0x94c   :  { %2711 = vmatmul.msk.f32.vlgmr.msra.gmra.mxu2 %vm168_vm0, %v493_v61 }
 0x94d   :  { %1263 = vmatpush.msra.mxu2 %v3459_v34 }
 0x94f   :  { %1264 = vmatpush.msra.mxu2 %v3461_v35 }
 0x951   :  { %1265 = vmatpush.msra.mxu2 %v3465_v36 }
 0x954   :  { %2719 = vmatmul.msk.f32.vlgmr.msrb.gmra.mxu2 %vm168_vm0, %v3394_v8  ;;  %v3471_v8 = vld [vmem:[#allocation11] sm:$0xff] }
 0x955   :  { %831 = vmatpush.msra.mxu3 %v3471_v8  ;;  %902 = vmatpush.msra.mxu0 %v3471_v8 }
 0x956   :  { %976 = vmatpush.msra.mxu1 %v3471_v8  ;;  %1266 = vmatpush.msra.mxu2 %v3471_v8 }
 0x95c   :  { %2720 = vmatmul.msk.f32.gmra.mxu2 %vm168_vm0, %v159_v60 }
 0x9cf   :  { %v513_v1 = vpop.f32.mrf.mxu2 }
 0x9d0   :  { %v516_v2 = vadd.f32 %v513_v1, %v3446_v0 }
 0x9d2   :  { %2821 = vtanh.f32 %v516_v2  ;;  %v2712_v4 = vmul.f32 -1.442695, %v516_v2 }
 0x9d4   :  { %2823 = vpow2.f32 %v2712_v4 }
 0x9d7   :  { %v806_v39 = vpop.f32.mrf.mxu2 }
 0x9d8   :  { %v2822_v3 = vpop.eup %2821  ;;  %v3497_v40 = vadd.f32 %v2785_v38, %v806_v39 }
 0x9d9   :  { %542 = vrot.lane.b32.xlu1 %v2822_v3, %s3257_s25 }
 0x9da   :  { %v2824_v5 = vpop.eup %2823 }
 0x9db   :  { %v520_v6 = vadd.f32 1.0, %v2824_v5 }
 0x9dd   :  { %2825 = vrcp.f32 %v520_v6  ;;  %v532_v10 = vand.u32 2147483648, %v520_v6  ;;  %vm526_vm4 = vweird.f32 %v520_v6  ;;  %v530_v16 = vand.u32 2147483647, %v520_v6 }
 0x9df   :  { %v533_v18 = vor.u32 1.1754944e-38, %v532_v10  ;;  %vm531_vm7 = vcmp.eq.f32.partialorder %v530_v16, 8.507059e+37  ;;  %v809_v44 = vpop.f32.mrf.mxu2 }
 0x9e0   :  { %v3500_v45 = vadd.f32 %v2785_v38, %v809_v44 }
 0x9e3   :  { %v2826_v7 = vpop.eup %2825 }
 0x9e4   :  { %v522_v11 = vmul.f32 %v2826_v7, %v520_v6  ;;  %vm527_vm3 = vweird.f32 %v2826_v7 }
 0x9e5   :  { %vm528_vm6 = vmor %vm526_vm4, %vm527_vm3 }
 0x9e6   :  { %v523_v13 = vsub.f32 1.0, %v522_v11 }
 0x9e8   :  { %v524_v14 = vmul.f32 %v2826_v7, %v523_v13 }
 0x9ea   :  { %v525_v15 = vadd.f32 %v2826_v7, %v524_v14 }
 0x9ec   :  { %v529_v17 = vsel %vm528_vm6, %v2826_v7, %v525_v15 }
 0x9ed   :  { %v534_v20 = vsel %vm531_vm7, %v533_v18, %v529_v17 }
 0x9ee   :  { %v540_v23 = vmul.f32 %v538_v22, %v534_v20 }
 0xa4b   :  { %v543_v19 = vpop.permute.xlu1 %542 }
 0xa4c   :  { %v545_v21 = vmul.f32 %v543_v19, %v534_v20 }
 0xa4e   :  { %547 = vrot.lane.b32.xlu2 %v545_v21, %s3258_s3 }
 0xaa8   :  { %v548_v24 = vpop.permute.xlu2 %547 }
 0xaa9   :  { %v3451_v25 = vadd.f32 %v548_v24, %v540_v23 }
 0xaab   :  { %2827 = vtanh.f32 %v3451_v25  ;;  %v609_v22 = vrot.slane %v3451_v25, 6 }
 0xab1   :  { %v2828_v26 = vpop.eup %2827 }
 0xab2   :  { %553 = vrot.lane.b32.xlu0 %v2828_v26, %s3257_s25 }
 0xb24   :  { %v554_v32 = vpop.permute.xlu0 %553 }
 0xb25   :  { %v556_v33 = vmul.f32 %v554_v32, %v534_v20 }
 0xb27   :  { %558 = vrot.lane.b32.xlu1 %v556_v33, %s3258_s3 }
 0xb99   :  { %v559_v37 = vpop.permute.xlu1 %558 }
 0xb9a   :  { %561 = vst.msk [vmem:[#allocation2 + $0x8] sm:$0x3] %vm267_vm5, %v559_v37  ;;  %2713 = vmatmul.msk.f32.vlgmr.msrb.gmra.mxu3 %vm168_vm0, %v559_v37 }
 0xb9b   :  { %1047 = vmatpush.msrb.mxu3 %v3459_v34 }
 0xb9d   :  { %1048 = vmatpush.msrb.mxu3 %v3461_v35 }
 0xb9f   :  { %1049 = vmatpush.msrb.mxu3 %v3465_v36 }
 0xba1   :  { %1050 = vmatpush.msrb.mxu3 %v3471_v8 }
 0xba2   :  { %832 = vmatmul.f32.vlgmr.msra.gmra.mxu3 %v3256_v9 }
 0xba3   :  { %1337 = vmatpush.msra.mxu3 %v3459_v34 }
 0xba5   :  { %1338 = vmatpush.msra.mxu3 %v3461_v35 }
 0xba7   :  { %1339 = vmatpush.msra.mxu3 %v3465_v36 }
 0xba9   :  { %1340 = vmatpush.msra.mxu3 %v3471_v8 }
 0xc1d   :  { %v581_v41 = vpop.f32.mrf.mxu3 }
 0xc1e   :  { %v585_v42 = vrot.slane %v581_v41, 6 }
 0xc20   :  { %v587_v43 = vadd.f32 %v585_v42, %v3446_v0 }
 0xc22   :  { %2829 = vtanh.f32 %v587_v43  ;;  %v2714_v50 = vmul.f32 -1.442695, %v587_v43 }
 0xc25   :  { %v833_v46 = vpop.f32.mrf.mxu3 }
 0xc26   :  { %v837_v47 = vrot.slane %v833_v46, 2 }
 0xc28   :  { %v2830_v12 = vpop.eup %2829  ;;  %v839_v48 = vadd.f32 %v837_v47, %v3500_v45 }
 0xc29   :  { %613 = vrot.lane.b32.xlu2 %v2830_v12, %s3257_s25 }
 0xc2a   :  { %2831 = vtanh.f32 %v839_v48  ;;  %v2721_v56 = vmul.f32 -1.442695, %v839_v48 }
 0xc2b   :  { %2833 = vpow2.f32 %v2714_v50 }
 0xc30   :  { %v2832_v49 = vpop.eup %2831 }
 0xc31   :  { %862 = vrot.lane.b32.xlu0 %v2832_v49, %s3257_s25  ;;  %v2834_v51 = vpop.eup %2833 }
 0xc32   :  { %v591_v52 = vadd.f32 1.0, %v2834_v51 }
 0xc34   :  { %2835 = vrcp.f32 %v591_v52  ;;  %v603_v60 = vand.u32 2147483648, %v591_v52  ;;  %vm597_vm9 = vweird.f32 %v591_v52  ;;  %v601_v61 = vand.u32 2147483647, %v591_v52 }
 0xc35   :  { %2837 = vpow2.f32 %v2721_v56 }
 0xc36   :  { %v604_v2 = vor.u32 1.1754944e-38, %v603_v60  ;;  %vm602_vm11 = vcmp.eq.f32.partialorder %v601_v61, 8.507059e+37 }
 0xc3a   :  { %v2836_v53 = vpop.eup %2835 }
 0xc3b   :  { %v593_v54 = vmul.f32 %v2836_v53, %v591_v52  ;;  %vm598_vm8 = vweird.f32 %v2836_v53  ;;  %v2838_v62 = vpop.eup %2837 }
 0xc3c   :  { %vm599_vm10 = vmor %vm597_vm9, %vm598_vm8  ;;  %v843_v3 = vadd.f32 1.0, %v2838_v62 }
 0xc3d   :  { %v594_v55 = vsub.f32 1.0, %v593_v54 }
 0xc3e   :  { %2839 = vrcp.f32 %v843_v3  ;;  %v855_v10 = vand.u32 2147483648, %v843_v3  ;;  %vm849_vm13 = vweird.f32 %v843_v3  ;;  %v853_v16 = vand.u32 2147483647, %v843_v3 }
 0xc3f   :  { %v595_v57 = vmul.f32 %v2836_v53, %v594_v55 }
 0xc40   :  { %v856_v18 = vor.u32 1.1754944e-38, %v855_v10  ;;  %vm854_vm15 = vcmp.eq.f32.partialorder %v853_v16, 8.507059e+37 }
 0xc41   :  { %v596_v59 = vadd.f32 %v2836_v53, %v595_v57 }
 0xc43   :  { %v600_v1 = vsel %vm599_vm10, %v2836_v53, %v596_v59 }
 0xc44   :  { %v605_v5 = vsel %vm602_vm11, %v604_v2, %v600_v1  ;;  %v2840_v7 = vpop.eup %2839 }
 0xc45   :  { %v845_v11 = vmul.f32 %v2840_v7, %v843_v3  ;;  %vm850_vm12 = vweird.f32 %v2840_v7  ;;  %v611_v23 = vmul.f32 %v609_v22, %v605_v5 }
 0xc46   :  { %vm851_vm14 = vmor %vm849_vm13, %vm850_vm12 }
 0xc47   :  { %v846_v13 = vsub.f32 1.0, %v845_v11 }
 0xc49   :  { %v847_v14 = vmul.f32 %v2840_v7, %v846_v13 }
 0xc4b   :  { %v848_v15 = vadd.f32 %v2840_v7, %v847_v14 }
 0xc4d   :  { %v852_v17 = vsel %vm851_vm14, %v2840_v7, %v848_v15 }
 0xc4e   :  { %v857_v20 = vsel %vm854_vm15, %v856_v18, %v852_v17 }
 0xc4f   :  { %v860_v27 = vmul.f32 0.0, %v857_v20 }
 0xc83   :  { %v614_v4 = vpop.permute.xlu2 %613 }
 0xc84   :  { %v616_v6 = vmul.f32 %v614_v4, %v605_v5 }
 0xc86   :  { %618 = vrot.lane.b32.xlu1 %v616_v6, %s3258_s3 }
 0xca3   :  { %v863_v19 = vpop.permute.xlu0 %862 }
 0xca4   :  { %v865_v21 = vmul.f32 %v863_v19, %v857_v20 }
 0xca6   :  { %867 = vrot.lane.b32.xlu2 %v865_v21, %s3258_s3 }
 0xcf8   :  { %v619_v24 = vpop.permute.xlu1 %618 }
 0xcf9   :  { %v3508_v26 = vadd.f32 %v619_v24, %v611_v23 }
 0xcfb   :  { %2841 = vtanh.f32 %v3508_v26  ;;  %v683_v24 = vrot.slane %v3508_v26, 6 }
 0xd00   :  { %v868_v28 = vpop.permute.xlu2 %867 }
 0xd01   :  { %v2842_v29 = vpop.eup %2841  ;;  %v3511_v30 = vadd.f32 %v868_v28, %v860_v27 }
 0xd02   :  { %624 = vrot.lane.b32.xlu0 %v2842_v29, %s3257_s25 }
 0xd03   :  { %2843 = vtanh.f32 %v3511_v30 }
 0xd09   :  { %v2844_v32 = vpop.eup %2843 }
 0xd0a   :  { %873 = vrot.lane.b32.xlu1 %v2844_v32, %s3257_s25  ;;  %v932_v32 = vrot.slane %v3511_v30, 2 }
 0xd74   :  { %v625_v33 = vpop.permute.xlu0 %624 }
 0xd75   :  { %v3516_v25 = vmul.f32 %v625_v33, %v605_v5 }
 0xd77   :  { %v633_v37 = vrot.slane %v3516_v25, 2 }
 0xd79   :  { %634 = vrot.lane.b32.xlu2 %v633_v37, %s3258_s3 }
 0xd7c   :  { %v874_v38 = vpop.permute.xlu1 %873 }
 0xd7d   :  { %v3520_v39 = vmul.f32 %v874_v38, %v857_v20 }
 0xd7f   :  { %v882_v41 = vrot.slane %v3520_v39, 6 }
 0xd81   :  { %883 = vrot.lane.b32.xlu0 %v882_v41, %s3258_s3 }
 0xdd3   :  { %v635_v42 = vpop.permute.xlu2 %634 }
 0xdd4   :  { %2715 = vmatmul.msk.f32.vlgmr.msrb.gmra.mxu0 %vm168_vm0, %v635_v42 }
 0xdd5   :  { %1115 = vmatpush.msrb.mxu0 %v3459_v34 }
 0xdd7   :  { %1116 = vmatpush.msrb.mxu0 %v3461_v35 }
 0xdd9   :  { %1117 = vmatpush.msrb.mxu0 %v3465_v36 }
 0xddb   :  { %1118 = vmatpush.msrb.mxu0 %v3471_v8 }
 0xdf3   :  { %v884_v43 = vpop.permute.xlu0 %883 }
 0xdf4   :  { %2722 = vmatmul.msk.f32.vlgmr.msra.gmra.mxu0 %vm168_vm0, %v884_v43 }
 0xe51   :  { %v655_v44 = vpop.f32.mrf.mxu0 }
 0xe52   :  { %v659_v46 = vrot.slane %v655_v44, 4 }
 0xe54   :  { %v661_v47 = vadd.f32 %v659_v46, %v3446_v0 }
 0xe56   :  { %2845 = vtanh.f32 %v661_v47  ;;  %v2716_v52 = vmul.f32 -1.442695, %v661_v47 }
 0xe5c   :  { %v2846_v12 = vpop.eup %2845 }
 0xe5d   :  { %687 = vrot.lane.b32.xlu1 %v2846_v12, %s3257_s25 }
 0xe71   :  { %v904_v48 = vpop.f32.mrf.mxu0 }
 0xe72   :  { %v908_v49 = vrot.slane %v904_v48, 4 }
 0xe74   :  { %v910_v50 = vadd.f32 %v908_v49, %v3500_v45 }
 0xe76   :  { %2847 = vtanh.f32 %v910_v50  ;;  %v2723_v53 = vmul.f32 -1.442695, %v910_v50 }
 0xe77   :  { %2849 = vpow2.f32 %v2716_v52 }
 0xe78   :  { %2851 = vpow2.f32 %v2723_v53 }
 0xe7c   :  { %v2848_v51 = vpop.eup %2847 }
 0xe7d   :  { %936 = vrot.lane.b32.xlu2 %v2848_v51, %s3257_s25  ;;  %v2850_v54 = vpop.eup %2849 }
 0xe7e   :  { %v665_v55 = vadd.f32 1.0, %v2850_v54  ;;  %v2852_v56 = vpop.eup %2851 }
 0xe7f   :  { %v914_v57 = vadd.f32 1.0, %v2852_v56 }
 0xe80   :  { %2853 = vrcp.f32 %v665_v55  ;;  %v677_v5 = vand.u32 2147483648, %v665_v55  ;;  %vm671_vm2 = vweird.f32 %v665_v55  ;;  %v675_v6 = vand.u32 2147483647, %v665_v55 }
 0xe81   :  { %2855 = vrcp.f32 %v914_v57  ;;  %v926_v17 = vand.u32 2147483648, %v914_v57  ;;  %vm920_vm7 = vweird.f32 %v914_v57  ;;  %v924_v18 = vand.u32 2147483647, %v914_v57 }
 0xe82   :  { %v678_v13 = vor.u32 1.1754944e-38, %v677_v5  ;;  %vm676_vm4 = vcmp.eq.f32.partialorder %v675_v6, 8.507059e+37 }
 0xe83   :  { %v927_v20 = vor.u32 1.1754944e-38, %v926_v17  ;;  %vm925_vm9 = vcmp.eq.f32.partialorder %v924_v18, 8.507059e+37 }
 0xe86   :  { %v2854_v59 = vpop.eup %2853 }
 0xe87   :  { %v667_v60 = vmul.f32 %v2854_v59, %v665_v55  ;;  %v2856_v62 = vpop.eup %2855  ;;  %vm672_vm1 = vweird.f32 %v2854_v59 }
 0xe88   :  { %v916_v2 = vmul.f32 %v2856_v62, %v914_v57  ;;  %vm673_vm3 = vmor %vm671_vm2, %vm672_vm1  ;;  %vm921_vm6 = vweird.f32 %v2856_v62 }
 0xe89   :  { %v668_v61 = vsub.f32 1.0, %v667_v60  ;;  %vm922_vm8 = vmor %vm920_vm7, %vm921_vm6 }
 0xe8a   :  { %v917_v4 = vsub.f32 1.0, %v916_v2 }
 0xe8b   :  { %v669_v1 = vmul.f32 %v2854_v59, %v668_v61 }
 0xe8c   :  { %v918_v11 = vmul.f32 %v2856_v62, %v917_v4 }
 0xe8d   :  { %v670_v3 = vadd.f32 %v2854_v59, %v669_v1 }
 0xe8e   :  { %v919_v16 = vadd.f32 %v2856_v62, %v918_v11 }
 0xe8f   :  { %v674_v7 = vsel %vm673_vm3, %v2854_v59, %v670_v3 }
 0xe90   :  { %v679_v15 = vsel %vm676_vm4, %v678_v13, %v674_v7  ;;  %v923_v19 = vsel %vm922_vm8, %v2856_v62, %v919_v16 }
 0xe91   :  { %v928_v22 = vsel %vm925_vm9, %v927_v20, %v923_v19  ;;  %v685_v27 = vmul.f32 %v683_v24, %v679_v15 }
 0xe92   :  { %v934_v33 = vmul.f32 %v932_v32, %v928_v22 }
 0xecf   :  { %v688_v14 = vpop.permute.xlu1 %687 }
 0xed0   :  { %v690_v10 = vmul.f32 %v688_v14, %v679_v15 }
 0xed2   :  { %692 = vrot.lane.b32.xlu0 %v690_v10, %s3258_s3 }
 0xed7   :  { %v937_v21 = vpop.permute.xlu2 %936 }
 0xed8   :  { %v939_v23 = vmul.f32 %v937_v21, %v928_v22 }
 0xeda   :  { %941 = vrot.lane.b32.xlu1 %v939_v23, %s3258_s3 }
 0xf44   :  { %v693_v28 = vpop.permute.xlu0 %692 }
 0xf45   :  { %v3537_v29 = vadd.f32 %v693_v28, %v685_v27 }
 0xf47   :  { %2857 = vtanh.f32 %v3537_v29 }
 0xf4c   :  { %v942_v37 = vpop.permute.xlu1 %941 }
 0xf4d   :  { %v2858_v38 = vpop.eup %2857  ;;  %v944_v41 = vadd.f32 %v942_v37, %v934_v33 }
 0xf4e   :  { %698 = vrot.lane.b32.xlu2 %v2858_v38, %s3257_s25 }
 0xf4f   :  { %2859 = vtanh.f32 %v944_v41  ;;  %v1006_v4 = vrot.slane %v944_v41, 2 }
 0xf55   :  { %v2860_v42 = vpop.eup %2859 }
 0xf56   :  { %947 = vrot.lane.b32.xlu0 %v2860_v42, %s3257_s25 }
 0xfa8   :  { %v699_v43 = vpop.permute.xlu2 %698 }
 0xfa9   :  { %v3543_v26 = vmul.f32 %v699_v43, %v679_v15 }
 0xfab   :  { %v707_v44 = vrot.slane %v3543_v26, 4 }
 0xfad   :  { %708 = vrot.lane.b32.xlu1 %v707_v44, %s3258_s3 }
 0xfc8   :  { %v948_v46 = vpop.permute.xlu0 %947 }
 0xfc9   :  { %v3547_v47 = vmul.f32 %v948_v46, %v928_v22 }
 0xfcb   :  { %v956_v30 = vrot.slane %v3547_v47, 4 }
 0xfcd   :  { %957 = vrot.lane.b32.xlu2 %v956_v30, %s3258_s3 }
0x101f   :  { %v709_v12 = vpop.permute.xlu1 %708 }
0x1020   :  { %2717 = vmatmul.msk.f32.vlgmr.msrb.gmra.mxu1 %vm168_vm0, %v709_v12 }
0x1021   :  { %1189 = vmatpush.msrb.mxu1 %v3459_v34 }
0x1023   :  { %1190 = vmatpush.msrb.mxu1 %v3461_v35 }
0x1025   :  { %1191 = vmatpush.msrb.mxu1 %v3465_v36 }
0x1027   :  { %v958_v48 = vpop.permute.xlu2 %957  ;;  %1192 = vmatpush.msrb.mxu1 %v3471_v8 }
0x1028   :  { %2724 = vmatmul.msk.f32.vlgmr.msra.gmra.mxu1 %vm168_vm0, %v958_v48 }
0x109d   :  { %v3557_v49 = vpop.f32.mrf.mxu1 }
0x10a5   :  { %v978_v50 = vpop.f32.mrf.mxu1 }
0x10a6   :  { %v982_v51 = vrot.slane %v978_v50, 6 }
0x10a8   :  { %v984_v52 = vadd.f32 %v982_v51, %v3500_v45 }
0x10aa   :  { %2861 = vtanh.f32 %v984_v52  ;;  %v2725_v34 = vmul.f32 -1.442695, %v984_v52 }
0x10ac   :  { %2863 = vpow2.f32 %v2725_v34 }
0x10b0   :  { %v2862_v53 = vpop.eup %2861 }
0x10b1   :  { %1010 = vrot.lane.b32.xlu0 %v2862_v53, %s3257_s25 }
0x10b2   :  { %v2864_v35 = vpop.eup %2863 }
0x10b3   :  { %v988_v54 = vadd.f32 1.0, %v2864_v35 }
0x10b5   :  { %2865 = vrcp.f32 %v988_v54  ;;  %v1000_v59 = vand.u32 2147483648, %v988_v54  ;;  %vm994_vm11 = vweird.f32 %v988_v54  ;;  %v998_v60 = vand.u32 2147483647, %v988_v54 }
0x10b7   :  { %v1001_v62 = vor.u32 1.1754944e-38, %v1000_v59  ;;  %vm999_vm13 = vcmp.eq.f32.partialorder %v998_v60, 8.507059e+37 }
0x10bb   :  { %v2866_v36 = vpop.eup %2865 }
0x10bc   :  { %v990_v55 = vmul.f32 %v2866_v36, %v988_v54  ;;  %vm995_vm10 = vweird.f32 %v2866_v36 }
0x10bd   :  { %vm996_vm12 = vmor %vm994_vm11, %vm995_vm10 }
0x10be   :  { %v991_v8 = vsub.f32 1.0, %v990_v55 }
0x10c0   :  { %v992_v56 = vmul.f32 %v2866_v36, %v991_v8 }
0x10c2   :  { %v993_v57 = vadd.f32 %v2866_v36, %v992_v56 }
0x10c4   :  { %v997_v61 = vsel %vm996_vm12, %v2866_v36, %v993_v57 }
0x10c5   :  { %v1002_v2 = vsel %vm999_vm13, %v1001_v62, %v997_v61 }
0x10c6   :  { %v1008_v5 = vmul.f32 %v1006_v4, %v1002_v2 }
0x1123   :  { %v1011_v1 = vpop.permute.xlu0 %1010 }
0x1124   :  { %v1013_v3 = vmul.f32 %v1011_v1, %v1002_v2 }
0x1126   :  { %1015 = vrot.lane.b32.xlu1 %v1013_v3, %s3258_s3 }
0x1198   :  { %v1016_v6 = vpop.permute.xlu1 %1015 }
0x1199   :  { %v1018_v7 = vadd.f32 %v1016_v6, %v1008_v5 }
0x119b   :  { %2867 = vtanh.f32 %v1018_v7  ;;  %v1077_v43 = vrot.slane %v1018_v7, 2 }
0x11a1   :  { %v2868_v11 = vpop.eup %2867 }
0x11a2   :  { %1021 = vrot.lane.b32.xlu2 %v2868_v11, %s3257_s25 }
0x11fc   :  { %v1022_v13 = vpop.permute.xlu2 %1021 }
0x11fd   :  { %v3563_v14 = vmul.f32 %v1022_v13, %v1002_v2 }
0x11ff   :  { %v1030_v15 = vrot.slane %v3563_v14, 2 }
0x1201   :  { %1031 = vrot.lane.b32.xlu0 %v1030_v15, %s3258_s3 }
0x1273   :  { %v1032_v10 = vpop.permute.xlu0 %1031 }
0x1274   :  { %2726 = vmatmul.msk.f32.vlgmr.msrb.gmra.mxu3 %vm168_vm0, %v1032_v10 }
0x12f7   :  { %v1052_v16 = vpop.f32.mrf.mxu3 }
0x12f8   :  { %v1055_v17 = vadd.f32 %v1052_v16, %v3500_v45 }
0x12fa   :  { %2869 = vtanh.f32 %v1055_v17  ;;  %v2727_v19 = vmul.f32 -1.442695, %v1055_v17 }
0x12fc   :  { %2871 = vpow2.f32 %v2727_v19 }
0x1300   :  { %v2870_v18 = vpop.eup %2869 }
0x1301   :  { %1081 = vrot.lane.b32.xlu1 %v2870_v18, %s3257_s25 }
0x1302   :  { %v2872_v20 = vpop.eup %2871 }
0x1303   :  { %v1059_v21 = vadd.f32 1.0, %v2872_v20 }
0x1305   :  { %2873 = vrcp.f32 %v1059_v21  ;;  %v1071_v32 = vand.u32 2147483648, %v1059_v21  ;;  %vm1065_vm15 = vweird.f32 %v1059_v21  ;;  %v1069_v33 = vand.u32 2147483647, %v1059_v21 }
0x1307   :  { %v1072_v37 = vor.u32 1.1754944e-38, %v1071_v32  ;;  %vm1070_vm2 = vcmp.eq.f32.partialorder %v1069_v33, 8.507059e+37 }
0x130b   :  { %v2874_v22 = vpop.eup %2873 }
0x130c   :  { %v1061_v23 = vmul.f32 %v2874_v22, %v1059_v21  ;;  %vm1066_vm14 = vweird.f32 %v2874_v22 }
0x130d   :  { %vm1067_vm1 = vmor %vm1065_vm15, %vm1066_vm14 }
0x130e   :  { %v1062_v24 = vsub.f32 1.0, %v1061_v23 }
0x1310   :  { %v1063_v27 = vmul.f32 %v2874_v22, %v1062_v24 }
0x1312   :  { %v1064_v28 = vadd.f32 %v2874_v22, %v1063_v27 }
0x1314   :  { %v1068_v45 = vsel %vm1067_vm1, %v2874_v22, %v1064_v28 }
0x1315   :  { %v1073_v41 = vsel %vm1070_vm2, %v1072_v37, %v1068_v45 }
0x1316   :  { %v1079_v44 = vmul.f32 %v1077_v43, %v1073_v41 }
0x1373   :  { %v1082_v38 = vpop.permute.xlu1 %1081 }
0x1374   :  { %v1084_v42 = vmul.f32 %v1082_v38, %v1073_v41 }
0x1376   :  { %1086 = vrot.lane.b32.xlu2 %v1084_v42, %s3258_s3 }
0x13d0   :  { %v1087_v46 = vpop.permute.xlu2 %1086 }
0x13d1   :  { %v1089_v30 = vadd.f32 %v1087_v46, %v1079_v44 }
0x13d3   :  { %2875 = vtanh.f32 %v1089_v30  ;;  %v1148_v6 = vrot.slane %v1089_v30, 2 }
0x13d9   :  { %v2876_v12 = vpop.eup %2875 }
0x13da   :  { %1092 = vrot.lane.b32.xlu0 %v2876_v12, %s3257_s25 }
0x144c   :  { %v1093_v48 = vpop.permute.xlu0 %1092 }
0x144d   :  { %v1095_v50 = vmul.f32 %v1093_v48, %v1073_v41 }
0x144f   :  { %1097 = vrot.lane.b32.xlu1 %v1095_v50, %s3258_s3 }
0x14c1   :  { %v1098_v51 = vpop.permute.xlu1 %1097 }
0x14c2   :  { %1100 = vst.msk [vmem:[#allocation3 + $0x8] sm:$0x3] %vm267_vm5, %v1098_v51  ;;  %2728 = vmatmul.msk.f32.vlgmr.msrb.gmra.mxu0 %vm168_vm0, %v1098_v51 }
0x153f   :  { %v1120_v52 = vpop.f32.mrf.mxu0 }
0x1540   :  { %v1124_v53 = vrot.slane %v1120_v52, 2 }
0x1542   :  { %v1126_v34 = vadd.f32 %v1124_v53, %v3497_v40 }
0x1544   :  { %2877 = vtanh.f32 %v1126_v34  ;;  %v2729_v54 = vmul.f32 -1.442695, %v1126_v34 }
0x1546   :  { %2879 = vpow2.f32 %v2729_v54 }
0x154a   :  { %v2878_v35 = vpop.eup %2877 }
0x154b   :  { %1152 = vrot.lane.b32.xlu2 %v2878_v35, %s3257_s25 }
0x154c   :  { %v2880_v36 = vpop.eup %2879 }
0x154d   :  { %v1130_v55 = vadd.f32 1.0, %v2880_v36 }
0x154f   :  { %2881 = vrcp.f32 %v1130_v55  ;;  %v1142_v61 = vand.u32 2147483648, %v1130_v55  ;;  %vm1136_vm4 = vweird.f32 %v1130_v55  ;;  %v1140_v62 = vand.u32 2147483647, %v1130_v55 }
0x1551   :  { %v1143_v2 = vor.u32 1.1754944e-38, %v1142_v61  ;;  %vm1141_vm7 = vcmp.eq.f32.partialorder %v1140_v62, 8.507059e+37 }
0x1555   :  { %v2882_v8 = vpop.eup %2881 }
0x1556   :  { %v1132_v56 = vmul.f32 %v2882_v8, %v1130_v55  ;;  %vm1137_vm3 = vweird.f32 %v2882_v8 }
0x1557   :  { %vm1138_vm6 = vmor %vm1136_vm4, %vm1137_vm3 }
0x1558   :  { %v1133_v57 = vsub.f32 1.0, %v1132_v56 }
0x155a   :  { %v1134_v59 = vmul.f32 %v2882_v8, %v1133_v57 }
0x155c   :  { %v1135_v60 = vadd.f32 %v2882_v8, %v1134_v59 }
0x155e   :  { %v1139_v1 = vsel %vm1138_vm6, %v2882_v8, %v1135_v60  ;;  %vm489_vm6 = vcmask 261126  }
0x155f   :  { %v1144_v4 = vsel %vm1141_vm7, %v1143_v2, %v1139_v1  ;;  %vm414_vm7 = vcmask 259076  }
0x1560   :  { %v1150_v7 = vmul.f32 %v1148_v6, %v1144_v4 }
0x15a5   :  { %v1153_v3 = vpop.permute.xlu2 %1152 }
0x15a6   :  { %v1155_v5 = vmul.f32 %v1153_v3, %v1144_v4 }
0x15a8   :  { %1157 = vrot.lane.b32.xlu0 %v1155_v5, %s3258_s3 }
0x161a   :  { %v1158_v11 = vpop.permute.xlu0 %1157 }
0x161b   :  { %v1160_v13 = vadd.f32 %v1158_v11, %v1150_v7 }
0x161d   :  { %2883 = vtanh.f32 %v1160_v13  ;;  %v1222_v12 = vrot.slane %v1160_v13, 2 }
0x1623   :  { %v2884_v15 = vpop.eup %2883 }
0x1624   :  { %1163 = vrot.lane.b32.xlu1 %v2884_v15, %s3257_s25 }
0x1696   :  { %v1164_v10 = vpop.permute.xlu1 %1163 }
0x1697   :  { %v3579_v16 = vmul.f32 %v1164_v10, %v1144_v4 }
0x1699   :  { %v1172_v17 = vrot.slane %v3579_v16, 6 }
0x169b   :  { %1173 = vrot.lane.b32.xlu2 %v1172_v17, %s3258_s3 }
0x16f5   :  { %v1174_v18 = vpop.permute.xlu2 %1173 }
0x16f6   :  { %2730 = vmatmul.msk.f32.vlgmr.msrb.gmra.mxu1 %vm168_vm0, %v1174_v18 }
0x1773   :  { %v1194_v19 = vpop.f32.mrf.mxu1 }
0x1774   :  { %v1198_v20 = vrot.slane %v1194_v19, 4 }
0x1776   :  { %v1200_v21 = vadd.f32 %v1198_v20, %v3497_v40 }
0x1778   :  { %2885 = vtanh.f32 %v1200_v21  ;;  %v2731_v23 = vmul.f32 -1.442695, %v1200_v21 }
0x177a   :  { %2887 = vpow2.f32 %v2731_v23 }
0x177e   :  { %v2886_v22 = vpop.eup %2885 }
0x177f   :  { %1226 = vrot.lane.b32.xlu0 %v2886_v22, %s3257_s25 }
0x1780   :  { %v2888_v24 = vpop.eup %2887 }
0x1781   :  { %v1204_v27 = vadd.f32 1.0, %v2888_v24 }
0x1783   :  { %2889 = vrcp.f32 %v1204_v27  ;;  %v1216_v38 = vand.u32 2147483648, %v1204_v27  ;;  %vm1210_vm9 = vweird.f32 %v1204_v27  ;;  %v1214_v41 = vand.u32 2147483647, %v1204_v27 }
0x1785   :  { %v1217_v43 = vor.u32 1.1754944e-38, %v1216_v38  ;;  %vm1215_vm11 = vcmp.eq.f32.partialorder %v1214_v41, 8.507059e+37 }
0x1789   :  { %v2890_v28 = vpop.eup %2889 }
0x178a   :  { %v1206_v32 = vmul.f32 %v2890_v28, %v1204_v27  ;;  %vm1211_vm8 = vweird.f32 %v2890_v28 }
0x178b   :  { %vm1212_vm10 = vmor %vm1210_vm9, %vm1211_vm8  ;;  %vm339_vm8 = vcmask 257026   ;;  %vm1417_vm9 = vcmask 523264  }
0x178c   :  { %v1207_v33 = vsub.f32 1.0, %v1206_v32 }
0x178e   :  { %v1208_v45 = vmul.f32 %v2890_v28, %v1207_v33 }
0x1790   :  { %v1209_v37 = vadd.f32 %v2890_v28, %v1208_v45 }
0x1792   :  { %v1213_v42 = vsel %vm1212_vm10, %v2890_v28, %v1209_v37 }
0x1793   :  { %v1218_v46 = vsel %vm1215_vm11, %v1217_v43, %v1213_v42 }
0x1794   :  { %v1224_v48 = vmul.f32 %v1222_v12, %v1218_v46 }
0x17f1   :  { %v1227_v44 = vpop.permute.xlu0 %1226 }
0x17f2   :  { %v1229_v30 = vmul.f32 %v1227_v44, %v1218_v46 }
0x17f4   :  { %1231 = vrot.lane.b32.xlu1 %v1229_v30, %s3258_s3 }
0x1866   :  { %v1232_v50 = vpop.permute.xlu1 %1231 }
0x1867   :  { %v1234_v51 = vadd.f32 %v1232_v50, %v1224_v48 }
0x1869   :  { %2891 = vtanh.f32 %v1234_v51  ;;  %v1296_v10 = vrot.slane %v1234_v51, 2 }
0x186f   :  { %v2892_v52 = vpop.eup %2891 }
0x1870   :  { %1237 = vrot.lane.b32.xlu2 %v2892_v52, %s3257_s25 }
0x18ca   :  { %v1238_v53 = vpop.permute.xlu2 %1237 }
0x18cb   :  { %v3588_v34 = vmul.f32 %v1238_v53, %v1218_v46 }
0x18cd   :  { %v1246_v35 = vrot.slane %v3588_v34, 4 }
0x18cf   :  { %1247 = vrot.lane.b32.xlu0 %v1246_v35, %s3258_s3 }
0x1941   :  { %v1248_v54 = vpop.permute.xlu0 %1247 }
0x1942   :  { %2732 = vmatmul.msk.f32.vlgmr.msra.gmra.mxu2 %vm168_vm0, %v1248_v54 }
0x19c5   :  { %v1268_v36 = vpop.f32.mrf.mxu2 }
0x19c6   :  { %v1272_v55 = vrot.slane %v1268_v36, 6 }
0x19c8   :  { %v1274_v8 = vadd.f32 %v1272_v55, %v3497_v40 }
0x19ca   :  { %2893 = vtanh.f32 %v1274_v8  ;;  %v2733_v57 = vmul.f32 -1.442695, %v1274_v8 }
0x19cc   :  { %2895 = vpow2.f32 %v2733_v57 }
0x19d0   :  { %v2894_v56 = vpop.eup %2893 }
0x19d1   :  { %1300 = vrot.lane.b32.xlu1 %v2894_v56, %s3257_s25 }
0x19d2   :  { %v2896_v59 = vpop.eup %2895 }
0x19d3   :  { %v1278_v60 = vadd.f32 1.0, %v2896_v59  ;;  %v1412_v59 = vld [vmem:[%s4010_s7 + $0x38] sm:$0xff] }
0x19d4   :  { %1432 = vmatpush.msra.mxu0 %v1412_v59 }
0x19d5   :  { %2897 = vrcp.f32 %v1278_v60  ;;  %v1290_v4 = vand.u32 2147483648, %v1278_v60  ;;  %vm1284_vm13 = vweird.f32 %v1278_v60  ;;  %v1288_v5 = vand.u32 2147483647, %v1278_v60 }
0x19d7   :  { %v1291_v7 = vor.u32 1.1754944e-38, %v1290_v4  ;;  %vm1289_vm15 = vcmp.eq.f32.partialorder %v1288_v5, 8.507059e+37  ;;  %v1406_v4 = vld [vmem:[%s4010_s7 + $0x8] sm:$0xff] }
0x19db   :  { %v2898_v61 = vpop.eup %2897 }
0x19dc   :  { %v1280_v62 = vmul.f32 %v2898_v61, %v1278_v60  ;;  %vm1285_vm12 = vweird.f32 %v2898_v61  ;;  %v3626_v60 = vld [vmem:[#allocation12 + $0x18] sm:$0xff] }
0x19dd   :  { %vm1286_vm14 = vmor %vm1284_vm13, %vm1285_vm12  ;;  %1463 = vmatpush.msra.mxu1 %v3626_v60  ;;  %1528 = vmatpush.msrb.mxu2 %v3626_v60 }
0x19de   :  { %v1281_v1 = vsub.f32 1.0, %v1280_v62  ;;  %v3635_v62 = vld [vmem:[#allocation12 + $0x8] sm:$0xff]  ;;  %1602 = vmatpush.msrb.mxu3 %v3626_v60 }
0x19e0   :  { %v1282_v2 = vmul.f32 %v2898_v61, %v1281_v1  ;;  %v1409_v1 = vld [vmem:[%s4010_s7 + $0x20] sm:$0xff] }
0x19e2   :  { %v1283_v3 = vadd.f32 %v2898_v61, %v1282_v2  ;;  %v1408_v2 = vld [vmem:[%s4010_s7 + $0x18] sm:$0xff] }
0x19e4   :  { %v1287_v6 = vsel %vm1286_vm14, %v2898_v61, %v1283_v3  ;;  %v1410_v61 = vld [vmem:[%s4010_s7 + $0x28] sm:$0xff]  ;;  %v1407_v3 = vld [vmem:[%s4010_s7 + $0x10] sm:$0xff] }
0x19e5   :  { %v1292_v13 = vsel %vm1289_vm15, %v1291_v7, %v1287_v6 }
0x19e6   :  { %v1298_v17 = vmul.f32 %v1296_v10, %v1292_v13 }
0x1a43   :  { %v1301_v11 = vpop.permute.xlu1 %1300 }
0x1a44   :  { %v1303_v15 = vmul.f32 %v1301_v11, %v1292_v13  ;;  %v1405_v11 = vld [vmem:[%s4010_s7] sm:$0xff] }
0x1a46   :  { %1305 = vrot.lane.b32.xlu2 %v1303_v15, %s3258_s3 }
0x1aa0   :  { %v1306_v18 = vpop.permute.xlu2 %1305 }
0x1aa1   :  { %v1308_v19 = vadd.f32 %v1306_v18, %v1298_v17  ;;  %v3692_v18 = vld [vmem:[%s4012_s9] ss:$0 sm:$0xff] }
0x1aa3   :  { %2899 = vtanh.f32 %v1308_v19  ;;  %v1367_v52 = vrot.slane %v1308_v19, 2 }
0x1aa9   :  { %v2900_v20 = vpop.eup %2899 }
0x1aaa   :  { %1311 = vrot.lane.b32.xlu0 %v2900_v20, %s3257_s25 }
0x1b1c   :  { %v1312_v21 = vpop.permute.xlu0 %1311 }
0x1b1d   :  { %v1314_v22 = vmul.f32 %v1312_v21, %v1292_v13  ;;  %v3662_v13 = vld [vmem:[#allocation12] sm:$0xff] }
0x1b1f   :  { %v1320_v23 = vrot.slane %v1314_v22, 2 }
0x1b21   :  { %1321 = vrot.lane.b32.xlu1 %v1320_v23, %s3258_s3 }
0x1b93   :  { %v1322_v24 = vpop.permute.xlu1 %1321 }
0x1b94   :  { %2734 = vmatmul.msk.f32.vlgmr.msra.gmra.mxu3 %vm168_vm0, %v1322_v24 }
0x1c17   :  { %v1342_v27 = vpop.f32.mrf.mxu3 }
0x1c18   :  { %v1345_v28 = vadd.f32 %v1342_v27, %v3497_v40 }
0x1c1a   :  { %2901 = vtanh.f32 %v1345_v28  ;;  %v2735_v33 = vmul.f32 -1.442695, %v1345_v28 }
0x1c1c   :  { %2903 = vpow2.f32 %v2735_v33 }
0x1c20   :  { %v2902_v32 = vpop.eup %2901 }
0x1c21   :  { %1371 = vrot.lane.b32.xlu2 %v2902_v32, %s3257_s25 }
0x1c22   :  { %v2904_v45 = vpop.eup %2903 }
0x1c23   :  { %v1349_v37 = vadd.f32 1.0, %v2904_v45 }
0x1c25   :  { %2905 = vrcp.f32 %v1349_v37  ;;  %v1361_v46 = vand.u32 2147483648, %v1349_v37  ;;  %vm1355_vm2 = vweird.f32 %v1349_v37  ;;  %v1359_v40 = vand.u32 2147483647, %v1349_v37 }
0x1c27   :  { %v1362_v12 = vor.u32 1.1754944e-38, %v1361_v46  ;;  %vm1360_vm4 = vcmp.eq.f32.partialorder %v1359_v40, 8.507059e+37 }
0x1c29   :  { %1168 = vrot.lane.b32.xlu2 %v3579_v16, %s3258_s3 }
0x1c2b   :  { %v2906_v38 = vpop.eup %2905 }
0x1c2c   :  { %v1351_v41 = vmul.f32 %v2906_v38, %v1349_v37  ;;  %vm1356_vm1 = vweird.f32 %v2906_v38 }
0x1c2d   :  { %vm1357_vm3 = vmor %vm1355_vm2, %vm1356_vm1 }
0x1c2e   :  { %v1352_v42 = vsub.f32 1.0, %v1351_v41 }
0x1c30   :  { %v1353_v43 = vmul.f32 %v2906_v38, %v1352_v42 }
0x1c32   :  { %v1354_v44 = vadd.f32 %v2906_v38, %v1353_v43 }
0x1c34   :  { %v1358_v30 = vsel %vm1357_vm3, %v2906_v38, %v1354_v44 }
0x1c35   :  { %v1363_v16 = vsel %vm1360_vm4, %v1362_v12, %v1358_v30 }
0x1c36   :  { %v1369_v53 = vmul.f32 %v1367_v52, %v1363_v16 }
0x1c7b   :  { %v1372_v48 = vpop.permute.xlu2 %1371 }
0x1c7c   :  { %v1374_v50 = vmul.f32 %v1372_v48, %v1363_v16 }
0x1c7e   :  { %1376 = vrot.lane.b32.xlu0 %v1374_v50, %s3258_s3 }
0x1c83   :  { %v1169_v51 = vpop.permute.xlu2 %1168 }
0x1c84   :  { %1171 = vst.msk [vmem:[#allocation3] sm:$0xc0] %vm489_vm6, %v1169_v51 }
0x1c86   :  { %1242 = vrot.lane.b32.xlu0 %v3588_v34, %s3258_s3 }
0x1c8e   :  { %336 = vrot.lane.b32.xlu0 %v3418_v63, %s3258_s3 }
0x1cf0   :  { %v1377_v35 = vpop.permute.xlu0 %1376 }
0x1cf1   :  { %v1379_v54 = vadd.f32 %v1377_v35, %v1369_v53 }
0x1cf3   :  { %2907 = vtanh.f32 %v1379_v54 }
0x1cf8   :  { %v1243_v36 = vpop.permute.xlu0 %1242 }
0x1cf9   :  { %v2908_v55 = vpop.eup %2907  ;;  %1245 = vst.msk [vmem:[#allocation3] sm:$0x30] %vm414_vm7, %v1243_v36 }
0x1cfa   :  { %1382 = vrot.lane.b32.xlu1 %v2908_v55, %s3257_s25 }
0x1d00   :  { %v337_v8 = vpop.permute.xlu0 %336 }
0x1d01   :  { %340 = vst.msk [vmem:[#allocation2] sm:$0xc] %vm339_vm8, %v337_v8 }
0x1d02   :  { %1316 = vrot.lane.b32.xlu1 %v1314_v22, %s3258_s3 }
0x1d0a   :  { %411 = vrot.lane.b32.xlu1 %v3427_v31, %s3258_s3  ;;  %v1411_v31 = vld [vmem:[%s4010_s7 + $0x30] sm:$0xff] }
0x1d0b   :  { %1433 = vmatpush.msra.mxu0 %v1411_v31 }
0x1d0d   :  { %1434 = vmatpush.msra.mxu0 %v1410_v61 }
0x1d0f   :  { %1435 = vmatpush.msra.mxu0 %v1409_v1 }
0x1d11   :  { %1436 = vmatpush.msra.mxu0 %v1408_v2 }
0x1d13   :  { %1437 = vmatpush.msra.mxu0 %v1407_v3 }
0x1d15   :  { %1438 = vmatpush.msra.mxu0 %v1406_v4 }
0x1d17   :  { %1439 = vmatpush.msra.mxu0 %v1405_v11 }
0x1d6c   :  { %v1383_v63 = vpop.permute.xlu1 %1382 }
0x1d6d   :  { %v1385_v34 = vmul.f32 %v1383_v63, %v1363_v16 }
0x1d6f   :  { %1387 = vrot.lane.b32.xlu2 %v1385_v34, %s3258_s3 }
0x1d74   :  { %v1317_v56 = vpop.permute.xlu1 %1316 }
0x1d75   :  { %1319 = vst.msk [vmem:[#allocation3] sm:$0xc] %vm339_vm8, %v1317_v56 }
0x1d77   :  { %486 = vrot.lane.b32.xlu2 %v3436_v58, %s3258_s3  ;;  %v3632_v58 = vld [vmem:[#allocation12 + $0x10] sm:$0xff] }
0x1d78   :  { %1464 = vmatpush.msra.mxu1 %v3632_v58  ;;  %1529 = vmatpush.msrb.mxu2 %v3632_v58 }
0x1d79   :  { %1603 = vmatpush.msrb.mxu3 %v3632_v58 }
0x1d7a   :  { %1465 = vmatpush.msra.mxu1 %v3635_v62  ;;  %1530 = vmatpush.msrb.mxu2 %v3635_v62 }
0x1d7b   :  { %1604 = vmatpush.msrb.mxu3 %v3635_v62 }
0x1d7c   :  { %v412_v57 = vpop.permute.xlu1 %411  ;;  %1466 = vmatpush.msra.mxu1 %v3662_v13  ;;  %1531 = vmatpush.msrb.mxu2 %v3662_v13 }
0x1d7d   :  { %415 = vst.msk [vmem:[#allocation2] sm:$0x30] %vm414_vm7, %v412_v57  ;;  %1467 = vmatmul.f32.vlgmr.msra.gmra.mxu1 %v3256_v9  ;;  %1605 = vmatpush.msrb.mxu3 %v3662_v13 }
0x1d7e   :  { %1676 = vmatpush.msrb.mxu1 %v3626_v60  ;;  %1750 = vmatpush.msra.mxu2 %v3626_v60 }
0x1d7f   :  { %1818 = vmatpush.msra.mxu3 %v3626_v60 }
0x1d80   :  { %1677 = vmatpush.msrb.mxu1 %v3632_v58  ;;  %1751 = vmatpush.msra.mxu2 %v3632_v58 }
0x1d81   :  { %1819 = vmatpush.msra.mxu3 %v3632_v58 }
0x1d82   :  { %1678 = vmatpush.msrb.mxu1 %v3635_v62  ;;  %1752 = vmatpush.msra.mxu2 %v3635_v62 }
0x1d83   :  { %1820 = vmatpush.msra.mxu3 %v3635_v62 }
0x1d84   :  { %1679 = vmatpush.msrb.mxu1 %v3662_v13  ;;  %1753 = vmatpush.msra.mxu2 %v3662_v13 }
0x1d85   :  { %1821 = vmatpush.msra.mxu3 %v3662_v13 }
0x1d86   :  { %1892 = vmatpush.msra.mxu1 %v3626_v60 }
0x1d88   :  { %1893 = vmatpush.msra.mxu1 %v3632_v58 }
0x1d8a   :  { %1894 = vmatpush.msra.mxu1 %v3635_v62 }
0x1d8c   :  { %1895 = vmatpush.msra.mxu1 %v3662_v13 }
0x1dc9   :  { %v1388_v5 = vpop.permute.xlu2 %1387 }
0x1dca   :  { %1390 = vst.msk [vmem:[#allocation3] sm:$0x3] %vm267_vm5, %v1388_v5 }
0x1dd1   :  { %v487_v6 = vpop.permute.xlu2 %486  ;;  %v1393_v7 = vld [vmem:[#allocation3] sm:$0xff] }
0x1dd2   :  { %490 = vst.msk [vmem:[#allocation2] sm:$0xc0] %vm489_vm6, %v487_v6  ;;  %1397 = vrot.lane.b32.xlu0 %v1393_v7, %s3258_s3 }
0x1dd9   :  { %v1391_v10 = vld [vmem:[#allocation2] sm:$0xff] }
0x1dfa   :  { %v1468_v20 = vpop.f32.mrf.mxu1 }
0x1e44   :  { %v1398_v15 = vpop.permute.xlu0 %1397 }
0x1e45   :  { %v3685_v17 = vsel %vm168_vm0, %v1391_v10, %v1398_v15 }
0x1e46   :  { %2736 = vmatmul.msk.f32.vlgmr.msra.gmra.mxu0 %vm1417_vm9, %v3685_v17 }
0x1ec3   :  { %v1441_v19 = vpop.f32.mrf.mxu0 }
0x1ec4   :  { %v3695_v21 = vadd.f32 %v3692_v18, %v1441_v19 }
0x1ec6   :  { %v1471_v22 = vadd.f32 %v1468_v20, %v3695_v21 }
0x1ec8   :  { %2909 = vtanh.f32 %v1471_v22  ;;  %v2738_v24 = vmul.f32 -1.442695, %v1471_v22 }
0x1eca   :  { %2911 = vpow2.f32 %v2738_v24 }
0x1ece   :  { %v2910_v23 = vpop.eup %2909 }
0x1ecf   :  { %1494 = vrot.lane.b32.xlu1 %v2910_v23, %s3257_s25 }
0x1ed0   :  { %v2912_v27 = vpop.eup %2911 }
0x1ed1   :  { %v1475_v28 = vadd.f32 1.0, %v2912_v27 }
0x1ed3   :  { %2913 = vrcp.f32 %v1475_v28  ;;  %v1487_v41 = vand.u32 2147483648, %v1475_v28  ;;  %vm1481_vm11 = vweird.f32 %v1475_v28  ;;  %v1485_v42 = vand.u32 2147483647, %v1475_v28 }
0x1ed5   :  { %v1488_v44 = vor.u32 1.1754944e-38, %v1487_v41  ;;  %vm1486_vm13 = vcmp.eq.f32.partialorder %v1485_v42, 8.507059e+37 }
0x1ed9   :  { %v2914_v32 = vpop.eup %2913 }
0x1eda   :  { %v1477_v33 = vmul.f32 %v2914_v32, %v1475_v28  ;;  %vm1482_vm10 = vweird.f32 %v2914_v32 }
0x1edb   :  { %vm1483_vm12 = vmor %vm1481_vm11, %vm1482_vm10 }
0x1edc   :  { %v1478_v45 = vsub.f32 1.0, %v1477_v33 }
0x1ede   :  { %v1479_v37 = vmul.f32 %v2914_v32, %v1478_v45 }
0x1ee0   :  { %v1480_v38 = vadd.f32 %v2914_v32, %v1479_v37 }
0x1ee2   :  { %v1484_v43 = vsel %vm1483_vm12, %v2914_v32, %v1480_v38 }
0x1ee3   :  { %v1489_v40 = vsel %vm1486_vm13, %v1488_v44, %v1484_v43 }
0x1ee4   :  { %v1492_v12 = vmul.f32 0.0, %v1489_v40 }
0x1f41   :  { %v1495_v46 = vpop.permute.xlu1 %1494 }
0x1f42   :  { %v1497_v30 = vmul.f32 %v1495_v46, %v1489_v40  ;;  %v733_v46 = vrot.slane %v3557_v49, 2 }
0x1f44   :  { %1499 = vrot.lane.b32.xlu2 %v1497_v30, %s3258_s3 }
0x1f9e   :  { %v1500_v48 = vpop.permute.xlu2 %1499 }
0x1f9f   :  { %v1502_v16 = vadd.f32 %v1500_v48, %v1492_v12  ;;  %v735_v12 = vadd.f32 %v733_v46, %v3446_v0 }
0x1fa1   :  { %2915 = vtanh.f32 %v1502_v16  ;;  %v1561_v5 = vrot.slane %v1502_v16, 6  ;;  %v2718_v0 = vmul.f32 -1.442695, %v735_v12 }
0x1fa7   :  { %v2916_v50 = vpop.eup %2915 }
0x1fa8   :  { %1505 = vrot.lane.b32.xlu0 %v2916_v50, %s3257_s25 }
0x201a   :  { %v1506_v51 = vpop.permute.xlu0 %1505 }
0x201b   :  { %v1508_v52 = vmul.f32 %v1506_v51, %v1489_v40 }
0x201d   :  { %1510 = vrot.lane.b32.xlu1 %v1508_v52, %s3258_s3 }
0x208f   :  { %v1511_v53 = vpop.permute.xlu1 %1510 }
0x2090   :  { %2739 = vmatmul.msk.f32.vlgmr.msrb.gmra.mxu2 %vm168_vm0, %v1511_v53 }
0x2091   :  { %1966 = vmatpush.msrb.mxu2 %v3626_v60 }
0x2093   :  { %1967 = vmatpush.msrb.mxu2 %v3632_v58 }
0x2095   :  { %1968 = vmatpush.msrb.mxu2 %v3635_v62 }
0x2097   :  { %1969 = vmatpush.msrb.mxu2 %v3662_v13 }
0x2113   :  { %v1533_v35 = vpop.f32.mrf.mxu2 }
0x2114   :  { %v1537_v54 = vrot.slane %v1533_v35, 6 }
0x2116   :  { %v1539_v36 = vadd.f32 %v1537_v54, %v3695_v21 }
0x2118   :  { %2917 = vtanh.f32 %v1539_v36  ;;  %v2740_v8 = vmul.f32 -1.442695, %v1539_v36 }
0x211a   :  { %2919 = vpow2.f32 %v2740_v8 }
0x211e   :  { %v2918_v55 = vpop.eup %2917 }
0x211f   :  { %1565 = vrot.lane.b32.xlu2 %v2918_v55, %s3257_s25 }
0x2120   :  { %v2920_v63 = vpop.eup %2919 }
0x2121   :  { %v1543_v34 = vadd.f32 1.0, %v2920_v63 }
0x2123   :  { %2921 = vrcp.f32 %v1543_v34  ;;  %v1555_v61 = vand.u32 2147483648, %v1543_v34  ;;  %vm1549_vm15 = vweird.f32 %v1543_v34  ;;  %v1553_v58 = vand.u32 2147483647, %v1543_v34 }
0x2125   :  { %v1556_v1 = vor.u32 1.1754944e-38, %v1555_v61  ;;  %vm1554_vm2 = vcmp.eq.f32.partialorder %v1553_v58, 8.507059e+37 }
0x2129   :  { %v2922_v56 = vpop.eup %2921 }
0x212a   :  { %v1545_v57 = vmul.f32 %v2922_v56, %v1543_v34  ;;  %vm1550_vm14 = vweird.f32 %v2922_v56 }
0x212b   :  { %vm1551_vm1 = vmor %vm1549_vm15, %vm1550_vm14 }
0x212c   :  { %v1546_v59 = vsub.f32 1.0, %v1545_v57 }
0x212e   :  { %v1547_v31 = vmul.f32 %v2922_v56, %v1546_v59 }
0x2130   :  { %v1548_v60 = vadd.f32 %v2922_v56, %v1547_v31 }
0x2132   :  { %v1552_v62 = vsel %vm1551_vm1, %v2922_v56, %v1548_v60 }
0x2133   :  { %v1557_v3 = vsel %vm1554_vm2, %v1556_v1, %v1552_v62 }
0x2134   :  { %v1563_v6 = vmul.f32 %v1561_v5, %v1557_v3 }
0x2179   :  { %v1566_v2 = vpop.permute.xlu2 %1565 }
0x217a   :  { %v1568_v4 = vmul.f32 %v1566_v2, %v1557_v3 }
0x217c   :  { %1570 = vrot.lane.b32.xlu0 %v1568_v4, %s3258_s3 }
0x21ee   :  { %v1571_v7 = vpop.permute.xlu0 %1570 }
0x21ef   :  { %v1573_v11 = vadd.f32 %v1571_v7, %v1563_v6  ;;  %v757_v6 = vrot.slane %v3537_v29, 6 }
0x21f1   :  { %2923 = vtanh.f32 %v1573_v11  ;;  %v1635_v52 = vrot.slane %v1573_v11, 6 }
0x21f7   :  { %v2924_v13 = vpop.eup %2923 }
0x21f8   :  { %1576 = vrot.lane.b32.xlu1 %v2924_v13, %s3257_s25 }
0x226a   :  { %v1577_v15 = vpop.permute.xlu1 %1576 }
0x226b   :  { %v3711_v10 = vmul.f32 %v1577_v15, %v1557_v3 }
0x226d   :  { %v1585_v19 = vrot.slane %v3711_v10, 2 }
0x226f   :  { %1586 = vrot.lane.b32.xlu2 %v1585_v19, %s3258_s3 }
0x22c9   :  { %v1587_v20 = vpop.permute.xlu2 %1586 }
0x22ca   :  { %2741 = vmatmul.msk.f32.vlgmr.msrb.gmra.mxu3 %vm168_vm0, %v1587_v20 }
0x234d   :  { %v1607_v22 = vpop.f32.mrf.mxu3 }
0x234e   :  { %v1611_v23 = vrot.slane %v1607_v22, 4 }
0x2350   :  { %v1613_v24 = vadd.f32 %v1611_v23, %v3695_v21 }
0x2352   :  { %2925 = vtanh.f32 %v1613_v24  ;;  %v2742_v28 = vmul.f32 -1.442695, %v1613_v24 }
0x2354   :  { %2927 = vpow2.f32 %v2742_v28 }
0x2358   :  { %v2926_v27 = vpop.eup %2925 }
0x2359   :  { %1639 = vrot.lane.b32.xlu0 %v2926_v27, %s3257_s25 }
0x235a   :  { %v2928_v32 = vpop.eup %2927 }
0x235b   :  { %v1617_v33 = vadd.f32 1.0, %v2928_v32 }
0x235d   :  { %2929 = vrcp.f32 %v1617_v33  ;;  %v1629_v43 = vand.u32 2147483648, %v1617_v33  ;;  %vm1623_vm4 = vweird.f32 %v1617_v33  ;;  %v1627_v44 = vand.u32 2147483647, %v1617_v33 }
0x235e   :  { %2931 = vtanh.f32 %v735_v12 }
0x235f   :  { %v1630_v30 = vor.u32 1.1754944e-38, %v1629_v43  ;;  %vm1628_vm11 = vcmp.eq.f32.partialorder %v1627_v44, 8.507059e+37 }
0x2363   :  { %v2930_v45 = vpop.eup %2929 }
0x2364   :  { %v1619_v37 = vmul.f32 %v2930_v45, %v1617_v33  ;;  %vm1624_vm3 = vweird.f32 %v2930_v45  ;;  %v2932_v51 = vpop.eup %2931 }
0x2365   :  { %vm1625_vm10 = vmor %vm1623_vm4, %vm1624_vm3 }
0x2366   :  { %v1620_v38 = vsub.f32 1.0, %v1619_v37 }
0x2368   :  { %v1621_v41 = vmul.f32 %v2930_v45, %v1620_v38 }
0x236a   :  { %v1622_v42 = vadd.f32 %v2930_v45, %v1621_v41 }
0x236c   :  { %v1626_v40 = vsel %vm1625_vm10, %v2930_v45, %v1622_v42 }
0x236d   :  { %v1631_v16 = vsel %vm1628_vm11, %v1630_v30, %v1626_v40 }
0x236e   :  { %v1637_v53 = vmul.f32 %v1635_v52, %v1631_v16 }
0x23cb   :  { %v1640_v48 = vpop.permute.xlu0 %1639 }
0x23cc   :  { %v1642_v50 = vmul.f32 %v1640_v48, %v1631_v16 }
0x23ce   :  { %1644 = vrot.lane.b32.xlu1 %v1642_v50, %s3258_s3 }
0x23d6   :  { %761 = vrot.lane.b32.xlu1 %v2932_v51, %s3257_s25 }
0x2440   :  { %v1645_v35 = vpop.permute.xlu1 %1644 }
0x2441   :  { %v3722_v54 = vadd.f32 %v1645_v35, %v1637_v53  ;;  %v2030_v53 = vld [vmem:[#allocation14 + $0x38] sm:$0xff]  ;;  %v2029_v35 = vld [vmem:[#allocation14 + $0x30] sm:$0xff] }
0x2442   :  { %2043 = vmatpush.msrb.mxu0 %v2030_v53 }
0x2443   :  { %2933 = vtanh.f32 %v3722_v54  ;;  %v1709_v30 = vrot.slane %v3722_v54, 6  ;;  %v2028_v54 = vld [vmem:[#allocation14 + $0x28] sm:$0xff] }
0x2444   :  { %2935 = vpow2.f32 %v2718_v0  ;;  %2044 = vmatpush.msrb.mxu0 %v2029_v35  ;;  %v2026_v0 = vld [vmem:[#allocation14 + $0x18] sm:$0xff] }
0x2446   :  { %2045 = vmatpush.msrb.mxu0 %v2028_v54 }
0x2448   :  { %v762_v2 = vpop.permute.xlu1 %761 }
0x2449   :  { %v2934_v49 = vpop.eup %2933 }
0x244a   :  { %1650 = vrot.lane.b32.xlu2 %v2934_v49, %s3257_s25  ;;  %v2936_v36 = vpop.eup %2935  ;;  %v2027_v49 = vld [vmem:[#allocation14 + $0x20] sm:$0xff] }
0x244b   :  { %v739_v55 = vadd.f32 1.0, %v2936_v36  ;;  %2046 = vmatpush.msrb.mxu0 %v2027_v49  ;;  %v2025_v36 = vld [vmem:[#allocation14 + $0x10] sm:$0xff] }
0x244d   :  { %2937 = vrcp.f32 %v739_v55  ;;  %v751_v61 = vand.u32 2147483648, %v739_v55  ;;  %vm745_vm13 = vweird.f32 %v739_v55  ;;  %v749_v58 = vand.u32 2147483647, %v739_v55  ;;  %2047 = vmatpush.msrb.mxu0 %v2026_v0 }
0x244f   :  { %v752_v1 = vor.u32 1.1754944e-38, %v751_v61  ;;  %vm750_vm15 = vcmp.eq.f32.partialorder %v749_v58, 8.507059e+37  ;;  %2048 = vmatpush.msrb.mxu0 %v2025_v36 }
0x2453   :  { %v2938_v8 = vpop.eup %2937 }
0x2454   :  { %v741_v63 = vmul.f32 %v2938_v8, %v739_v55  ;;  %vm746_vm12 = vweird.f32 %v2938_v8  ;;  %v2024_v55 = vld [vmem:[#allocation14 + $0x8] sm:$0xff] }
0x2455   :  { %vm747_vm14 = vmor %vm745_vm13, %vm746_vm12  ;;  %2049 = vmatpush.msrb.mxu0 %v2024_v55 }
0x2456   :  { %v742_v34 = vsub.f32 1.0, %v741_v63 }
0x2458   :  { %v743_v56 = vmul.f32 %v2938_v8, %v742_v34 }
0x245a   :  { %v744_v31 = vadd.f32 %v2938_v8, %v743_v56 }
0x245c   :  { %v748_v62 = vsel %vm747_vm14, %v2938_v8, %v744_v31  ;;  %v2023_v8 = vld [vmem:[#allocation14] sm:$0xff] }
0x245d   :  { %v753_v3 = vsel %vm750_vm15, %v752_v1, %v748_v62  ;;  %2050 = vmatpush.msrb.mxu0 %v2023_v8  ;;  %v3773_v1 = vld [vmem:[%s4015_s12] ss:$0 sm:$0xff] }
0x245e   :  { %v764_v4 = vmul.f32 %v762_v2, %v753_v3  ;;  %v759_v7 = vmul.f32 %v757_v6, %v753_v3 }
0x24a4   :  { %v1651_v57 = vpop.permute.xlu2 %1650 }
0x24a5   :  { %v3726_v59 = vmul.f32 %v1651_v57, %v1631_v16 }
0x24a7   :  { %v1659_v60 = vrot.slane %v3726_v59, 4 }
0x24a9   :  { %1660 = vrot.lane.b32.xlu0 %v1659_v60, %s3258_s3 }
0x24b1   :  { %766 = vrot.lane.b32.xlu0 %v764_v4, %s3258_s3 }
0x24b9   :  { %878 = vrot.lane.b32.xlu0 %v3520_v39, %s3258_s3 }
0x251b   :  { %v1661_v5 = vpop.permute.xlu0 %1660 }
0x251c   :  { %2743 = vmatmul.msk.f32.vlgmr.msrb.gmra.mxu1 %vm168_vm0, %v1661_v5 }
0x2523   :  { %v767_v11 = vpop.permute.xlu0 %766 }
0x2524   :  { %v769_v13 = vadd.f32 %v767_v11, %v759_v7 }
0x252b   :  { %v879_v15 = vpop.permute.xlu0 %878 }
0x252c   :  { %881 = vst.msk [vmem:[#allocation3 + $0x8] sm:$0xc0] %vm489_vm6, %v879_v15 }
0x2599   :  { %v1681_v19 = vpop.f32.mrf.mxu1 }
0x259a   :  { %v1685_v20 = vrot.slane %v1681_v19, 2 }
0x259c   :  { %v1687_v22 = vadd.f32 %v1685_v20, %v3695_v21 }
0x259e   :  { %2939 = vtanh.f32 %v1687_v22  ;;  %v2744_v29 = vmul.f32 -1.442695, %v1687_v22 }
0x259f   :  { %2941 = vtanh.f32 %v769_v13 }
0x25a0   :  { %2943 = vpow2.f32 %v2744_v29 }
0x25a4   :  { %v2940_v23 = vpop.eup %2939 }
0x25a5   :  { %1713 = vrot.lane.b32.xlu2 %v2940_v23, %s3257_s25  ;;  %v2942_v39 = vpop.eup %2941 }
0x25a6   :  { %v2944_v24 = vpop.eup %2943 }
0x25a7   :  { %v1691_v27 = vadd.f32 1.0, %v2944_v24 }
0x25a9   :  { %2945 = vrcp.f32 %v1691_v27  ;;  %v1703_v37 = vand.u32 2147483648, %v1691_v27  ;;  %vm1697_vm2 = vweird.f32 %v1691_v27  ;;  %v1701_v38 = vand.u32 2147483647, %v1691_v27 }
0x25ab   :  { %vm1702_vm4 = vcmp.eq.f32.partialorder %v1701_v38, 8.507059e+37 }
0x25ad   :  { %772 = vrot.lane.b32.xlu2 %v2942_v39, %s3257_s25 }
0x25af   :  { %v2946_v21 = vpop.eup %2945 }
0x25b0   :  { %v1693_v28 = vmul.f32 %v2946_v21, %v1691_v27  ;;  %vm1698_vm1 = vweird.f32 %v2946_v21 }
0x25b1   :  { %vm1699_vm3 = vmor %vm1697_vm2, %vm1698_vm1 }
0x25b2   :  { %v1694_v32 = vsub.f32 1.0, %v1693_v28 }
0x25b4   :  { %v1695_v33 = vmul.f32 %v2946_v21, %v1694_v32 }
0x25b5   :  { %1026 = vrot.lane.b32.xlu2 %v3563_v14, %s3258_s3  ;;  %v1704_v14 = vor.u32 1.1754944e-38, %v1703_v37 }
0x25b6   :  { %v1696_v45 = vadd.f32 %v2946_v21, %v1695_v33 }
0x25b8   :  { %v1700_v41 = vsel %vm1699_vm3, %v2946_v21, %v1696_v45 }
0x25bd   :  { %703 = vrot.lane.b32.xlu2 %v3543_v26, %s3258_s3  ;;  %v1705_v26 = vsel %vm1702_vm4, %v1704_v14, %v1700_v41 }
0x25be   :  { %v1711_v12 = vmul.f32 %v1709_v30, %v1705_v26 }
0x25ff   :  { %v1714_v42 = vpop.permute.xlu2 %1713 }
0x2600   :  { %v1716_v43 = vmul.f32 %v1714_v42, %v1705_v26  ;;  %v3790_v42 = vld [vmem:[#allocation15 + $0x18] sm:$0xff] }
0x2601   :  { %2074 = vmatpush.msrb.mxu3 %v3790_v42  ;;  %2145 = vmatpush.msrb.mxu1 %v3790_v42 }
0x2602   :  { %1718 = vrot.lane.b32.xlu1 %v1716_v43, %s3258_s3  ;;  %v3796_v43 = vld [vmem:[#allocation15 + $0x8] sm:$0xff]  ;;  %2583 = vmatpush.msra.mxu0 %v3790_v42 }
0x2607   :  { %v773_v44 = vpop.permute.xlu2 %772 }
0x260a   :  { %952 = vrot.lane.b32.xlu1 %v3547_v47, %s3258_s3  ;;  %v775_v47 = vmul.f32 %v773_v44, %v753_v3  ;;  %v3802_v44 = vld [vmem:[#allocation15] sm:$0xff] }
0x260f   :  { %v1027_v46 = vpop.permute.xlu2 %1026 }
0x2610   :  { %1029 = vst.msk [vmem:[#allocation3 + $0x8] sm:$0xc] %vm339_vm8, %v1027_v46 }
0x2612   :  { %629 = vrot.lane.b32.xlu1 %v3516_v25, %s3258_s3 }
0x2617   :  { %v704_v40 = vpop.permute.xlu2 %703 }
0x2618   :  { %706 = vst.msk [vmem:[#allocation2 + $0x8] sm:$0x30] %vm414_vm7, %v704_v40 }
0x2674   :  { %v1719_v48 = vpop.permute.xlu1 %1718 }
0x2675   :  { %v3751_v16 = vadd.f32 %v1719_v48, %v1711_v12 }
0x2677   :  { %2947 = vtanh.f32 %v3751_v16  ;;  %v1780_v32 = vrot.slane %v3751_v16, 6 }
0x267c   :  { %v953_v50 = vpop.permute.xlu1 %952 }
0x267d   :  { %v2948_v51 = vpop.eup %2947  ;;  %955 = vst.msk [vmem:[#allocation3 + $0x8] sm:$0x30] %vm414_vm7, %v953_v50 }
0x267e   :  { %1724 = vrot.lane.b32.xlu0 %v2948_v51, %s3257_s25 }
0x2684   :  { %v630_v52 = vpop.permute.xlu1 %629  ;;  %v1394_v25 = vld [vmem:[#allocation3 + $0x8] sm:$0xff] }
0x2685   :  { %632 = vst.msk [vmem:[#allocation2 + $0x8] sm:$0xc] %vm339_vm8, %v630_v52  ;;  %1399 = vrot.lane.b32.xlu2 %v1394_v25, %s3258_s3 }
0x2686   :  { %777 = vrot.lane.b32.xlu0 %v775_v47, %s3258_s3 }
0x26df   :  { %v1400_v31 = vpop.permute.xlu2 %1399 }
0x26f0   :  { %v1725_v63 = vpop.permute.xlu0 %1724 }
0x26f1   :  { %v3759_v34 = vmul.f32 %v1725_v63, %v1705_v26  ;;  %v3792_v26 = vld [vmem:[#allocation15 + $0x10] sm:$0xff] }
0x26f2   :  { %2075 = vmatpush.msrb.mxu3 %v3792_v26  ;;  %2146 = vmatpush.msrb.mxu1 %v3792_v26 }
0x26f3   :  { %v1733_v56 = vrot.slane %v3759_v34, 6  ;;  %2584 = vmatpush.msra.mxu0 %v3792_v26 }
0x26f4   :  { %2076 = vmatpush.msrb.mxu3 %v3796_v43  ;;  %2147 = vmatpush.msrb.mxu1 %v3796_v43 }
0x26f5   :  { %1734 = vrot.lane.b32.xlu1 %v1733_v56, %s3258_s3  ;;  %2585 = vmatpush.msra.mxu0 %v3796_v43 }
0x26f6   :  { %2077 = vmatpush.msrb.mxu3 %v3802_v44  ;;  %2148 = vmatpush.msrb.mxu1 %v3802_v44 }
0x26f7   :  { %2586 = vmatpush.msra.mxu0 %v3802_v44 }
0x26f8   :  { %v778_v57 = vpop.permute.xlu0 %777 }
0x26f9   :  { %780 = vst.msk [vmem:[#allocation2 + $0x8] sm:$0xc0] %vm489_vm6, %v778_v57 }
0x2700   :  { %v1392_v60 = vld [vmem:[#allocation2 + $0x8] sm:$0xff] }
0x2701   :  { %v1404_v61 = vsel %vm168_vm0, %v1392_v60, %v1400_v31 }
0x2702   :  { %2737 = vmatmul.msk.f32.gmra.mxu0 %vm1417_vm9, %v1404_v61 }
0x270a   :  { %2753 = vmatmul.msk.f32.vlgmr.msrb.gmra.mxu0 %vm1417_vm9, %v3685_v17 }
0x2712   :  { %2754 = vmatmul.msk.f32.gmra.mxu0 %vm1417_vm9, %v1404_v61 }
0x2767   :  { %v1735_v58 = vpop.permute.xlu1 %1734 }
0x2768   :  { %2745 = vmatmul.msk.f32.vlgmr.msra.gmra.mxu2 %vm168_vm0, %v1735_v58 }
0x2769   :  { %2219 = vmatpush.msra.mxu2 %v3790_v42 }
0x276b   :  { %2220 = vmatpush.msra.mxu2 %v3792_v26 }
0x276d   :  { %2221 = vmatpush.msra.mxu2 %v3796_v43 }
0x276f   :  { %2222 = vmatpush.msra.mxu2 %v3802_v44 }
0x277f   :  { %v1444_v62 = vpop.f32.mrf.mxu0 }
0x2780   :  { %v3779_v4 = vadd.f32 %v3692_v18, %v1444_v62 }
0x2787   :  { %v2052_v2 = vpop.f32.mrf.mxu0 }
0x2788   :  { %v3776_v3 = vadd.f32 %v3773_v1, %v2052_v2 }
0x278f   :  { %v2055_v48 = vpop.f32.mrf.mxu0 }
0x2790   :  { %v3827_v50 = vadd.f32 %v3773_v1, %v2055_v48 }
0x27eb   :  { %v1755_v5 = vpop.f32.mrf.mxu2 }
0x27ec   :  { %v1758_v17 = vadd.f32 %v1755_v5, %v3779_v4 }
0x27ee   :  { %2949 = vtanh.f32 %v1758_v17  ;;  %v2746_v7 = vmul.f32 -1.442695, %v1758_v17 }
0x27f0   :  { %2951 = vpow2.f32 %v2746_v7 }
0x27f4   :  { %v2950_v6 = vpop.eup %2949 }
0x27f5   :  { %1784 = vrot.lane.b32.xlu0 %v2950_v6, %s3257_s25 }
0x27f6   :  { %v2952_v11 = vpop.eup %2951 }
0x27f7   :  { %v1762_v13 = vadd.f32 1.0, %v2952_v11 }
0x27f9   :  { %2953 = vrcp.f32 %v1762_v13  ;;  %v1774_v18 = vand.u32 2147483648, %v1762_v13  ;;  %vm1768_vm11 = vweird.f32 %v1762_v13  ;;  %v1772_v39 = vand.u32 2147483647, %v1762_v13 }
0x27fb   :  { %v1775_v24 = vor.u32 1.1754944e-38, %v1774_v18  ;;  %vm1773_vm13 = vcmp.eq.f32.partialorder %v1772_v39, 8.507059e+37 }
0x27ff   :  { %v2954_v15 = vpop.eup %2953 }
0x2800   :  { %v1764_v19 = vmul.f32 %v2954_v15, %v1762_v13  ;;  %vm1769_vm10 = vweird.f32 %v2954_v15 }
0x2801   :  { %vm1770_vm12 = vmor %vm1768_vm11, %vm1769_vm10 }
0x2802   :  { %v1765_v20 = vsub.f32 1.0, %v1764_v19 }
0x2804   :  { %v1766_v22 = vmul.f32 %v2954_v15, %v1765_v20 }
0x2806   :  { %v1767_v23 = vadd.f32 %v2954_v15, %v1766_v22 }
0x2808   :  { %v1771_v29 = vsel %vm1770_vm12, %v2954_v15, %v1767_v23 }
0x2809   :  { %v1776_v21 = vsel %vm1773_vm13, %v1775_v24, %v1771_v29 }
0x280a   :  { %v1782_v33 = vmul.f32 %v1780_v32, %v1776_v21 }
0x2867   :  { %v1785_v27 = vpop.permute.xlu0 %1784 }
0x2868   :  { %v1787_v28 = vmul.f32 %v1785_v27, %v1776_v21 }
0x286a   :  { %1789 = vrot.lane.b32.xlu1 %v1787_v28, %s3258_s3 }
0x28dc   :  { %v1790_v45 = vpop.permute.xlu1 %1789 }
0x28dd   :  { %v3785_v37 = vadd.f32 %v1790_v45, %v1782_v33 }
0x28df   :  { %2955 = vtanh.f32 %v3785_v37  ;;  %v1851_v27 = vrot.slane %v3785_v37, 6 }
0x28e5   :  { %v2956_v38 = vpop.eup %2955 }
0x28e6   :  { %1795 = vrot.lane.b32.xlu2 %v2956_v38, %s3257_s25 }
0x2940   :  { %v1796_v41 = vpop.permute.xlu2 %1795 }
0x2941   :  { %v1798_v14 = vmul.f32 %v1796_v41, %v1776_v21 }
0x2943   :  { %1800 = vrot.lane.b32.xlu0 %v1798_v14, %s3258_s3 }
0x29b5   :  { %v1801_v46 = vpop.permute.xlu0 %1800 }
0x29b6   :  { %1803 = vst.msk [vmem:[#allocation4 + $0x8] sm:$0x3] %vm267_vm5, %v1801_v46  ;;  %2747 = vmatmul.msk.f32.vlgmr.msra.gmra.mxu3 %vm168_vm0, %v1801_v46 }
0x29b7   :  { %2293 = vmatpush.msra.mxu3 %v3790_v42 }
0x29b9   :  { %2294 = vmatpush.msra.mxu3 %v3792_v26 }
0x29bb   :  { %2295 = vmatpush.msra.mxu3 %v3796_v43 }
0x29bd   :  { %2296 = vmatpush.msra.mxu3 %v3802_v44 }
0x29be   :  { %2078 = vmatmul.f32.vlgmr.msrb.gmra.mxu3 %v3256_v9 }
0x29bf   :  { %2509 = vmatpush.msrb.mxu3 %v3790_v42 }
0x29c1   :  { %2510 = vmatpush.msrb.mxu3 %v3792_v26 }
0x29c3   :  { %2511 = vmatpush.msrb.mxu3 %v3796_v43 }
0x29c5   :  { %2512 = vmatpush.msrb.mxu3 %v3802_v44 }
0x2a39   :  { %v1823_v40 = vpop.f32.mrf.mxu3 }
0x2a3a   :  { %v1827_v30 = vrot.slane %v1823_v40, 6 }
0x2a3c   :  { %v1829_v12 = vadd.f32 %v1827_v30, %v3779_v4 }
0x2a3e   :  { %2957 = vtanh.f32 %v1829_v12  ;;  %v2748_v54 = vmul.f32 -1.442695, %v1829_v12 }
0x2a41   :  { %v2079_v16 = vpop.f32.mrf.mxu3 }
0x2a42   :  { %v2083_v51 = vrot.slane %v2079_v16, 2 }
0x2a44   :  { %v2958_v9 = vpop.eup %2957  ;;  %v2085_v47 = vadd.f32 %v2083_v51, %v3827_v50 }
0x2a45   :  { %1855 = vrot.lane.b32.xlu1 %v2958_v9, %s3257_s25 }
0x2a46   :  { %2959 = vtanh.f32 %v2085_v47  ;;  %v2755_v25 = vmul.f32 -1.442695, %v2085_v47 }
0x2a48   :  { %2961 = vpow2.f32 %v2755_v25 }
0x2a4c   :  { %v2960_v52 = vpop.eup %2959 }
0x2a4d   :  { %2108 = vrot.lane.b32.xlu2 %v2960_v52, %s3257_s25 }
0x2a4e   :  { %v2962_v53 = vpop.eup %2961 }
0x2a4f   :  { %v2089_v35 = vadd.f32 1.0, %v2962_v53 }
0x2a51   :  { %2963 = vrcp.f32 %v2089_v35  ;;  %v2101_v31 = vand.u32 2147483648, %v2089_v35  ;;  %vm2095_vm15 = vweird.f32 %v2089_v35  ;;  %v2099_v60 = vand.u32 2147483647, %v2089_v35 }
0x2a52   :  { %2965 = vpow2.f32 %v2748_v54 }
0x2a53   :  { %v2102_v62 = vor.u32 1.1754944e-38, %v2101_v31  ;;  %vm2100_vm2 = vcmp.eq.f32.partialorder %v2099_v60, 8.507059e+37 }
0x2a57   :  { %v2964_v49 = vpop.eup %2963 }
0x2a58   :  { %v2966_v0 = vpop.eup %2965  ;;  %v2091_v36 = vmul.f32 %v2964_v49, %v2089_v35  ;;  %vm2096_vm14 = vweird.f32 %v2964_v49 }
0x2a59   :  { %v1833_v55 = vadd.f32 1.0, %v2966_v0  ;;  %vm2097_vm1 = vmor %vm2095_vm15, %vm2096_vm14 }
0x2a5a   :  { %v2092_v8 = vsub.f32 1.0, %v2091_v36 }
0x2a5b   :  { %2967 = vrcp.f32 %v1833_v55  ;;  %v1845_v11 = vand.u32 2147483648, %v1833_v55  ;;  %vm1839_vm4 = vweird.f32 %v1833_v55  ;;  %v1843_v13 = vand.u32 2147483647, %v1833_v55 }
0x2a5c   :  { %v2093_v63 = vmul.f32 %v2964_v49, %v2092_v8 }
0x2a5d   :  { %v1846_v19 = vor.u32 1.1754944e-38, %v1845_v11  ;;  %vm1844_vm11 = vcmp.eq.f32.partialorder %v1843_v13, 8.507059e+37 }
0x2a5e   :  { %v2094_v56 = vadd.f32 %v2964_v49, %v2093_v63 }
0x2a60   :  { %v2098_v61 = vsel %vm2097_vm1, %v2964_v49, %v2094_v56 }
0x2a61   :  { %v2968_v57 = vpop.eup %2967  ;;  %v2103_v2 = vsel %vm2100_vm2, %v2102_v62, %v2098_v61 }
0x2a62   :  { %v1835_v58 = vmul.f32 %v2968_v57, %v1833_v55  ;;  %vm1840_vm3 = vweird.f32 %v2968_v57  ;;  %v2106_v18 = vmul.f32 0.0, %v2103_v2 }
0x2a63   :  { %vm1841_vm10 = vmor %vm1839_vm4, %vm1840_vm3 }
0x2a64   :  { %v1836_v17 = vsub.f32 1.0, %v1835_v58 }
0x2a66   :  { %v1837_v6 = vmul.f32 %v2968_v57, %v1836_v17 }
0x2a68   :  { %v1838_v7 = vadd.f32 %v2968_v57, %v1837_v6 }
0x2a6a   :  { %v1842_v15 = vsel %vm1841_vm10, %v2968_v57, %v1838_v7 }
0x2a6b   :  { %v1847_v22 = vsel %vm1844_vm11, %v1846_v19, %v1842_v15 }
0x2a6c   :  { %v1853_v21 = vmul.f32 %v1851_v27, %v1847_v22 }
0x2aa7   :  { %v2109_v1 = vpop.permute.xlu2 %2108 }
0x2aa8   :  { %v2111_v5 = vmul.f32 %v2109_v1, %v2103_v2 }
0x2aaa   :  { %2113 = vrot.lane.b32.xlu1 %v2111_v5, %s3258_s3 }
0x2ab7   :  { %v1856_v20 = vpop.permute.xlu1 %1855 }
0x2ab8   :  { %v1858_v23 = vmul.f32 %v1856_v20, %v1847_v22 }
0x2aba   :  { %1860 = vrot.lane.b32.xlu0 %v1858_v23, %s3258_s3 }
0x2b1c   :  { %v2114_v39 = vpop.permute.xlu1 %2113 }
0x2b1d   :  { %v3834_v29 = vadd.f32 %v2114_v39, %v2106_v18 }
0x2b1f   :  { %2969 = vtanh.f32 %v3834_v29 }
0x2b25   :  { %v2970_v24 = vpop.eup %2969 }
0x2b26   :  { %2119 = vrot.lane.b32.xlu0 %v2970_v24, %s3257_s25 }
0x2b2c   :  { %v1861_v28 = vpop.permute.xlu0 %1860 }
0x2b2d   :  { %v3839_v32 = vadd.f32 %v1861_v28, %v1853_v21 }
0x2b2f   :  { %2971 = vtanh.f32 %v3839_v32  ;;  %v1925_v39 = vrot.slane %v3839_v32, 6 }
0x2b35   :  { %v2972_v33 = vpop.eup %2971 }
0x2b36   :  { %1866 = vrot.lane.b32.xlu2 %v2972_v33, %s3257_s25  ;;  %v2178_v33 = vrot.slane %v3834_v29, 2 }
0x2b90   :  { %v1867_v45 = vpop.permute.xlu2 %1866 }
0x2b91   :  { %v3843_v38 = vmul.f32 %v1867_v45, %v1847_v22 }
0x2b93   :  { %v1875_v41 = vrot.slane %v3843_v38, 2 }
0x2b95   :  { %1876 = vrot.lane.b32.xlu1 %v1875_v41, %s3258_s3 }
0x2b98   :  { %v2120_v14 = vpop.permute.xlu0 %2119 }
0x2b99   :  { %v3847_v46 = vmul.f32 %v2120_v14, %v2103_v2 }
0x2b9b   :  { %v2128_v37 = vrot.slane %v3847_v46, 6 }
0x2b9d   :  { %2129 = vrot.lane.b32.xlu2 %v2128_v37, %s3258_s3 }
0x2bf7   :  { %v2130_v30 = vpop.permute.xlu2 %2129 }
0x2c07   :  { %v1877_v40 = vpop.permute.xlu1 %1876 }
0x2c08   :  { %2749 = vmatmul.msk.f32.vlgmr.msra.gmra.mxu1 %vm168_vm0, %v1877_v40 }
0x2c09   :  { %2361 = vmatpush.msra.mxu1 %v3790_v42 }
0x2c0b   :  { %2362 = vmatpush.msra.mxu1 %v3792_v26 }
0x2c0d   :  { %2363 = vmatpush.msra.mxu1 %v3796_v43 }
0x2c0f   :  { %2364 = vmatpush.msra.mxu1 %v3802_v44 }
0x2c10   :  { %2756 = vmatmul.msk.f32.vlgmr.msrb.gmra.mxu1 %vm168_vm0, %v2130_v30 }
0x2c85   :  { %v1897_v12 = vpop.f32.mrf.mxu1 }
0x2c86   :  { %v1901_v48 = vrot.slane %v1897_v12, 4 }
0x2c88   :  { %v1903_v16 = vadd.f32 %v1901_v48, %v3779_v4 }
0x2c8a   :  { %2973 = vtanh.f32 %v1903_v16  ;;  %v2750_v53 = vmul.f32 -1.442695, %v1903_v16 }
0x2c8d   :  { %v2150_v51 = vpop.f32.mrf.mxu1 }
0x2c8e   :  { %v2154_v9 = vrot.slane %v2150_v51, 4 }
0x2c90   :  { %v2974_v47 = vpop.eup %2973  ;;  %v2156_v52 = vadd.f32 %v2154_v9, %v3827_v50 }
0x2c91   :  { %1929 = vrot.lane.b32.xlu0 %v2974_v47, %s3257_s25 }
0x2c92   :  { %2975 = vtanh.f32 %v2156_v52  ;;  %v2757_v35 = vmul.f32 -1.442695, %v2156_v52 }
0x2c93   :  { %2977 = vpow2.f32 %v2750_v53 }
0x2c94   :  { %2979 = vpow2.f32 %v2757_v35 }
0x2c98   :  { %v2976_v25 = vpop.eup %2975 }
0x2c99   :  { %2182 = vrot.lane.b32.xlu1 %v2976_v25, %s3257_s25  ;;  %v2978_v54 = vpop.eup %2977 }
0x2c9a   :  { %v1907_v49 = vadd.f32 1.0, %v2978_v54  ;;  %v2980_v0 = vpop.eup %2979 }
0x2c9b   :  { %v2160_v36 = vadd.f32 1.0, %v2980_v0 }
0x2c9c   :  { %2981 = vrcp.f32 %v1907_v49  ;;  %v1919_v58 = vand.u32 2147483648, %v1907_v49  ;;  %vm1913_vm13 = vweird.f32 %v1907_v49  ;;  %v1917_v62 = vand.u32 2147483647, %v1907_v49 }
0x2c9d   :  { %2983 = vrcp.f32 %v2160_v36  ;;  %v2172_v13 = vand.u32 2147483648, %v2160_v36  ;;  %vm2166_vm2 = vweird.f32 %v2160_v36  ;;  %v2170_v15 = vand.u32 2147483647, %v2160_v36 }
0x2c9e   :  { %v1920_v5 = vor.u32 1.1754944e-38, %v1919_v58  ;;  %vm1918_vm15 = vcmp.eq.f32.partialorder %v1917_v62, 8.507059e+37 }
0x2c9f   :  { %v2173_v20 = vor.u32 1.1754944e-38, %v2172_v13  ;;  %vm2171_vm4 = vcmp.eq.f32.partialorder %v2170_v15, 8.507059e+37 }
0x2ca2   :  { %v2982_v55 = vpop.eup %2981 }
0x2ca3   :  { %v1909_v8 = vmul.f32 %v2982_v55, %v1907_v49  ;;  %v2984_v56 = vpop.eup %2983  ;;  %vm1914_vm12 = vweird.f32 %v2982_v55 }
0x2ca4   :  { %v2162_v31 = vmul.f32 %v2984_v56, %v2160_v36  ;;  %vm1915_vm14 = vmor %vm1913_vm13, %vm1914_vm12  ;;  %vm2167_vm1 = vweird.f32 %v2984_v56 }
0x2ca5   :  { %v1910_v63 = vsub.f32 1.0, %v1909_v8  ;;  %vm2168_vm3 = vmor %vm2166_vm2, %vm2167_vm1 }
0x2ca6   :  { %v2163_v61 = vsub.f32 1.0, %v2162_v31 }
0x2ca7   :  { %v1911_v57 = vmul.f32 %v2982_v55, %v1910_v63 }
0x2ca8   :  { %v2164_v2 = vmul.f32 %v2984_v56, %v2163_v61 }
0x2ca9   :  { %v1912_v60 = vadd.f32 %v2982_v55, %v1911_v57 }
0x2caa   :  { %v2165_v11 = vadd.f32 %v2984_v56, %v2164_v2 }
0x2cab   :  { %v1916_v1 = vsel %vm1915_vm14, %v2982_v55, %v1912_v60 }
0x2cac   :  { %v1921_v6 = vsel %vm1918_vm15, %v1920_v5, %v1916_v1  ;;  %v2169_v19 = vsel %vm2168_vm3, %v2984_v56, %v2165_v11 }
0x2cad   :  { %v2174_v23 = vsel %vm2171_vm4, %v2173_v20, %v2169_v19  ;;  %v1927_v24 = vmul.f32 %v1925_v39, %v1921_v6 }
0x2cae   :  { %v2180_v45 = vmul.f32 %v2178_v33, %v2174_v23 }
0x2d03   :  { %v1930_v17 = vpop.permute.xlu0 %1929 }
0x2d04   :  { %v1932_v7 = vmul.f32 %v1930_v17, %v1921_v6 }
0x2d06   :  { %1934 = vrot.lane.b32.xlu2 %v1932_v7, %s3258_s3 }
0x2d0b   :  { %v2183_v22 = vpop.permute.xlu1 %2182 }
0x2d0c   :  { %v2185_v18 = vmul.f32 %v2183_v22, %v2174_v23 }
0x2d0e   :  { %2187 = vrot.lane.b32.xlu0 %v2185_v18, %s3258_s3 }
0x2d60   :  { %v1935_v27 = vpop.permute.xlu2 %1934 }
0x2d61   :  { %v3864_v21 = vadd.f32 %v1935_v27, %v1927_v24 }
0x2d63   :  { %2985 = vtanh.f32 %v3864_v21 }
0x2d69   :  { %v2986_v28 = vpop.eup %2985 }
0x2d6a   :  { %1940 = vrot.lane.b32.xlu1 %v2986_v28, %s3257_s25 }
0x2d80   :  { %v2188_v41 = vpop.permute.xlu0 %2187 }
0x2d81   :  { %v2190_v14 = vadd.f32 %v2188_v41, %v2180_v45 }
0x2d83   :  { %2987 = vtanh.f32 %v2190_v14  ;;  %v2252_v60 = vrot.slane %v2190_v14, 2 }
0x2d89   :  { %v2988_v37 = vpop.eup %2987 }
0x2d8a   :  { %2193 = vrot.lane.b32.xlu2 %v2988_v37, %s3257_s25 }
0x2ddc   :  { %v1941_v40 = vpop.permute.xlu1 %1940 }
0x2ddd   :  { %v3870_v32 = vmul.f32 %v1941_v40, %v1921_v6 }
0x2ddf   :  { %v1949_v30 = vrot.slane %v3870_v32, 4 }
0x2de1   :  { %1950 = vrot.lane.b32.xlu0 %v1949_v30, %s3258_s3 }
0x2de4   :  { %v2194_v12 = vpop.permute.xlu2 %2193 }
0x2de5   :  { %v3874_v48 = vmul.f32 %v2194_v12, %v2174_v23 }
0x2de7   :  { %v2202_v16 = vrot.slane %v3874_v48, 4 }
0x2de9   :  { %2203 = vrot.lane.b32.xlu1 %v2202_v16, %s3258_s3 }
0x2e53   :  { %v1951_v29 = vpop.permute.xlu0 %1950 }
0x2e54   :  { %2751 = vmatmul.msk.f32.vlgmr.msrb.gmra.mxu2 %vm168_vm0, %v1951_v29 }
0x2e55   :  { %2435 = vmatpush.msrb.mxu2 %v3790_v42 }
0x2e57   :  { %2436 = vmatpush.msrb.mxu2 %v3792_v26 }
0x2e59   :  { %2437 = vmatpush.msrb.mxu2 %v3796_v43 }
0x2e5b   :  { %v2204_v51 = vpop.permute.xlu1 %2203  ;;  %2438 = vmatpush.msrb.mxu2 %v3802_v44 }
0x2e5c   :  { %2758 = vmatmul.msk.f32.vlgmr.msra.gmra.mxu2 %vm168_vm0, %v2204_v51 }
0x2ed7   :  { %v3884_v9 = vpop.f32.mrf.mxu2 }
0x2edf   :  { %v2224_v47 = vpop.f32.mrf.mxu2 }
0x2ee0   :  { %v2228_v52 = vrot.slane %v2224_v47, 6 }
0x2ee2   :  { %v2230_v25 = vadd.f32 %v2228_v52, %v3827_v50 }
0x2ee4   :  { %2989 = vtanh.f32 %v2230_v25  ;;  %v2759_v42 = vmul.f32 -1.442695, %v2230_v25 }
0x2ee6   :  { %2991 = vpow2.f32 %v2759_v42 }
0x2eea   :  { %v2990_v53 = vpop.eup %2989 }
0x2eeb   :  { %2256 = vrot.lane.b32.xlu2 %v2990_v53, %s3257_s25 }
0x2eec   :  { %v2992_v26 = vpop.eup %2991 }
0x2eed   :  { %v2234_v35 = vadd.f32 1.0, %v2992_v26 }
0x2eef   :  { %2993 = vrcp.f32 %v2234_v35  ;;  %v2246_v36 = vand.u32 2147483648, %v2234_v35  ;;  %vm2240_vm11 = vweird.f32 %v2234_v35  ;;  %v2244_v55 = vand.u32 2147483647, %v2234_v35 }
0x2ef1   :  { %v2247_v63 = vor.u32 1.1754944e-38, %v2246_v36  ;;  %vm2245_vm13 = vcmp.eq.f32.partialorder %v2244_v55, 8.507059e+37 }
0x2ef5   :  { %v2994_v43 = vpop.eup %2993 }
0x2ef6   :  { %v2236_v54 = vmul.f32 %v2994_v43, %v2234_v35  ;;  %vm2241_vm10 = vweird.f32 %v2994_v43 }
0x2ef7   :  { %vm2242_vm12 = vmor %vm2240_vm11, %vm2241_vm10 }
0x2ef8   :  { %v2237_v44 = vsub.f32 1.0, %v2236_v54 }
0x2efa   :  { %v2238_v49 = vmul.f32 %v2994_v43, %v2237_v44 }
0x2efc   :  { %v2239_v0 = vadd.f32 %v2994_v43, %v2238_v49 }
0x2efe   :  { %v2243_v8 = vsel %vm2242_vm12, %v2994_v43, %v2239_v0 }
0x2eff   :  { %v2248_v57 = vsel %vm2245_vm13, %v2247_v63, %v2243_v8 }
0x2f00   :  { %v2254_v61 = vmul.f32 %v2252_v60, %v2248_v57 }
0x2f45   :  { %v2257_v56 = vpop.permute.xlu2 %2256 }
0x2f46   :  { %v2259_v31 = vmul.f32 %v2257_v56, %v2248_v57 }
0x2f48   :  { %2261 = vrot.lane.b32.xlu0 %v2259_v31, %s3258_s3 }
0x2fba   :  { %v2262_v58 = vpop.permute.xlu0 %2261 }
0x2fbb   :  { %v2264_v62 = vadd.f32 %v2262_v58, %v2254_v61 }
0x2fbd   :  { %2995 = vtanh.f32 %v2264_v62  ;;  %v2323_v37 = vrot.slane %v2264_v62, 2 }
0x2fc3   :  { %v2996_v1 = vpop.eup %2995 }
0x2fc4   :  { %2267 = vrot.lane.b32.xlu1 %v2996_v1, %s3257_s25 }
0x3036   :  { %v2268_v2 = vpop.permute.xlu1 %2267 }
0x3037   :  { %v3890_v5 = vmul.f32 %v2268_v2, %v2248_v57 }
0x3039   :  { %v2276_v17 = vrot.slane %v3890_v5, 2 }
0x303b   :  { %2277 = vrot.lane.b32.xlu2 %v2276_v17, %s3258_s3 }
0x3095   :  { %v2278_v6 = vpop.permute.xlu2 %2277 }
0x3096   :  { %2760 = vmatmul.msk.f32.vlgmr.msra.gmra.mxu3 %vm168_vm0, %v2278_v6 }
0x3119   :  { %v2298_v7 = vpop.f32.mrf.mxu3 }
0x311a   :  { %v2301_v11 = vadd.f32 %v2298_v7, %v3827_v50 }
0x311c   :  { %2997 = vtanh.f32 %v2301_v11  ;;  %v2761_v15 = vmul.f32 -1.442695, %v2301_v11 }
0x311e   :  { %2999 = vpow2.f32 %v2761_v15 }
0x3122   :  { %v2998_v13 = vpop.eup %2997 }
0x3123   :  { %2327 = vrot.lane.b32.xlu0 %v2998_v13, %s3257_s25 }
0x3124   :  { %v3000_v19 = vpop.eup %2999 }
0x3125   :  { %v2305_v20 = vadd.f32 1.0, %v3000_v19 }
0x3127   :  { %3001 = vrcp.f32 %v2305_v20  ;;  %v2317_v27 = vand.u32 2147483648, %v2305_v20  ;;  %vm2311_vm15 = vweird.f32 %v2305_v20  ;;  %v2315_v28 = vand.u32 2147483647, %v2305_v20 }
0x3129   :  { %v2318_v33 = vor.u32 1.1754944e-38, %v2317_v27  ;;  %vm2316_vm2 = vcmp.eq.f32.partialorder %v2315_v28, 8.507059e+37 }
0x312d   :  { %v3002_v22 = vpop.eup %3001 }
0x312e   :  { %v2307_v23 = vmul.f32 %v3002_v22, %v2305_v20  ;;  %vm2312_vm14 = vweird.f32 %v3002_v22 }
0x312f   :  { %vm2313_vm1 = vmor %vm2311_vm15, %vm2312_vm14 }
0x3130   :  { %v2308_v18 = vsub.f32 1.0, %v2307_v23 }
0x3132   :  { %v2309_v39 = vmul.f32 %v3002_v22, %v2308_v18 }
0x3134   :  { %v2310_v24 = vadd.f32 %v3002_v22, %v2309_v39 }
0x3136   :  { %v2314_v50 = vsel %vm2313_vm1, %v3002_v22, %v2310_v24 }
0x3137   :  { %v2319_v41 = vsel %vm2316_vm2, %v2318_v33, %v2314_v50 }
0x3138   :  { %v2325_v40 = vmul.f32 %v2323_v37, %v2319_v41 }
0x3195   :  { %v2328_v45 = vpop.permute.xlu0 %2327 }
0x3196   :  { %v2330_v14 = vmul.f32 %v2328_v45, %v2319_v41 }
0x3198   :  { %2332 = vrot.lane.b32.xlu1 %v2330_v14, %s3258_s3 }
0x320a   :  { %v2333_v30 = vpop.permute.xlu1 %2332 }
0x320b   :  { %v2335_v12 = vadd.f32 %v2333_v30, %v2325_v40 }
0x320d   :  { %3003 = vtanh.f32 %v2335_v12  ;;  %v2394_v61 = vrot.slane %v2335_v12, 2 }
0x3213   :  { %v3004_v16 = vpop.eup %3003 }
0x3214   :  { %2338 = vrot.lane.b32.xlu2 %v3004_v16, %s3257_s25 }
0x326e   :  { %v2339_v29 = vpop.permute.xlu2 %2338 }
0x326f   :  { %v2341_v51 = vmul.f32 %v2339_v29, %v2319_v41 }
0x3271   :  { %2343 = vrot.lane.b32.xlu0 %v2341_v51, %s3258_s3 }
0x32e3   :  { %v2344_v47 = vpop.permute.xlu0 %2343 }
0x32e4   :  { %2346 = vst.msk [vmem:[#allocation5 + $0x8] sm:$0x3] %vm267_vm5, %v2344_v47  ;;  %2762 = vmatmul.msk.f32.vlgmr.msra.gmra.mxu1 %vm168_vm0, %v2344_v47 }
0x3361   :  { %v2366_v52 = vpop.f32.mrf.mxu1 }
0x3362   :  { %v2370_v25 = vrot.slane %v2366_v52, 2 }
0x3364   :  { %v2372_v53 = vadd.f32 %v2370_v25, %v3776_v3 }
0x3366   :  { %3005 = vtanh.f32 %v2372_v53  ;;  %v2763_v26 = vmul.f32 -1.442695, %v2372_v53 }
0x3368   :  { %3007 = vpow2.f32 %v2763_v26 }
0x336c   :  { %v3006_v42 = vpop.eup %3005 }
0x336d   :  { %2398 = vrot.lane.b32.xlu1 %v3006_v42, %s3257_s25 }
0x336e   :  { %v3008_v35 = vpop.eup %3007 }
0x336f   :  { %v2376_v43 = vadd.f32 1.0, %v3008_v35 }
0x3371   :  { %3009 = vrcp.f32 %v2376_v43  ;;  %v2388_v55 = vand.u32 2147483648, %v2376_v43  ;;  %vm2382_vm3 = vweird.f32 %v2376_v43  ;;  %v2386_v8 = vand.u32 2147483647, %v2376_v43 }
0x3373   :  { %v2389_v56 = vor.u32 1.1754944e-38, %v2388_v55  ;;  %vm2387_vm10 = vcmp.eq.f32.partialorder %v2386_v8, 8.507059e+37 }
0x3377   :  { %v3010_v54 = vpop.eup %3009 }
0x3378   :  { %v2378_v44 = vmul.f32 %v3010_v54, %v2376_v43  ;;  %vm2383_vm5 = vweird.f32 %v3010_v54 }
0x3379   :  { %vm2384_vm4 = vmor %vm2382_vm3, %vm2383_vm5 }
0x337a   :  { %v2379_v49 = vsub.f32 1.0, %v2378_v44 }
0x337c   :  { %v2380_v0 = vmul.f32 %v3010_v54, %v2379_v49 }
0x337e   :  { %v2381_v36 = vadd.f32 %v3010_v54, %v2380_v0 }
0x3380   :  { %v2385_v63 = vsel %vm2384_vm4, %v3010_v54, %v2381_v36 }
0x3381   :  { %v2390_v31 = vsel %vm2387_vm10, %v2389_v56, %v2385_v63 }
0x3382   :  { %v2396_v58 = vmul.f32 %v2394_v61, %v2390_v31 }
0x33df   :  { %v2399_v57 = vpop.permute.xlu1 %2398 }
0x33e0   :  { %v2401_v60 = vmul.f32 %v2399_v57, %v2390_v31 }
0x33e2   :  { %2403 = vrot.lane.b32.xlu2 %v2401_v60, %s3258_s3  ;;  %v1975_v60 = vrot.slane %v3884_v9, 2 }
0x343c   :  { %v2404_v62 = vpop.permute.xlu2 %2403 }
0x343d   :  { %v2406_v1 = vadd.f32 %v2404_v62, %v2396_v58  ;;  %v1977_v62 = vadd.f32 %v1975_v60, %v3779_v4 }
0x343f   :  { %3011 = vtanh.f32 %v2406_v1  ;;  %v2468_v12 = vrot.slane %v2406_v1, 2  ;;  %v2752_v9 = vmul.f32 -1.442695, %v1977_v62 }
0x3445   :  { %v3012_v2 = vpop.eup %3011 }
0x3446   :  { %2409 = vrot.lane.b32.xlu0 %v3012_v2, %s3257_s25 }
0x34b8   :  { %v2410_v17 = vpop.permute.xlu0 %2409 }
0x34b9   :  { %v3906_v6 = vmul.f32 %v2410_v17, %v2390_v31 }
0x34bb   :  { %v2418_v7 = vrot.slane %v3906_v6, 6 }
0x34bd   :  { %2419 = vrot.lane.b32.xlu1 %v2418_v7, %s3258_s3 }
0x352f   :  { %v2420_v11 = vpop.permute.xlu1 %2419 }
0x3530   :  { %2764 = vmatmul.msk.f32.vlgmr.msrb.gmra.mxu2 %vm168_vm0, %v2420_v11 }
0x35b3   :  { %v2440_v13 = vpop.f32.mrf.mxu2 }
0x35b4   :  { %v2444_v15 = vrot.slane %v2440_v13, 4 }
0x35b6   :  { %v2446_v19 = vadd.f32 %v2444_v15, %v3776_v3 }
0x35b8   :  { %3013 = vtanh.f32 %v2446_v19  ;;  %v2765_v22 = vmul.f32 -1.442695, %v2446_v19 }
0x35ba   :  { %3015 = vpow2.f32 %v2765_v22 }
0x35be   :  { %v3014_v20 = vpop.eup %3013 }
0x35bf   :  { %2472 = vrot.lane.b32.xlu2 %v3014_v20, %s3257_s25 }
0x35c0   :  { %v3016_v23 = vpop.eup %3015 }
0x35c1   :  { %v2450_v18 = vadd.f32 1.0, %v3016_v23 }
0x35c3   :  { %3017 = vrcp.f32 %v2450_v18  ;;  %v2462_v33 = vand.u32 2147483648, %v2450_v18  ;;  %vm2456_vm12 = vweird.f32 %v2450_v18  ;;  %v2460_v45 = vand.u32 2147483647, %v2450_v18 }
0x35c5   :  { %v2463_v14 = vor.u32 1.1754944e-38, %v2462_v33  ;;  %vm2461_vm14 = vcmp.eq.f32.partialorder %v2460_v45, 8.507059e+37 }
0x35c9   :  { %v3018_v39 = vpop.eup %3017 }
0x35ca   :  { %v2452_v24 = vmul.f32 %v3018_v39, %v2450_v18  ;;  %vm2457_vm11 = vweird.f32 %v3018_v39 }
0x35cb   :  { %vm2458_vm13 = vmor %vm2456_vm12, %vm2457_vm11 }
0x35cc   :  { %v2453_v27 = vsub.f32 1.0, %v2452_v24 }
0x35ce   :  { %v2454_v28 = vmul.f32 %v3018_v39, %v2453_v27 }
0x35d0   :  { %v2455_v50 = vadd.f32 %v3018_v39, %v2454_v28 }
0x35d2   :  { %v2459_v41 = vsel %vm2458_vm13, %v3018_v39, %v2455_v50 }
0x35d3   :  { %v2464_v40 = vsel %vm2461_vm14, %v2463_v14, %v2459_v41 }
0x35d4   :  { %v2470_v16 = vmul.f32 %v2468_v12, %v2464_v40 }
0x3619   :  { %v2473_v37 = vpop.permute.xlu2 %2472 }
0x361a   :  { %v2475_v30 = vmul.f32 %v2473_v37, %v2464_v40 }
0x361c   :  { %2477 = vrot.lane.b32.xlu0 %v2475_v30, %s3258_s3 }
0x368e   :  { %v2478_v29 = vpop.permute.xlu0 %2477 }
0x368f   :  { %v2480_v51 = vadd.f32 %v2478_v29, %v2470_v16  ;;  %v1999_v16 = vrot.slane %v3864_v21, 6 }
0x3691   :  { %3019 = vtanh.f32 %v2480_v51  ;;  %v2542_v19 = vrot.slane %v2480_v51, 2 }
0x3697   :  { %v3020_v47 = vpop.eup %3019 }
0x3698   :  { %2483 = vrot.lane.b32.xlu1 %v3020_v47, %s3257_s25 }
0x370a   :  { %v2484_v52 = vpop.permute.xlu1 %2483 }
0x370b   :  { %v3915_v25 = vmul.f32 %v2484_v52, %v2464_v40 }
0x370d   :  { %v2492_v53 = vrot.slane %v3915_v25, 4 }
0x370f   :  { %2493 = vrot.lane.b32.xlu2 %v2492_v53, %s3258_s3 }
0x3769   :  { %v2494_v42 = vpop.permute.xlu2 %2493 }
0x376a   :  { %2766 = vmatmul.msk.f32.vlgmr.msrb.gmra.mxu3 %vm168_vm0, %v2494_v42 }
0x37ed   :  { %v2514_v26 = vpop.f32.mrf.mxu3 }
0x37ee   :  { %v2518_v35 = vrot.slane %v2514_v26, 6 }
0x37f0   :  { %v2520_v43 = vadd.f32 %v2518_v35, %v3776_v3 }
0x37f2   :  { %3021 = vtanh.f32 %v2520_v43  ;;  %v2767_v44 = vmul.f32 -1.442695, %v2520_v43  ;;  %v2651_v43 = vld [vmem:[%s4016_s13 + $0x38] sm:$0xff] }
0x37f3   :  { %2668 = vmatpush.msrb.mxu1 %v2651_v43 }
0x37f4   :  { %3023 = vpow2.f32 %v2767_v44  ;;  %v2648_v44 = vld [vmem:[%s4016_s13 + $0x20] sm:$0xff] }
0x37f8   :  { %v3022_v54 = vpop.eup %3021 }
0x37f9   :  { %2546 = vrot.lane.b32.xlu0 %v3022_v54, %s3257_s25  ;;  %v2649_v54 = vld [vmem:[%s4016_s13 + $0x28] sm:$0xff] }
0x37fa   :  { %v3024_v49 = vpop.eup %3023 }
0x37fb   :  { %v2524_v0 = vadd.f32 1.0, %v3024_v49  ;;  %v2647_v49 = vld [vmem:[%s4016_s13 + $0x18] sm:$0xff] }
0x37fd   :  { %3025 = vrcp.f32 %v2524_v0  ;;  %v2536_v57 = vand.u32 2147483648, %v2524_v0  ;;  %vm2530_vm1 = vweird.f32 %v2524_v0  ;;  %v2534_v31 = vand.u32 2147483647, %v2524_v0 }
0x37fe   :  { %3027 = vtanh.f32 %v1977_v62 }
0x37ff   :  { %v2537_v58 = vor.u32 1.1754944e-38, %v2536_v57  ;;  %vm2535_vm5 = vcmp.eq.f32.partialorder %v2534_v31, 8.507059e+37  ;;  %3029 = vpow2.f32 %v2752_v9 }
0x3803   :  { %v3026_v36 = vpop.eup %3025 }
0x3804   :  { %v2526_v55 = vmul.f32 %v3026_v36, %v2524_v0  ;;  %vm2531_vm15 = vweird.f32 %v3026_v36  ;;  %v3028_v7 = vpop.eup %3027  ;;  %v2646_v0 = vld [vmem:[%s4016_s13 + $0x10] sm:$0xff] }
0x3805   :  { %vm2532_vm2 = vmor %vm2530_vm1, %vm2531_vm15  ;;  %v3030_v11 = vpop.eup %3029 }
0x3806   :  { %v2527_v8 = vsub.f32 1.0, %v2526_v55  ;;  %v1981_v13 = vadd.f32 1.0, %v3030_v11  ;;  %v2644_v55 = vld [vmem:[%s4016_s13] sm:$0xff] }
0x3808   :  { %v2528_v63 = vmul.f32 %v3026_v36, %v2527_v8  ;;  %3031 = vrcp.f32 %v1981_v13  ;;  %v1993_v27 = vand.u32 2147483648, %v1981_v13  ;;  %vm1987_vm4 = vweird.f32 %v1981_v13 }
0x3809   :  { %v1991_v28 = vand.u32 2147483647, %v1981_v13 }
0x380a   :  { %v2529_v56 = vadd.f32 %v3026_v36, %v2528_v63  ;;  %v1994_v33 = vor.u32 1.1754944e-38, %v1993_v27 }
0x380b   :  { %vm1992_vm11 = vcmp.eq.f32.partialorder %v1991_v28, 8.507059e+37 }
0x380c   :  { %v2533_v61 = vsel %vm2532_vm2, %v3026_v36, %v2529_v56  ;;  %v2645_v36 = vld [vmem:[%s4016_s13 + $0x8] sm:$0xff] }
0x380d   :  { %v2538_v2 = vsel %vm2535_vm5, %v2537_v58, %v2533_v61 }
0x380e   :  { %v3032_v4 = vpop.eup %3031  ;;  %v2544_v20 = vmul.f32 %v2542_v19, %v2538_v2 }
0x380f   :  { %v1983_v15 = vmul.f32 %v3032_v4, %v1981_v13  ;;  %vm1988_vm3 = vweird.f32 %v3032_v4 }
0x3810   :  { %vm1989_vm10 = vmor %vm1987_vm4, %vm1988_vm3 }
0x3811   :  { %v1984_v23 = vsub.f32 1.0, %v1983_v15 }
0x3813   :  { %v1985_v39 = vmul.f32 %v3032_v4, %v1984_v23 }
0x386b   :  { %v2547_v1 = vpop.permute.xlu0 %2546 }
0x386c   :  { %v2549_v17 = vmul.f32 %v2547_v1, %v2538_v2 }
0x386e   :  { %2551 = vrot.lane.b32.xlu1 %v2549_v17, %s3258_s3 }
0x3876   :  { %2003 = vrot.lane.b32.xlu1 %v3028_v7, %s3257_s25 }
0x387e   :  { %2124 = vrot.lane.b32.xlu1 %v3847_v46, %s3258_s3  ;;  %v1986_v46 = vadd.f32 %v3032_v4, %v1985_v39  ;;  %v2788_v39 = vld [vmem:[#allocation17] ss:$0 sm:$0xff] }
0x3880   :  { %v1990_v50 = vsel %vm1989_vm10, %v3032_v4, %v1986_v46 }
0x3881   :  { %v1995_v45 = vsel %vm1992_vm11, %v1994_v33, %v1990_v50 }
0x3882   :  { %v2001_v29 = vmul.f32 %v1999_v16, %v1995_v45 }
0x3886   :  { %1871 = vrot.lane.b32.xlu1 %v3843_v38, %s3258_s3 }
0x38e0   :  { %v2552_v22 = vpop.permute.xlu1 %2551 }
0x38e1   :  { %v3930_v18 = vadd.f32 %v2552_v22, %v2544_v20 }
0x38e3   :  { %3033 = vtanh.f32 %v3930_v18 }
0x38e8   :  { %v2004_v24 = vpop.permute.xlu1 %2003 }
0x38e9   :  { %v3034_v38 = vpop.eup %3033  ;;  %v2006_v41 = vmul.f32 %v2004_v24, %v1995_v45 }
0x38ea   :  { %2557 = vrot.lane.b32.xlu2 %v3034_v38, %s3257_s25  ;;  %v2613_v38 = vrot.slane %v3930_v18, 2 }
0x38f0   :  { %v2125_v14 = vpop.permute.xlu1 %2124 }
0x38f1   :  { %2127 = vst.msk [vmem:[#allocation5 + $0x8] sm:$0xc0] %vm489_vm6, %v2125_v14 }
0x38f2   :  { %2008 = vrot.lane.b32.xlu2 %v2006_v41, %s3258_s3 }
0x38f8   :  { %v1872_v37 = vpop.permute.xlu1 %1871 }
0x38f9   :  { %1874 = vst.msk [vmem:[#allocation4 + $0x8] sm:$0xc] %vm339_vm8, %v1872_v37 }
0x38fa   :  { %2198 = vrot.lane.b32.xlu2 %v3874_v48, %s3258_s3 }
0x3902   :  { %1945 = vrot.lane.b32.xlu2 %v3870_v32, %s3258_s3 }
0x3944   :  { %v2558_v40 = vpop.permute.xlu2 %2557 }
0x3945   :  { %v3941_v30 = vmul.f32 %v2558_v40, %v2538_v2 }
0x3947   :  { %v2566_v12 = vrot.slane %v3941_v30, 2 }
0x3949   :  { %2567 = vrot.lane.b32.xlu0 %v2566_v12, %s3258_s3 }
0x394c   :  { %v2009_v51 = vpop.permute.xlu2 %2008 }
0x394d   :  { %v2011_v47 = vadd.f32 %v2009_v51, %v2001_v29 }
0x394f   :  { %3035 = vtanh.f32 %v2011_v47 }
0x3954   :  { %v2199_v52 = vpop.permute.xlu2 %2198 }
0x3955   :  { %v3036_v53 = vpop.eup %3035  ;;  %2201 = vst.msk [vmem:[#allocation5 + $0x8] sm:$0x30] %vm414_vm7, %v2199_v52 }
0x3956   :  { %2014 = vrot.lane.b32.xlu0 %v3036_v53, %s3257_s25 }
0x395c   :  { %v1946_v32 = vpop.permute.xlu2 %1945 }
0x395d   :  { %1948 = vst.msk [vmem:[#allocation4 + $0x8] sm:$0x30] %vm414_vm7, %v1946_v32 }
0x395e   :  { %2272 = vrot.lane.b32.xlu0 %v3890_v5, %s3258_s3  ;;  %v2650_v5 = vld [vmem:[%s4016_s13 + $0x30] sm:$0xff]  ;;  %s3259_s13 = smov [#allocation18]  }
0x395f   :  { %2669 = vmatpush.msrb.mxu1 %v2650_v5  ;;  %s2687_s19 = sshll.u32 %s3259_s13, 4  ;;  %s2688_s19 = int_to_ptr.vmem [resolvable:$true] %s2687_s19 }
0x3961   :  { %2670 = vmatpush.msrb.mxu1 %v2649_v54 }
0x3963   :  { %2671 = vmatpush.msrb.mxu1 %v2648_v44 }
0x3965   :  { %2672 = vmatpush.msrb.mxu1 %v2647_v49 }
0x3967   :  { %2673 = vmatpush.msrb.mxu1 %v2646_v0 }
0x3969   :  { %2674 = vmatpush.msrb.mxu1 %v2645_v36 }
0x396b   :  { %2675 = vmatpush.msrb.mxu1 %v2644_v55 }
0x39bb   :  { %v2568_v48 = vpop.permute.xlu0 %2567 }
0x39bc   :  { %2768 = vmatmul.msk.f32.vlgmr.msra.gmra.mxu0 %vm168_vm0, %v2568_v48 }
0x39c8   :  { %v2015_v21 = vpop.permute.xlu0 %2014 }
0x39c9   :  { %v2017_v42 = vmul.f32 %v2015_v21, %v1995_v45 }
0x39cb   :  { %2019 = vrot.lane.b32.xlu0 %v2017_v42, %s3258_s3 }
0x39d0   :  { %v2273_v26 = vpop.permute.xlu0 %2272 }
0x39d1   :  { %2275 = vst.msk [vmem:[#allocation5 + $0x8] sm:$0xc] %vm339_vm8, %v2273_v26 }
0x39d8   :  { %v2638_v35 = vld [vmem:[#allocation5 + $0x8] sm:$0xff] }
0x39d9   :  { %2640 = vrot.lane.b32.xlu1 %v2638_v35, %s3258_s3 }
0x3a39   :  { %v2588_v8 = vpop.f32.mrf.mxu0 }
0x3a3a   :  { %v2591_v63 = vadd.f32 %v2588_v8, %v3776_v3 }
0x3a3c   :  { %3037 = vtanh.f32 %v2591_v63  ;;  %v2769_v3 = vmul.f32 -1.442695, %v2591_v63 }
0x3a3d   :  { %v2020_v56 = vpop.permute.xlu0 %2019 }
0x3a3e   :  { %2022 = vst.msk [vmem:[#allocation4 + $0x8] sm:$0xc0] %vm489_vm6, %v2020_v56  ;;  %3039 = vpow2.f32 %v2769_v3 }
0x3a42   :  { %v3038_v57 = vpop.eup %3037 }
0x3a43   :  { %2617 = vrot.lane.b32.xlu2 %v3038_v57, %s3257_s25 }
0x3a44   :  { %v3040_v62 = vpop.eup %3039 }
0x3a45   :  { %v2637_v60 = vld [vmem:[#allocation4 + $0x8] sm:$0xff]  ;;  %v2595_v1 = vadd.f32 1.0, %v3040_v62 }
0x3a47   :  { %3041 = vrcp.f32 %v2595_v1  ;;  %v2607_v11 = vand.u32 2147483648, %v2595_v1  ;;  %vm2601_vm7 = vweird.f32 %v2595_v1  ;;  %v2605_v13 = vand.u32 2147483647, %v2595_v1 }
0x3a49   :  { %v2608_v15 = vor.u32 1.1754944e-38, %v2607_v11  ;;  %vm2606_vm8 = vcmp.eq.f32.partialorder %v2605_v13, 8.507059e+37 }
0x3a4b   :  { %1581 = vrot.lane.b32.xlu2 %v3711_v10, %s3258_s3  ;;  %v2641_v31 = vpop.permute.xlu1 %2640 }
0x3a4c   :  { %v2643_v61 = vsel %vm168_vm0, %v2637_v60, %v2641_v31 }
0x3a4d   :  { %v2657_v58 = vrot.slane %v2643_v61, 6  ;;  %v3042_v2 = vpop.eup %3041 }
0x3a4e   :  { %v2597_v17 = vmul.f32 %v3042_v2, %v2595_v1  ;;  %vm2602_vm6 = vweird.f32 %v3042_v2 }
0x3a4f   :  { %2770 = vmatmul.msk.f32.vlgmr.msrb.gmra.mxu1 %vm1417_vm9, %v2657_v58  ;;  %vm2603_vm0 = vmor %vm2601_vm7, %vm2602_vm6  ;;  %vm2680_vm9 = vcmask 25600  }
0x3a50   :  { %v2598_v7 = vsub.f32 1.0, %v2597_v17 }
0x3a52   :  { %v2599_v9 = vmul.f32 %v3042_v2, %v2598_v7 }
0x3a53   :  { %2414 = vrot.lane.b32.xlu2 %v3906_v6, %s3258_s3 }
0x3a54   :  { %v2600_v10 = vadd.f32 %v3042_v2, %v2599_v9 }
0x3a56   :  { %v2604_v4 = vsel %vm2603_vm0, %v3042_v2, %v2600_v10 }
0x3a57   :  { %v2609_v19 = vsel %vm2606_vm8, %v2608_v15, %v2604_v4 }
0x3a58   :  { %v2615_v27 = vmul.f32 %v2613_v38, %v2609_v19 }
0x3a9d   :  { %v2618_v6 = vpop.permute.xlu2 %2617 }
0x3a9e   :  { %v2620_v20 = vmul.f32 %v2618_v6, %v2609_v19 }
0x3aa0   :  { %2622 = vrot.lane.b32.xlu0 %v2620_v20, %s3258_s3 }
0x3aa5   :  { %v1582_v22 = vpop.permute.xlu2 %1581 }
0x3aa8   :  { %1655 = vrot.lane.b32.xlu0 %v3726_v59, %s3258_s3 }
0x3aad   :  { %v2415_v23 = vpop.permute.xlu2 %2414 }
0x3ab0   :  { %2488 = vrot.lane.b32.xlu0 %v3915_v25, %s3258_s3 }
0x3acc   :  { %v2677_v46 = vpop.f32.mrf.mxu1 }
0x3acd   :  { %v2678_v24 = vadd.f32 %v2788_v39, %v2677_v46 }
0x3acf   :  { %2681 = vst.msk [vmem:[#allocation18] sm:$0x3] %vm2680_vm9, %v2678_v24 }
0x3ad0   :  { %2692 = dma.vmem_to_hbm [thread:$0]  %s2688_s19, 32, %s2690_s21, [#allocation8]  }
0x3b12   :  { %v2623_v28 = vpop.permute.xlu0 %2622 }
0x3b13   :  { %v2625_v50 = vadd.f32 %v2623_v28, %v2615_v27 }
0x3b15   :  { %3043 = vtanh.f32 %v2625_v50 }
0x3b1a   :  { %v1656_v33 = vpop.permute.xlu0 %1655 }
0x3b1b   :  { %v3044_v45 = vpop.eup %3043 }
0x3b1c   :  { %2628 = vrot.lane.b32.xlu1 %v3044_v45, %s3257_s25 }
0x3b22   :  { %v2489_v59 = vpop.permute.xlu0 %2488 }
0x3b24   :  { %1729 = vrot.lane.b32.xlu1 %v3759_v34, %s3258_s3 }
0x3b2c   :  { %2562 = vrot.lane.b32.xlu1 %v3941_v30, %s3258_s3 }
0x3b8e   :  { %v2629_v25 = vpop.permute.xlu1 %2628 }
0x3b8f   :  { %v2631_v18 = vmul.f32 %v2629_v25, %v2609_v19 }
0x3b91   :  { %2633 = vrot.lane.b32.xlu2 %v2631_v18, %s3258_s3 }
0x3b96   :  { %v1730_v41 = vpop.permute.xlu1 %1729 }
0x3b9e   :  { %v2563_v14 = vpop.permute.xlu1 %2562 }
0x3beb   :  { %v2634_v37 = vpop.permute.xlu2 %2633 }
0x3bec   :  { %3245 = dma.done.wait [#allocation8], 32  }
0x3bed   :  { %3246 = vsyncadd [#allocation8], 4294967264 }
0x3bee   :  { %2697 = vsyncpa [#allocation7], 1 }
0x3bef   :  { %2698 = vsyncpa [#allocation10], 1 }
0x3bf0   :  { %2699 = vsyncpa [#allocation13], 1 }
0x3bf1   :  { %2700 = vsyncpa [#allocation16], 1 }
0x3bf2   :  { %2701 = vsyncpa [#allocation8], 1 }

</bundles_post_ra>
